<compile_context>
chip_gen: v5e
topology: v5e:2x2
jax: 0.10.0
libtpu: 0.0.40
codegen_flags: <defaults>
</compile_context>

<pallas_src>
import functools

import jax
import jax.numpy as jnp
from jax import lax
from jax.experimental import pallas as pl
from jax.experimental.pallas import tpu as pltpu

LANE = 128
# Per-grid-step patch-row tile for kernel A.  4*TILE_M*128 bf16 = 128 KiB per buffer,
# so double-buffered inputs + weights stay far below v5e's 16 MiB scoped-VMEM default
# and v7x's per-core budget, while each step is a full-vreg, lane-dense MXU tile.
TILE_M = 256


def _round_up(x, m):
    return (x + m - 1) // m * m


# ---------------------------------------------------------------------------
# Kernel A: conv1 GEMM + bias + ReLU + 2x2 maxpool, gridded over patch rows.
# ---------------------------------------------------------------------------

def _conv_pool_kernel(p_ref, w_ref, b_ref, o_ref):
    # p: (4, TILE_M, 128) bf16 im2col patches; leading dim = the four 2x2-pool phases
    #    (dh, dw), identically row-ordered inside each phase.
    # w: (128, 128) bf16 zero-padded conv1 weight, b: (1, 128) f32 zero-padded bias.
    # o: (TILE_M, 128) bf16 = maxpool2x2(relu(conv1)) with channels on lanes.
    w = w_ref[...]
    b = b_ref[...]

    def phase(i):
        return jnp.maximum(
            jnp.dot(p_ref[i], w, preferred_element_type=jnp.float32) + b, 0.0)

    # Pool = elementwise max over the 4 phase blocks (pure VPU, no XLU shuffles).
    pooled = jnp.maximum(jnp.maximum(phase(0), phase(1)),
                         jnp.maximum(phase(2), phase(3)))
    o_ref[...] = pooled.astype(o_ref.dtype)


def conv_relu_pool(patches, w, b, *, tile_m):
    rows = patches.shape[1]
    return pl.pallas_call(
        _conv_pool_kernel,
        out_shape=jax.ShapeDtypeStruct((rows, LANE), jnp.bfloat16),
        grid=(rows // tile_m,),
        in_specs=[pl.BlockSpec((4, tile_m, LANE), lambda i: (0, i, 0)),
                  pl.BlockSpec((LANE, LANE), lambda i: (0, 0)),
                  pl.BlockSpec((1, LANE), lambda i: (0, 0))],
        out_specs=pl.BlockSpec((tile_m, LANE), lambda i: (i, 0)),
        compiler_params=pltpu.CompilerParams(
            dimension_semantics=("parallel",)),
    )(patches, w, b)


# ---------------------------------------------------------------------------
# Kernel B: conv2 GEMM + bias + ReLU + 2x2 maxpool + fc1 + fc2 + fc3, fused.
# ---------------------------------------------------------------------------

def _conv_pool_fc_kernel(p_ref, w2_ref, b2_ref, wf1_ref, bf1_ref, wf2_ref, bf2_ref,
                         wf3_ref, bf3_ref, o_ref, a_ref, *, slab, n_spatial):
    # conv2: bf16 GEMM (f32 accumulate) + bias + ReLU per pool phase, folded straight
    # into the pool max so only one (n_spatial*slab, 128) f32 slab stays live.
    w2 = w2_ref[...]
    b2 = b2_ref[...]

    def phase(i):
        return jnp.maximum(
            jnp.dot(p_ref[i], w2, preferred_element_type=jnp.float32) + b2, 0.0)

    pooled = phase(0)
    for i in range(1, 4):
        pooled = jnp.maximum(pooled, phase(i))
    a_ref[...] = pooled                      # rows ordered (spatial, sample-slab)

    # fc1: PyTorch's NCHW flatten folded into per-spatial (128,128) weight slabs.
    # Every read is an aligned (slab, 128) f32 tile (slab is a multiple of 8), cast to
    # bf16 for the MXU.  Padded slab rows only produce padded-batch output rows.
    # NOTE: on v6e/v7x this loop could be halved by stacking slab pairs along K=256
    # (block-diagonal w2 / paired patches); skipped here to keep the layout simple.
    acc = jnp.zeros((slab, LANE), jnp.float32)
    for s in range(n_spatial):
        xs = a_ref[s * slab:(s + 1) * slab, :].astype(jnp.bfloat16)
        acc = acc + jnp.dot(xs, wf1_ref[s], preferred_element_type=jnp.float32)
    x = jnp.maximum(acc + bf1_ref[...], 0.0)

    # fc2 -> fc3 chained on VMEM-resident, 128-padded bf16 weights.
    x = jnp.maximum(
        jnp.dot(x.astype(jnp.bfloat16), wf2_ref[...],
                preferred_element_type=jnp.float32) + bf2_ref[...], 0.0)
    x = jnp.dot(x.astype(jnp.bfloat16), wf3_ref[...],
                preferred_element_type=jnp.float32) + bf3_ref[...]
    o_ref[...] = x.astype(o_ref.dtype)


def conv_pool_fc(patches, pk, *, slab, n_spatial):
    kernel = functools.partial(_conv_pool_fc_kernel, slab=slab, n_spatial=n_spatial)
    vmem = pl.BlockSpec(memory_space=pltpu.MemorySpace.VMEM)
    return pl.pallas_call(
        kernel,
        out_shape=jax.ShapeDtypeStruct((slab, LANE), jnp.float32),
        in_specs=[vmem] * 9,
        out_specs=vmem,
        scratch_shapes=[pltpu.VMEM((n_spatial * slab, LANE), jnp.float32)],
    )(patches, pk["w2"], pk["b2"], pk["wf1"], pk["bf1"],
      pk["wf2"], pk["bf2"], pk["wf3"], pk["bf3"])


# ---------------------------------------------------------------------------
# Wrapper glue: pool-phase-grouped, K-padded, bf16 im2col (one gather per conv).
# ---------------------------------------------------------------------------

def _pooled_patches(x, ksize, *, dn, k_pad, sample_major, rows_pad=None, slab=None):
    """im2col patches pre-grouped by 2x2-maxpool phase, K-padded, bf16.

    Returns (4, R, k_pad): block dh*2+dw holds the conv patches of output positions
    (2*hp+dh, 2*wp+dw); features ordered (c, kh, kw) to match PyTorch weight.view(Cout,-1).
      sample_major=True : rows ordered (n, hp, wp), zero-padded to rows_pad rows.
      sample_major=False: rows ordered (hp*Wp+wp, sample) with every spatial slab padded
                          to `slab` rows (so kernel B's fc1 reads are sublane-aligned).
    """
    p = lax.conv_general_dilated_patches(x, (ksize, ksize), (1, 1), "VALID",
                                         dimension_numbers=dn)     # (N, Ho, Wo, C*k*k)
    N, Ho, Wo, K = p.shape
    Hp, Wp = Ho // 2, Wo // 2
    p = p.reshape(N, Hp, 2, Wp, 2, K)
    if sample_major:
        p = p.transpose(2, 4, 0, 1, 3, 5).reshape(4, N * Hp * Wp, K)
        p = jnp.pad(p, ((0, 0), (0, rows_pad - N * Hp * Wp), (0, k_pad - K)))
    else:
        p = p.transpose(2, 4, 1, 3, 0, 5).reshape(4, Hp * Wp, N, K)
        p = jnp.pad(p, ((0, 0), (0, 0), (0, slab - N), (0, k_pad - K)))
        p = p.reshape(4, Hp * Wp * slab, k_pad)
    return p.astype(jnp.bfloat16)


# ---------------------------------------------------------------------------
# Net forward (matches the PyTorch module)
# ---------------------------------------------------------------------------

def net_forward(packed, x_nchw):
    n = x_nchw.shape[0]
    x = x_nchw.astype(jnp.bfloat16)          # bf16 MXU operands; cast once, outside kernels

    # conv1 -> relu -> pool : kernel A, gridded + pipelined over pooled patch rows.
    rows1 = n * 14 * 14
    rows1p = _round_up(rows1, TILE_M)
    p1 = _pooled_patches(x, 5, dn=("NCHW", "OIHW", "NHWC"), k_pad=LANE,
                         sample_major=True, rows_pad=rows1p)          # (4, rows1p, 128)
    a1 = conv_relu_pool(p1, packed["w1"], packed["b1"], tile_m=TILE_M)  # (rows1p, 128) bf16

    # conv2 -> relu -> pool -> fc1 -> fc2 -> fc3 : kernel B, fully fused in VMEM.
    # TODO(synk): fusing the conv2 patch gather into kernel B (so a1 never touches HBM)
    # would need an in-kernel gather; kept as XLA glue with a bf16 a1 instead.
    a1_img = a1[:rows1, :6].reshape(n, 14, 14, 6)                      # NHWC, bf16
    slab = _round_up(n, 8)
    p2 = _pooled_patches(a1_img, 5, dn=("NHWC", "HWIO", "NHWC"), k_pad=2 * LANE,
                         sample_major=False, slab=slab)                # (4, 25*slab, 256)
    logits = conv_pool_fc(p2, packed, slab=slab, n_spatial=25)         # (slab, 128) f32
    return logits[:n, :10]


# ---------------------------------------------------------------------------
# Parameters: PyTorch-layout init + one-time repack into padded bf16 GEMM operands.
# ---------------------------------------------------------------------------

def pack_params(params):
    """Repack PyTorch-layout params once into lane-dense, K-padded bf16 GEMM operands."""

    def pad_mat(m, rows):
        out = jnp.zeros((rows, LANE), jnp.float32)
        out = out.at[:m.shape[0], :m.shape[1]].set(m.astype(jnp.float32))
        return out.astype(jnp.bfloat16)

    def pad_vec(v):
        return jnp.zeros((1, LANE), jnp.float32).at[0, :v.shape[0]].set(v.astype(jnp.float32))

    pk = {}
    pk["w1"] = pad_mat(params["conv1_w"].reshape(6, 75).T, LANE)             # (128, 128) bf16
    pk["b1"] = pad_vec(params["conv1_b"])                                    # (1, 128) f32
    pk["w2"] = pad_mat(params["conv2_w"].reshape(16, 150).T, 2 * LANE)       # (256, 128) bf16
    pk["b2"] = pad_vec(params["conv2_b"])
    # fc1 consumes the NCHW flatten (feature f = c*25 + h*5 + w): split its weight into
    # one (C, 120) slab per spatial position s = h*5 + w, padded to (128, 128).
    wf1 = params["fc1_w"].T.reshape(16, 25, 120).transpose(1, 0, 2)          # (s, c, j)
    pk["wf1"] = (jnp.zeros((25, LANE, LANE), jnp.float32)
                 .at[:, :16, :120].set(wf1).astype(jnp.bfloat16))
    pk["bf1"] = pad_vec(params["fc1_b"])
    pk["wf2"] = pad_mat(params["fc2_w"].T, LANE)                             # (128, 128) bf16
    pk["bf2"] = pad_vec(params["fc2_b"])
    pk["wf3"] = pad_mat(params["fc3_w"].T, LANE)                             # (128, 128) bf16
    pk["bf3"] = pad_vec(params["fc3_b"])
    return pk


def _uniform(key, shape, bound):
    return jax.random.uniform(key, shape, jnp.float32, -bound, bound)


def init_params(key):
    ks = jax.random.split(key, 10)
    p = {}
    b = 1.0 / (3 * 5 * 5) ** 0.5
    p["conv1_w"] = _uniform(ks[0], (6, 3, 5, 5), b)
    p["conv1_b"] = _uniform(ks[1], (6,), b)
    b = 1.0 / (6 * 5 * 5) ** 0.5
    p["conv2_w"] = _uniform(ks[2], (16, 6, 5, 5), b)
    p["conv2_b"] = _uniform(ks[3], (16,), b)
    b = 1.0 / 400 ** 0.5
    p["fc1_w"] = _uniform(ks[4], (120, 400), b)
    p["fc1_b"] = _uniform(ks[5], (120,), b)
    b = 1.0 / 120 ** 0.5
    p["fc2_w"] = _uniform(ks[6], (84, 120), b)
    p["fc2_b"] = _uniform(ks[7], (84,), b)
    b = 1.0 / 84 ** 0.5
    p["fc3_w"] = _uniform(ks[8], (10, 84), b)
    p["fc3_b"] = _uniform(ks[9], (10,), b)
    return p


def reference_forward(params, x):
    """Pure-XLA f32 reference mirroring the PyTorch module (numerics self-check)."""
    dn = ("NCHW", "OIHW", "NCHW")
    y = lax.conv_general_dilated(x, params["conv1_w"], (1, 1), "VALID", dimension_numbers=dn)
    y = jnp.maximum(y + params["conv1_b"][None, :, None, None], 0.0)
    y = lax.reduce_window(y, -jnp.inf, lax.max, (1, 1, 2, 2), (1, 1, 2, 2), "VALID")
    y = lax.conv_general_dilated(y, params["conv2_w"], (1, 1), "VALID", dimension_numbers=dn)
    y = jnp.maximum(y + params["conv2_b"][None, :, None, None], 0.0)
    y = lax.reduce_window(y, -jnp.inf, lax.max, (1, 1, 2, 2), (1, 1, 2, 2), "VALID")
    y = y.reshape(y.shape[0], -1)                               # NCHW flatten == PyTorch .view
    y = jnp.maximum(y @ params["fc1_w"].T + params["fc1_b"], 0.0)
    y = jnp.maximum(y @ params["fc2_w"].T + params["fc2_b"], 0.0)
    return y @ params["fc3_w"].T + params["fc3_b"]


if __name__ == "__main__":
    key = jax.random.PRNGKey(0)
    pkey, xkey = jax.random.split(key)
    params = init_params(pkey)
    packed = pack_params(params)                 # pad / permute / bf16-cast weights once
    # Module implies CIFAR-sized inputs: (N, 3, 32, 32). Small batch = 2.
    x = jax.random.normal(xkey, (2, 3, 32, 32), jnp.float32)

    out = jax.jit(net_forward)(packed, x)
    out = jax.block_until_ready(out)

    assert out.shape == (2, 10) and out.dtype == jnp.float32
    ref = reference_forward(params, x)
    # bf16 MXU operands (f32 accumulation) -> looser tolerance vs the pure-f32 reference.
    assert bool(jnp.allclose(out, ref, atol=1e-1, rtol=1e-1)), "mismatch vs XLA reference"
    print("KERNEL_OK")
</pallas_src>

<mosaic_0001>
module attributes {stable_mosaic.version = 11 : i64} {
  func.func @_conv_pool_kernel(%arg0: i32, %arg1: memref<4x256x128xbf16, #tpu.memory_space<vmem>>, %arg2: memref<128x128xbf16, #tpu.memory_space<vmem>>, %arg3: memref<1x128xf32, #tpu.memory_space<vmem>>, %arg4: memref<256x128xbf16, #tpu.memory_space<vmem>>) attributes {dimension_semantics = [#tpu.dimension_semantics<parallel>], iteration_bounds = array<i64: 2>, scalar_prefetch = 0 : i64, scratch_operands = 0 : i64, tpu.core_type = #tpu.core_type<tc>, window_params = [{transform_indices = @transform_0, window_bounds = array<i64: 4, 256, 128>}, {pipeline_mode = #tpu.pipeline_mode<synchronous>, transform_indices = @transform_1, window_bounds = array<i64: 128, 128>}, {pipeline_mode = #tpu.pipeline_mode<synchronous>, transform_indices = @transform_2, window_bounds = array<i64: 1, 128>}, {transform_indices = @transform_3, window_bounds = array<i64: 256, 128>}]} {
    %c0 = arith.constant 0 : index
    %c0_0 = arith.constant 0 : index
    %0 = vector.load %arg2[%c0, %c0_0] : memref<128x128xbf16, #tpu.memory_space<vmem>>, vector<128x128xbf16>
    %c0_1 = arith.constant 0 : index
    %c0_2 = arith.constant 0 : index
    %1 = vector.load %arg3[%c0_1, %c0_2] : memref<1x128xf32, #tpu.memory_space<vmem>>, vector<1x128xf32>
    %c0_3 = arith.constant 0 : index
    %c0_4 = arith.constant 0 : index
    %c0_5 = arith.constant 0 : index
    %2 = vector.load %arg1[%c0_3, %c0_4, %c0_5] : memref<4x256x128xbf16, #tpu.memory_space<vmem>>, vector<1x256x128xbf16>
    %3 = vector.shape_cast %2 : vector<1x256x128xbf16> to vector<256x128xbf16>
    %cst = arith.constant dense<0.000000e+00> : vector<256x128xf32>
    %4 = tpu.matmul %3, %0, %cst {dimension_numbers = #tpu.dot_dimension_numbers<[1], [0], [0], [1], [0, 0, 1, 1], [], []>} : vector<256x128xbf16>, vector<128x128xbf16>, vector<256x128xf32> -> vector<256x128xf32>
    %5 = vector.broadcast %1 : vector<1x128xf32> to vector<256x128xf32>
    %6 = arith.addf %4, %5 : vector<256x128xf32>
    %cst_6 = arith.constant 0.000000e+00 : f32
    %7 = vector.broadcast %cst_6 : f32 to vector<256x128xf32>
    %8 = arith.maximumf %6, %7 : vector<256x128xf32>
    %c1 = arith.constant 1 : index
    %c0_7 = arith.constant 0 : index
    %c0_8 = arith.constant 0 : index
    %9 = vector.load %arg1[%c1, %c0_7, %c0_8] : memref<4x256x128xbf16, #tpu.memory_space<vmem>>, vector<1x256x128xbf16>
    %10 = vector.shape_cast %9 : vector<1x256x128xbf16> to vector<256x128xbf16>
    %cst_9 = arith.constant dense<0.000000e+00> : vector<256x128xf32>
    %11 = tpu.matmul %10, %0, %cst_9 {dimension_numbers = #tpu.dot_dimension_numbers<[1], [0], [0], [1], [0, 0, 1, 1], [], []>} : vector<256x128xbf16>, vector<128x128xbf16>, vector<256x128xf32> -> vector<256x128xf32>
    %12 = vector.broadcast %1 : vector<1x128xf32> to vector<256x128xf32>
    %13 = arith.addf %11, %12 : vector<256x128xf32>
    %cst_10 = arith.constant 0.000000e+00 : f32
    %14 = vector.broadcast %cst_10 : f32 to vector<256x128xf32>
    %15 = arith.maximumf %13, %14 : vector<256x128xf32>
    %16 = arith.maximumf %8, %15 : vector<256x128xf32>
    %c2 = arith.constant 2 : index
    %c0_11 = arith.constant 0 : index
    %c0_12 = arith.constant 0 : index
    %17 = vector.load %arg1[%c2, %c0_11, %c0_12] : memref<4x256x128xbf16, #tpu.memory_space<vmem>>, vector<1x256x128xbf16>
    %18 = vector.shape_cast %17 : vector<1x256x128xbf16> to vector<256x128xbf16>
    %cst_13 = arith.constant dense<0.000000e+00> : vector<256x128xf32>
    %19 = tpu.matmul %18, %0, %cst_13 {dimension_numbers = #tpu.dot_dimension_numbers<[1], [0], [0], [1], [0, 0, 1, 1], [], []>} : vector<256x128xbf16>, vector<128x128xbf16>, vector<256x128xf32> -> vector<256x128xf32>
    %20 = vector.broadcast %1 : vector<1x128xf32> to vector<256x128xf32>
    %21 = arith.addf %19, %20 : vector<256x128xf32>
    %cst_14 = arith.constant 0.000000e+00 : f32
    %22 = vector.broadcast %cst_14 : f32 to vector<256x128xf32>
    %23 = arith.maximumf %21, %22 : vector<256x128xf32>
    %c3 = arith.constant 3 : index
    %c0_15 = arith.constant 0 : index
    %c0_16 = arith.constant 0 : index
    %24 = vector.load %arg1[%c3, %c0_15, %c0_16] : memref<4x256x128xbf16, #tpu.memory_space<vmem>>, vector<1x256x128xbf16>
    %25 = vector.shape_cast %24 : vector<1x256x128xbf16> to vector<256x128xbf16>
    %cst_17 = arith.constant dense<0.000000e+00> : vector<256x128xf32>
    %26 = tpu.matmul %25, %0, %cst_17 {dimension_numbers = #tpu.dot_dimension_numbers<[1], [0], [0], [1], [0, 0, 1, 1], [], []>} : vector<256x128xbf16>, vector<128x128xbf16>, vector<256x128xf32> -> vector<256x128xf32>
    %27 = vector.broadcast %1 : vector<1x128xf32> to vector<256x128xf32>
    %28 = arith.addf %26, %27 : vector<256x128xf32>
    %cst_18 = arith.constant 0.000000e+00 : f32
    %29 = vector.broadcast %cst_18 : f32 to vector<256x128xf32>
    %30 = arith.maximumf %28, %29 : vector<256x128xf32>
    %31 = arith.maximumf %23, %30 : vector<256x128xf32>
    %32 = arith.maximumf %16, %31 : vector<256x128xf32>
    %33 = arith.truncf %32 : vector<256x128xf32> to vector<256x128xbf16>
    %c0_19 = arith.constant 0 : index
    %c0_20 = arith.constant 0 : index
    %34 = vector.load %arg4[%c0_19, %c0_20] : memref<256x128xbf16, #tpu.memory_space<vmem>>, vector<256x128xbf16>
    tpu.vector_store %arg4[%c0_19, %c0_20], %33 {strides = array<i32>} : memref<256x128xbf16, #tpu.memory_space<vmem>>, vector<256x128xbf16>,
    return
  }
  func.func @transform_0(%arg0: i32) -> (i32, i32, i32) {
    %c0_i32 = arith.constant 0 : i32
    %c0_i32_0 = arith.constant 0 : i32
    %c0_i32_1 = arith.constant 0 : i32
    return %c0_i32, %arg0, %c0_i32_0 : i32, i32, i32
  }
  func.func @transform_1(%arg0: i32) -> (i32, i32) {
    %c0_i32 = arith.constant 0 : i32
    %c0_i32_0 = arith.constant 0 : i32
    %c0_i32_1 = arith.constant 0 : i32
    return %c0_i32, %c0_i32_0 : i32, i32
  }
  func.func @transform_2(%arg0: i32) -> (i32, i32) {
    %c0_i32 = arith.constant 0 : i32
    %c0_i32_0 = arith.constant 0 : i32
    %c0_i32_1 = arith.constant 0 : i32
    return %c0_i32, %c0_i32_0 : i32, i32
  }
  func.func @transform_3(%arg0: i32) -> (i32, i32) {
    %c0_i32 = arith.constant 0 : i32
    %c0_i32_0 = arith.constant 0 : i32
    return %arg0, %c0_i32 : i32, i32
  }
}

module attributes {stable_mosaic.version = 11 : i64} {
  func.func @_conv_pool_fc_kernel(%arg0: memref<4x200x256xbf16, #tpu.memory_space<vmem>>, %arg1: memref<256x128xbf16, #tpu.memory_space<vmem>>, %arg2: memref<1x128xf32, #tpu.memory_space<vmem>>, %arg3: memref<25x128x128xbf16, #tpu.memory_space<vmem>>, %arg4: memref<1x128xf32, #tpu.memory_space<vmem>>, %arg5: memref<128x128xbf16, #tpu.memory_space<vmem>>, %arg6: memref<1x128xf32, #tpu.memory_space<vmem>>, %arg7: memref<128x128xbf16, #tpu.memory_space<vmem>>, %arg8: memref<1x128xf32, #tpu.memory_space<vmem>>, %arg9: memref<8x128xf32, #tpu.memory_space<vmem>>, %arg10: memref<200x128xf32, #tpu.memory_space<vmem>>) attributes {dimension_semantics = [], scalar_prefetch = 0 : i64, scratch_operands = 1 : i64, tpu.core_type = #tpu.core_type<tc>} {
    %c0 = arith.constant 0 : index
    %c0_0 = arith.constant 0 : index
    %0 = vector.load %arg1[%c0, %c0_0] : memref<256x128xbf16, #tpu.memory_space<vmem>>, vector<256x128xbf16>
    %c0_1 = arith.constant 0 : index
    %c0_2 = arith.constant 0 : index
    %1 = vector.load %arg2[%c0_1, %c0_2] : memref<1x128xf32, #tpu.memory_space<vmem>>, vector<1x128xf32>
    %c0_3 = arith.constant 0 : index
    %c0_4 = arith.constant 0 : index
    %c0_5 = arith.constant 0 : index
    %2 = vector.load %arg0[%c0_3, %c0_4, %c0_5] : memref<4x200x256xbf16, #tpu.memory_space<vmem>>, vector<1x200x256xbf16>
    %3 = vector.shape_cast %2 : vector<1x200x256xbf16> to vector<200x256xbf16>
    %cst = arith.constant dense<0.000000e+00> : vector<200x128xf32>
    %4 = tpu.matmul %3, %0, %cst {dimension_numbers = #tpu.dot_dimension_numbers<[1], [0], [0], [1], [0, 0, 1, 1], [], []>} : vector<200x256xbf16>, vector<256x128xbf16>, vector<200x128xf32> -> vector<200x128xf32>
    %5 = vector.broadcast %1 : vector<1x128xf32> to vector<200x128xf32>
    %6 = arith.addf %4, %5 : vector<200x128xf32>
    %cst_6 = arith.constant 0.000000e+00 : f32
    %7 = vector.broadcast %cst_6 : f32 to vector<200x128xf32>
    %8 = arith.maximumf %6, %7 : vector<200x128xf32>
    %c1 = arith.constant 1 : index
    %c0_7 = arith.constant 0 : index
    %c0_8 = arith.constant 0 : index
    %9 = vector.load %arg0[%c1, %c0_7, %c0_8] : memref<4x200x256xbf16, #tpu.memory_space<vmem>>, vector<1x200x256xbf16>
    %10 = vector.shape_cast %9 : vector<1x200x256xbf16> to vector<200x256xbf16>
    %cst_9 = arith.constant dense<0.000000e+00> : vector<200x128xf32>
    %11 = tpu.matmul %10, %0, %cst_9 {dimension_numbers = #tpu.dot_dimension_numbers<[1], [0], [0], [1], [0, 0, 1, 1], [], []>} : vector<200x256xbf16>, vector<256x128xbf16>, vector<200x128xf32> -> vector<200x128xf32>
    %12 = vector.broadcast %1 : vector<1x128xf32> to vector<200x128xf32>
    %13 = arith.addf %11, %12 : vector<200x128xf32>
    %cst_10 = arith.constant 0.000000e+00 : f32
    %14 = vector.broadcast %cst_10 : f32 to vector<200x128xf32>
    %15 = arith.maximumf %13, %14 : vector<200x128xf32>
    %16 = arith.maximumf %8, %15 : vector<200x128xf32>
    %c2 = arith.constant 2 : index
    %c0_11 = arith.constant 0 : index
    %c0_12 = arith.constant 0 : index
    %17 = vector.load %arg0[%c2, %c0_11, %c0_12] : memref<4x200x256xbf16, #tpu.memory_space<vmem>>, vector<1x200x256xbf16>
    %18 = vector.shape_cast %17 : vector<1x200x256xbf16> to vector<200x256xbf16>
    %cst_13 = arith.constant dense<0.000000e+00> : vector<200x128xf32>
    %19 = tpu.matmul %18, %0, %cst_13 {dimension_numbers = #tpu.dot_dimension_numbers<[1], [0], [0], [1], [0, 0, 1, 1], [], []>} : vector<200x256xbf16>, vector<256x128xbf16>, vector<200x128xf32> -> vector<200x128xf32>
    %20 = vector.broadcast %1 : vector<1x128xf32> to vector<200x128xf32>
    %21 = arith.addf %19, %20 : vector<200x128xf32>
    %cst_14 = arith.constant 0.000000e+00 : f32
    %22 = vector.broadcast %cst_14 : f32 to vector<200x128xf32>
    %23 = arith.maximumf %21, %22 : vector<200x128xf32>
    %24 = arith.maximumf %16, %23 : vector<200x128xf32>
    %c3 = arith.constant 3 : index
    %c0_15 = arith.constant 0 : index
    %c0_16 = arith.constant 0 : index
    %25 = vector.load %arg0[%c3, %c0_15, %c0_16] : memref<4x200x256xbf16, #tpu.memory_space<vmem>>, vector<1x200x256xbf16>
    %26 = vector.shape_cast %25 : vector<1x200x256xbf16> to vector<200x256xbf16>
    %cst_17 = arith.constant dense<0.000000e+00> : vector<200x128xf32>
    %27 = tpu.matmul %26, %0, %cst_17 {dimension_numbers = #tpu.dot_dimension_numbers<[1], [0], [0], [1], [0, 0, 1, 1], [], []>} : vector<200x256xbf16>, vector<256x128xbf16>, vector<200x128xf32> -> vector<200x128xf32>
    %28 = vector.broadcast %1 : vector<1x128xf32> to vector<200x128xf32>
    %29 = arith.addf %27, %28 : vector<200x128xf32>
    %cst_18 = arith.constant 0.000000e+00 : f32
    %30 = vector.broadcast %cst_18 : f32 to vector<200x128xf32>
    %31 = arith.maximumf %29, %30 : vector<200x128xf32>
    %32 = arith.maximumf %24, %31 : vector<200x128xf32>
    %c0_19 = arith.constant 0 : index
    %c0_20 = arith.constant 0 : index
    %33 = vector.load %arg10[%c0_19, %c0_20] : memref<200x128xf32, #tpu.memory_space<vmem>>, vector<200x128xf32>
    tpu.vector_store %arg10[%c0_19, %c0_20], %32 {strides = array<i32>} : memref<200x128xf32, #tpu.memory_space<vmem>>, vector<200x128xf32>,
    %cst_21 = arith.constant 0.000000e+00 : f32
    %34 = vector.broadcast %cst_21 : f32 to vector<8x128xf32>
    %c0_22 = arith.constant 0 : index
    %c0_23 = arith.constant 0 : index
    %35 = vector.load %arg10[%c0_22, %c0_23] : memref<200x128xf32, #tpu.memory_space<vmem>>, vector<8x128xf32>
    %36 = arith.truncf %35 : vector<8x128xf32> to vector<8x128xbf16>
    %c0_24 = arith.constant 0 : index
    %c0_25 = arith.constant 0 : index
    %c0_26 = arith.constant 0 : index
    %37 = vector.load %arg3[%c0_24, %c0_25, %c0_26] : memref<25x128x128xbf16, #tpu.memory_space<vmem>>, vector<1x128x128xbf16>
    %38 = vector.shape_cast %37 : vector<1x128x128xbf16> to vector<128x128xbf16>
    %cst_27 = arith.constant dense<0.000000e+00> : vector<8x128xf32>
    %39 = tpu.matmul %36, %38, %cst_27 {dimension_numbers = #tpu.dot_dimension_numbers<[1], [0], [0], [1], [0, 0, 1, 1], [], []>} : vector<8x128xbf16>, vector<128x128xbf16>, vector<8x128xf32> -> vector<8x128xf32>
    %40 = arith.addf %34, %39 : vector<8x128xf32>
    %c8 = arith.constant 8 : index
    %c0_28 = arith.constant 0 : index
    %41 = vector.load %arg10[%c8, %c0_28] : memref<200x128xf32, #tpu.memory_space<vmem>>, vector<8x128xf32>
    %42 = arith.truncf %41 : vector<8x128xf32> to vector<8x128xbf16>
    %c1_29 = arith.constant 1 : index
    %c0_30 = arith.constant 0 : index
    %c0_31 = arith.constant 0 : index
    %43 = vector.load %arg3[%c1_29, %c0_30, %c0_31] : memref<25x128x128xbf16, #tpu.memory_space<vmem>>, vector<1x128x128xbf16>
    %44 = vector.shape_cast %43 : vector<1x128x128xbf16> to vector<128x128xbf16>
    %cst_32 = arith.constant dense<0.000000e+00> : vector<8x128xf32>
    %45 = tpu.matmul %42, %44, %cst_32 {dimension_numbers = #tpu.dot_dimension_numbers<[1], [0], [0], [1], [0, 0, 1, 1], [], []>} : vector<8x128xbf16>, vector<128x128xbf16>, vector<8x128xf32> -> vector<8x128xf32>
    %46 = arith.addf %40, %45 : vector<8x128xf32>
    %c16 = arith.constant 16 : index
    %c0_33 = arith.constant 0 : index
    %47 = vector.load %arg10[%c16, %c0_33] : memref<200x128xf32, #tpu.memory_space<vmem>>, vector<8x128xf32>
    %48 = arith.truncf %47 : vector<8x128xf32> to vector<8x128xbf16>
    %c2_34 = arith.constant 2 : index
    %c0_35 = arith.constant 0 : index
    %c0_36 = arith.constant 0 : index
    %49 = vector.load %arg3[%c2_34, %c0_35, %c0_36] : memref<25x128x128xbf16, #tpu.memory_space<vmem>>, vector<1x128x128xbf16>
    %50 = vector.shape_cast %49 : vector<1x128x128xbf16> to vector<128x128xbf16>
    %cst_37 = arith.constant dense<0.000000e+00> : vector<8x128xf32>
    %51 = tpu.matmul %48, %50, %cst_37 {dimension_numbers = #tpu.dot_dimension_numbers<[1], [0], [0], [1], [0, 0, 1, 1], [], []>} : vector<8x128xbf16>, vector<128x128xbf16>, vector<8x128xf32> -> vector<8x128xf32>
    %52 = arith.addf %46, %51 : vector<8x128xf32>
    %c24 = arith.constant 24 : index
    %c0_38 = arith.constant 0 : index
    %53 = vector.load %arg10[%c24, %c0_38] : memref<200x128xf32, #tpu.memory_space<vmem>>, vector<8x128xf32>
    %54 = arith.truncf %53 : vector<8x128xf32> to vector<8x128xbf16>
    %c3_39 = arith.constant 3 : index
    %c0_40 = arith.constant 0 : index
    %c0_41 = arith.constant 0 : index
    %55 = vector.load %arg3[%c3_39, %c0_40, %c0_41] : memref<25x128x128xbf16, #tpu.memory_space<vmem>>, vector<1x128x128xbf16>
    %56 = vector.shape_cast %55 : vector<1x128x128xbf16> to vector<128x128xbf16>
    %cst_42 = arith.constant dense<0.000000e+00> : vector<8x128xf32>
    %57 = tpu.matmul %54, %56, %cst_42 {dimension_numbers = #tpu.dot_dimension_numbers<[1], [0], [0], [1], [0, 0, 1, 1], [], []>} : vector<8x128xbf16>, vector<128x128xbf16>, vector<8x128xf32> -> vector<8x128xf32>
    %58 = arith.addf %52, %57 : vector<8x128xf32>
    %c32 = arith.constant 32 : index
    %c0_43 = arith.constant 0 : index
    %59 = vector.load %arg10[%c32, %c0_43] : memref<200x128xf32, #tpu.memory_space<vmem>>, vector<8x128xf32>
    %60 = arith.truncf %59 : vector<8x128xf32> to vector<8x128xbf16>
    %c4 = arith.constant 4 : index
    %c0_44 = arith.constant 0 : index
    %c0_45 = arith.constant 0 : index
    %61 = vector.load %arg3[%c4, %c0_44, %c0_45] : memref<25x128x128xbf16, #tpu.memory_space<vmem>>, vector<1x128x128xbf16>
    %62 = vector.shape_cast %61 : vector<1x128x128xbf16> to vector<128x128xbf16>
    %cst_46 = arith.constant dense<0.000000e+00> : vector<8x128xf32>
    %63 = tpu.matmul %60, %62, %cst_46 {dimension_numbers = #tpu.dot_dimension_numbers<[1], [0], [0], [1], [0, 0, 1, 1], [], []>} : vector<8x128xbf16>, vector<128x128xbf16>, vector<8x128xf32> -> vector<8x128xf32>
    %64 = arith.addf %58, %63 : vector<8x128xf32>
    %c40 = arith.constant 40 : index
    %c0_47 = arith.constant 0 : index
    %65 = vector.load %arg10[%c40, %c0_47] : memref<200x128xf32, #tpu.memory_space<vmem>>, vector<8x128xf32>
    %66 = arith.truncf %65 : vector<8x128xf32> to vector<8x128xbf16>
    %c5 = arith.constant 5 : index
    %c0_48 = arith.constant 0 : index
    %c0_49 = arith.constant 0 : index
    %67 = vector.load %arg3[%c5, %c0_48, %c0_49] : memref<25x128x128xbf16, #tpu.memory_space<vmem>>, vector<1x128x128xbf16>
    %68 = vector.shape_cast %67 : vector<1x128x128xbf16> to vector<128x128xbf16>
    %cst_50 = arith.constant dense<0.000000e+00> : vector<8x128xf32>
    %69 = tpu.matmul %66, %68, %cst_50 {dimension_numbers = #tpu.dot_dimension_numbers<[1], [0], [0], [1], [0, 0, 1, 1], [], []>} : vector<8x128xbf16>, vector<128x128xbf16>, vector<8x128xf32> -> vector<8x128xf32>
    %70 = arith.addf %64, %69 : vector<8x128xf32>
    %c48 = arith.constant 48 : index
    %c0_51 = arith.constant 0 : index
    %71 = vector.load %arg10[%c48, %c0_51] : memref<200x128xf32, #tpu.memory_space<vmem>>, vector<8x128xf32>
    %72 = arith.truncf %71 : vector<8x128xf32> to vector<8x128xbf16>
    %c6 = arith.constant 6 : index
    %c0_52 = arith.constant 0 : index
    %c0_53 = arith.constant 0 : index
    %73 = vector.load %arg3[%c6, %c0_52, %c0_53] : memref<25x128x128xbf16, #tpu.memory_space<vmem>>, vector<1x128x128xbf16>
    %74 = vector.shape_cast %73 : vector<1x128x128xbf16> to vector<128x128xbf16>
    %cst_54 = arith.constant dense<0.000000e+00> : vector<8x128xf32>
    %75 = tpu.matmul %72, %74, %cst_54 {dimension_numbers = #tpu.dot_dimension_numbers<[1], [0], [0], [1], [0, 0, 1, 1], [], []>} : vector<8x128xbf16>, vector<128x128xbf16>, vector<8x128xf32> -> vector<8x128xf32>
    %76 = arith.addf %70, %75 : vector<8x128xf32>
    %c56 = arith.constant 56 : index
    %c0_55 = arith.constant 0 : index
    %77 = vector.load %arg10[%c56, %c0_55] : memref<200x128xf32, #tpu.memory_space<vmem>>, vector<8x128xf32>
    %78 = arith.truncf %77 : vector<8x128xf32> to vector<8x128xbf16>
    %c7 = arith.constant 7 : index
    %c0_56 = arith.constant 0 : index
    %c0_57 = arith.constant 0 : index
    %79 = vector.load %arg3[%c7, %c0_56, %c0_57] : memref<25x128x128xbf16, #tpu.memory_space<vmem>>, vector<1x128x128xbf16>
    %80 = vector.shape_cast %79 : vector<1x128x128xbf16> to vector<128x128xbf16>
    %cst_58 = arith.constant dense<0.000000e+00> : vector<8x128xf32>
    %81 = tpu.matmul %78, %80, %cst_58 {dimension_numbers = #tpu.dot_dimension_numbers<[1], [0], [0], [1], [0, 0, 1, 1], [], []>} : vector<8x128xbf16>, vector<128x128xbf16>, vector<8x128xf32> -> vector<8x128xf32>
    %82 = arith.addf %76, %81 : vector<8x128xf32>
    %c64 = arith.constant 64 : index
    %c0_59 = arith.constant 0 : index
    %83 = vector.load %arg10[%c64, %c0_59] : memref<200x128xf32, #tpu.memory_space<vmem>>, vector<8x128xf32>
    %84 = arith.truncf %83 : vector<8x128xf32> to vector<8x128xbf16>
    %c8_60 = arith.constant 8 : index
    %c0_61 = arith.constant 0 : index
    %c0_62 = arith.constant 0 : index
    %85 = vector.load %arg3[%c8_60, %c0_61, %c0_62] : memref<25x128x128xbf16, #tpu.memory_space<vmem>>, vector<1x128x128xbf16>
    %86 = vector.shape_cast %85 : vector<1x128x128xbf16> to vector<128x128xbf16>
    %cst_63 = arith.constant dense<0.000000e+00> : vector<8x128xf32>
    %87 = tpu.matmul %84, %86, %cst_63 {dimension_numbers = #tpu.dot_dimension_numbers<[1], [0], [0], [1], [0, 0, 1, 1], [], []>} : vector<8x128xbf16>, vector<128x128xbf16>, vector<8x128xf32> -> vector<8x128xf32>
    %88 = arith.addf %82, %87 : vector<8x128xf32>
    %c72 = arith.constant 72 : index
    %c0_64 = arith.constant 0 : index
    %89 = vector.load %arg10[%c72, %c0_64] : memref<200x128xf32, #tpu.memory_space<vmem>>, vector<8x128xf32>
    %90 = arith.truncf %89 : vector<8x128xf32> to vector<8x128xbf16>
    %c9 = arith.constant 9 : index
    %c0_65 = arith.constant 0 : index
    %c0_66 = arith.constant 0 : index
    %91 = vector.load %arg3[%c9, %c0_65, %c0_66] : memref<25x128x128xbf16, #tpu.memory_space<vmem>>, vector<1x128x128xbf16>
    %92 = vector.shape_cast %91 : vector<1x128x128xbf16> to vector<128x128xbf16>
    %cst_67 = arith.constant dense<0.000000e+00> : vector<8x128xf32>
    %93 = tpu.matmul %90, %92, %cst_67 {dimension_numbers = #tpu.dot_dimension_numbers<[1], [0], [0], [1], [0, 0, 1, 1], [], []>} : vector<8x128xbf16>, vector<128x128xbf16>, vector<8x128xf32> -> vector<8x128xf32>
    %94 = arith.addf %88, %93 : vector<8x128xf32>
    %c80 = arith.constant 80 : index
    %c0_68 = arith.constant 0 : index
    %95 = vector.load %arg10[%c80, %c0_68] : memref<200x128xf32, #tpu.memory_space<vmem>>, vector<8x128xf32>
    %96 = arith.truncf %95 : vector<8x128xf32> to vector<8x128xbf16>
    %c10 = arith.constant 10 : index
    %c0_69 = arith.constant 0 : index
    %c0_70 = arith.constant 0 : index
    %97 = vector.load %arg3[%c10, %c0_69, %c0_70] : memref<25x128x128xbf16, #tpu.memory_space<vmem>>, vector<1x128x128xbf16>
    %98 = vector.shape_cast %97 : vector<1x128x128xbf16> to vector<128x128xbf16>
    %cst_71 = arith.constant dense<0.000000e+00> : vector<8x128xf32>
    %99 = tpu.matmul %96, %98, %cst_71 {dimension_numbers = #tpu.dot_dimension_numbers<[1], [0], [0], [1], [0, 0, 1, 1], [], []>} : vector<8x128xbf16>, vector<128x128xbf16>, vector<8x128xf32> -> vector<8x128xf32>
    %100 = arith.addf %94, %99 : vector<8x128xf32>
    %c88 = arith.constant 88 : index
    %c0_72 = arith.constant 0 : index
    %101 = vector.load %arg10[%c88, %c0_72] : memref<200x128xf32, #tpu.memory_space<vmem>>, vector<8x128xf32>
    %102 = arith.truncf %101 : vector<8x128xf32> to vector<8x128xbf16>
    %c11 = arith.constant 11 : index
    %c0_73 = arith.constant 0 : index
    %c0_74 = arith.constant 0 : index
    %103 = vector.load %arg3[%c11, %c0_73, %c0_74] : memref<25x128x128xbf16, #tpu.memory_space<vmem>>, vector<1x128x128xbf16>
    %104 = vector.shape_cast %103 : vector<1x128x128xbf16> to vector<128x128xbf16>
    %cst_75 = arith.constant dense<0.000000e+00> : vector<8x128xf32>
    %105 = tpu.matmul %102, %104, %cst_75 {dimension_numbers = #tpu.dot_dimension_numbers<[1], [0], [0], [1], [0, 0, 1, 1], [], []>} : vector<8x128xbf16>, vector<128x128xbf16>, vector<8x128xf32> -> vector<8x128xf32>
    %106 = arith.addf %100, %105 : vector<8x128xf32>
    %c96 = arith.constant 96 : index
    %c0_76 = arith.constant 0 : index
    %107 = vector.load %arg10[%c96, %c0_76] : memref<200x128xf32, #tpu.memory_space<vmem>>, vector<8x128xf32>
    %108 = arith.truncf %107 : vector<8x128xf32> to vector<8x128xbf16>
    %c12 = arith.constant 12 : index
    %c0_77 = arith.constant 0 : index
    %c0_78 = arith.constant 0 : index
    %109 = vector.load %arg3[%c12, %c0_77, %c0_78] : memref<25x128x128xbf16, #tpu.memory_space<vmem>>, vector<1x128x128xbf16>
    %110 = vector.shape_cast %109 : vector<1x128x128xbf16> to vector<128x128xbf16>
    %cst_79 = arith.constant dense<0.000000e+00> : vector<8x128xf32>
    %111 = tpu.matmul %108, %110, %cst_79 {dimension_numbers = #tpu.dot_dimension_numbers<[1], [0], [0], [1], [0, 0, 1, 1], [], []>} : vector<8x128xbf16>, vector<128x128xbf16>, vector<8x128xf32> -> vector<8x128xf32>
    %112 = arith.addf %106, %111 : vector<8x128xf32>
    %c104 = arith.constant 104 : index
    %c0_80 = arith.constant 0 : index
    %113 = vector.load %arg10[%c104, %c0_80] : memref<200x128xf32, #tpu.memory_space<vmem>>, vector<8x128xf32>
    %114 = arith.truncf %113 : vector<8x128xf32> to vector<8x128xbf16>
    %c13 = arith.constant 13 : index
    %c0_81 = arith.constant 0 : index
    %c0_82 = arith.constant 0 : index
    %115 = vector.load %arg3[%c13, %c0_81, %c0_82] : memref<25x128x128xbf16, #tpu.memory_space<vmem>>, vector<1x128x128xbf16>
    %116 = vector.shape_cast %115 : vector<1x128x128xbf16> to vector<128x128xbf16>
    %cst_83 = arith.constant dense<0.000000e+00> : vector<8x128xf32>
    %117 = tpu.matmul %114, %116, %cst_83 {dimension_numbers = #tpu.dot_dimension_numbers<[1], [0], [0], [1], [0, 0, 1, 1], [], []>} : vector<8x128xbf16>, vector<128x128xbf16>, vector<8x128xf32> -> vector<8x128xf32>
    %118 = arith.addf %112, %117 : vector<8x128xf32>
    %c112 = arith.constant 112 : index
    %c0_84 = arith.constant 0 : index
    %119 = vector.load %arg10[%c112, %c0_84] : memref<200x128xf32, #tpu.memory_space<vmem>>, vector<8x128xf32>
    %120 = arith.truncf %119 : vector<8x128xf32> to vector<8x128xbf16>
    %c14 = arith.constant 14 : index
    %c0_85 = arith.constant 0 : index
    %c0_86 = arith.constant 0 : index
    %121 = vector.load %arg3[%c14, %c0_85, %c0_86] : memref<25x128x128xbf16, #tpu.memory_space<vmem>>, vector<1x128x128xbf16>
    %122 = vector.shape_cast %121 : vector<1x128x128xbf16> to vector<128x128xbf16>
    %cst_87 = arith.constant dense<0.000000e+00> : vector<8x128xf32>
    %123 = tpu.matmul %120, %122, %cst_87 {dimension_numbers = #tpu.dot_dimension_numbers<[1], [0], [0], [1], [0, 0, 1, 1], [], []>} : vector<8x128xbf16>, vector<128x128xbf16>, vector<8x128xf32> -> vector<8x128xf32>
    %124 = arith.addf %118, %123 : vector<8x128xf32>
    %c120 = arith.constant 120 : index
    %c0_88 = arith.constant 0 : index
    %125 = vector.load %arg10[%c120, %c0_88] : memref<200x128xf32, #tpu.memory_space<vmem>>, vector<8x128xf32>
    %126 = arith.truncf %125 : vector<8x128xf32> to vector<8x128xbf16>
    %c15 = arith.constant 15 : index
    %c0_89 = arith.constant 0 : index
    %c0_90 = arith.constant 0 : index
    %127 = vector.load %arg3[%c15, %c0_89, %c0_90] : memref<25x128x128xbf16, #tpu.memory_space<vmem>>, vector<1x128x128xbf16>
    %128 = vector.shape_cast %127 : vector<1x128x128xbf16> to vector<128x128xbf16>
    %cst_91 = arith.constant dense<0.000000e+00> : vector<8x128xf32>
    %129 = tpu.matmul %126, %128, %cst_91 {dimension_numbers = #tpu.dot_dimension_numbers<[1], [0], [0], [1], [0, 0, 1, 1], [], []>} : vector<8x128xbf16>, vector<128x128xbf16>, vector<8x128xf32> -> vector<8x128xf32>
    %130 = arith.addf %124, %129 : vector<8x128xf32>
    %c128 = arith.constant 128 : index
    %c0_92 = arith.constant 0 : index
    %131 = vector.load %arg10[%c128, %c0_92] : memref<200x128xf32, #tpu.memory_space<vmem>>, vector<8x128xf32>
    %132 = arith.truncf %131 : vector<8x128xf32> to vector<8x128xbf16>
    %c16_93 = arith.constant 16 : index
    %c0_94 = arith.constant 0 : index
    %c0_95 = arith.constant 0 : index
    %133 = vector.load %arg3[%c16_93, %c0_94, %c0_95] : memref<25x128x128xbf16, #tpu.memory_space<vmem>>, vector<1x128x128xbf16>
    %134 = vector.shape_cast %133 : vector<1x128x128xbf16> to vector<128x128xbf16>
    %cst_96 = arith.constant dense<0.000000e+00> : vector<8x128xf32>
    %135 = tpu.matmul %132, %134, %cst_96 {dimension_numbers = #tpu.dot_dimension_numbers<[1], [0], [0], [1], [0, 0, 1, 1], [], []>} : vector<8x128xbf16>, vector<128x128xbf16>, vector<8x128xf32> -> vector<8x128xf32>
    %136 = arith.addf %130, %135 : vector<8x128xf32>
    %c136 = arith.constant 136 : index
    %c0_97 = arith.constant 0 : index
    %137 = vector.load %arg10[%c136, %c0_97] : memref<200x128xf32, #tpu.memory_space<vmem>>, vector<8x128xf32>
    %138 = arith.truncf %137 : vector<8x128xf32> to vector<8x128xbf16>
    %c17 = arith.constant 17 : index
    %c0_98 = arith.constant 0 : index
    %c0_99 = arith.constant 0 : index
    %139 = vector.load %arg3[%c17, %c0_98, %c0_99] : memref<25x128x128xbf16, #tpu.memory_space<vmem>>, vector<1x128x128xbf16>
    %140 = vector.shape_cast %139 : vector<1x128x128xbf16> to vector<128x128xbf16>
    %cst_100 = arith.constant dense<0.000000e+00> : vector<8x128xf32>
    %141 = tpu.matmul %138, %140, %cst_100 {dimension_numbers = #tpu.dot_dimension_numbers<[1], [0], [0], [1], [0, 0, 1, 1], [], []>} : vector<8x128xbf16>, vector<128x128xbf16>, vector<8x128xf32> -> vector<8x128xf32>
    %142 = arith.addf %136, %141 : vector<8x128xf32>
    %c144 = arith.constant 144 : index
    %c0_101 = arith.constant 0 : index
    %143 = vector.load %arg10[%c144, %c0_101] : memref<200x128xf32, #tpu.memory_space<vmem>>, vector<8x128xf32>
    %144 = arith.truncf %143 : vector<8x128xf32> to vector<8x128xbf16>
    %c18 = arith.constant 18 : index
    %c0_102 = arith.constant 0 : index
    %c0_103 = arith.constant 0 : index
    %145 = vector.load %arg3[%c18, %c0_102, %c0_103] : memref<25x128x128xbf16, #tpu.memory_space<vmem>>, vector<1x128x128xbf16>
    %146 = vector.shape_cast %145 : vector<1x128x128xbf16> to vector<128x128xbf16>
    %cst_104 = arith.constant dense<0.000000e+00> : vector<8x128xf32>
    %147 = tpu.matmul %144, %146, %cst_104 {dimension_numbers = #tpu.dot_dimension_numbers<[1], [0], [0], [1], [0, 0, 1, 1], [], []>} : vector<8x128xbf16>, vector<128x128xbf16>, vector<8x128xf32> -> vector<8x128xf32>
    %148 = arith.addf %142, %147 : vector<8x128xf32>
    %c152 = arith.constant 152 : index
    %c0_105 = arith.constant 0 : index
    %149 = vector.load %arg10[%c152, %c0_105] : memref<200x128xf32, #tpu.memory_space<vmem>>, vector<8x128xf32>
    %150 = arith.truncf %149 : vector<8x128xf32> to vector<8x128xbf16>
    %c19 = arith.constant 19 : index
    %c0_106 = arith.constant 0 : index
    %c0_107 = arith.constant 0 : index
    %151 = vector.load %arg3[%c19, %c0_106, %c0_107] : memref<25x128x128xbf16, #tpu.memory_space<vmem>>, vector<1x128x128xbf16>
    %152 = vector.shape_cast %151 : vector<1x128x128xbf16> to vector<128x128xbf16>
    %cst_108 = arith.constant dense<0.000000e+00> : vector<8x128xf32>
    %153 = tpu.matmul %150, %152, %cst_108 {dimension_numbers = #tpu.dot_dimension_numbers<[1], [0], [0], [1], [0, 0, 1, 1], [], []>} : vector<8x128xbf16>, vector<128x128xbf16>, vector<8x128xf32> -> vector<8x128xf32>
    %154 = arith.addf %148, %153 : vector<8x128xf32>
    %c160 = arith.constant 160 : index
    %c0_109 = arith.constant 0 : index
    %155 = vector.load %arg10[%c160, %c0_109] : memref<200x128xf32, #tpu.memory_space<vmem>>, vector<8x128xf32>
    %156 = arith.truncf %155 : vector<8x128xf32> to vector<8x128xbf16>
    %c20 = arith.constant 20 : index
    %c0_110 = arith.constant 0 : index
    %c0_111 = arith.constant 0 : index
    %157 = vector.load %arg3[%c20, %c0_110, %c0_111] : memref<25x128x128xbf16, #tpu.memory_space<vmem>>, vector<1x128x128xbf16>
    %158 = vector.shape_cast %157 : vector<1x128x128xbf16> to vector<128x128xbf16>
    %cst_112 = arith.constant dense<0.000000e+00> : vector<8x128xf32>
    %159 = tpu.matmul %156, %158, %cst_112 {dimension_numbers = #tpu.dot_dimension_numbers<[1], [0], [0], [1], [0, 0, 1, 1], [], []>} : vector<8x128xbf16>, vector<128x128xbf16>, vector<8x128xf32> -> vector<8x128xf32>
    %160 = arith.addf %154, %159 : vector<8x128xf32>
    %c168 = arith.constant 168 : index
    %c0_113 = arith.constant 0 : index
    %161 = vector.load %arg10[%c168, %c0_113] : memref<200x128xf32, #tpu.memory_space<vmem>>, vector<8x128xf32>
    %162 = arith.truncf %161 : vector<8x128xf32> to vector<8x128xbf16>
    %c21 = arith.constant 21 : index
    %c0_114 = arith.constant 0 : index
    %c0_115 = arith.constant 0 : index
    %163 = vector.load %arg3[%c21, %c0_114, %c0_115] : memref<25x128x128xbf16, #tpu.memory_space<vmem>>, vector<1x128x128xbf16>
    %164 = vector.shape_cast %163 : vector<1x128x128xbf16> to vector<128x128xbf16>
    %cst_116 = arith.constant dense<0.000000e+00> : vector<8x128xf32>
    %165 = tpu.matmul %162, %164, %cst_116 {dimension_numbers = #tpu.dot_dimension_numbers<[1], [0], [0], [1], [0, 0, 1, 1], [], []>} : vector<8x128xbf16>, vector<128x128xbf16>, vector<8x128xf32> -> vector<8x128xf32>
    %166 = arith.addf %160, %165 : vector<8x128xf32>
    %c176 = arith.constant 176 : index
    %c0_117 = arith.constant 0 : index
    %167 = vector.load %arg10[%c176, %c0_117] : memref<200x128xf32, #tpu.memory_space<vmem>>, vector<8x128xf32>
    %168 = arith.truncf %167 : vector<8x128xf32> to vector<8x128xbf16>
    %c22 = arith.constant 22 : index
    %c0_118 = arith.constant 0 : index
    %c0_119 = arith.constant 0 : index
    %169 = vector.load %arg3[%c22, %c0_118, %c0_119] : memref<25x128x128xbf16, #tpu.memory_space<vmem>>, vector<1x128x128xbf16>
    %170 = vector.shape_cast %169 : vector<1x128x128xbf16> to vector<128x128xbf16>
    %cst_120 = arith.constant dense<0.000000e+00> : vector<8x128xf32>
    %171 = tpu.matmul %168, %170, %cst_120 {dimension_numbers = #tpu.dot_dimension_numbers<[1], [0], [0], [1], [0, 0, 1, 1], [], []>} : vector<8x128xbf16>, vector<128x128xbf16>, vector<8x128xf32> -> vector<8x128xf32>
    %172 = arith.addf %166, %171 : vector<8x128xf32>
    %c184 = arith.constant 184 : index
    %c0_121 = arith.constant 0 : index
    %173 = vector.load %arg10[%c184, %c0_121] : memref<200x128xf32, #tpu.memory_space<vmem>>, vector<8x128xf32>
    %174 = arith.truncf %173 : vector<8x128xf32> to vector<8x128xbf16>
    %c23 = arith.constant 23 : index
    %c0_122 = arith.constant 0 : index
    %c0_123 = arith.constant 0 : index
    %175 = vector.load %arg3[%c23, %c0_122, %c0_123] : memref<25x128x128xbf16, #tpu.memory_space<vmem>>, vector<1x128x128xbf16>
    %176 = vector.shape_cast %175 : vector<1x128x128xbf16> to vector<128x128xbf16>
    %cst_124 = arith.constant dense<0.000000e+00> : vector<8x128xf32>
    %177 = tpu.matmul %174, %176, %cst_124 {dimension_numbers = #tpu.dot_dimension_numbers<[1], [0], [0], [1], [0, 0, 1, 1], [], []>} : vector<8x128xbf16>, vector<128x128xbf16>, vector<8x128xf32> -> vector<8x128xf32>
    %178 = arith.addf %172, %177 : vector<8x128xf32>
    %c192 = arith.constant 192 : index
    %c0_125 = arith.constant 0 : index
    %179 = vector.load %arg10[%c192, %c0_125] : memref<200x128xf32, #tpu.memory_space<vmem>>, vector<8x128xf32>
    %180 = arith.truncf %179 : vector<8x128xf32> to vector<8x128xbf16>
    %c24_126 = arith.constant 24 : index
    %c0_127 = arith.constant 0 : index
    %c0_128 = arith.constant 0 : index
    %181 = vector.load %arg3[%c24_126, %c0_127, %c0_128] : memref<25x128x128xbf16, #tpu.memory_space<vmem>>, vector<1x128x128xbf16>
    %182 = vector.shape_cast %181 : vector<1x128x128xbf16> to vector<128x128xbf16>
    %cst_129 = arith.constant dense<0.000000e+00> : vector<8x128xf32>
    %183 = tpu.matmul %180, %182, %cst_129 {dimension_numbers = #tpu.dot_dimension_numbers<[1], [0], [0], [1], [0, 0, 1, 1], [], []>} : vector<8x128xbf16>, vector<128x128xbf16>, vector<8x128xf32> -> vector<8x128xf32>
    %184 = arith.addf %178, %183 : vector<8x128xf32>
    %c0_130 = arith.constant 0 : index
    %c0_131 = arith.constant 0 : index
    %185 = vector.load %arg4[%c0_130, %c0_131] : memref<1x128xf32, #tpu.memory_space<vmem>>, vector<1x128xf32>
    %186 = vector.broadcast %185 : vector<1x128xf32> to vector<8x128xf32>
    %187 = arith.addf %184, %186 : vector<8x128xf32>
    %cst_132 = arith.constant 0.000000e+00 : f32
    %188 = vector.broadcast %cst_132 : f32 to vector<8x128xf32>
    %189 = arith.maximumf %187, %188 : vector<8x128xf32>
    %190 = arith.truncf %189 : vector<8x128xf32> to vector<8x128xbf16>
    %c0_133 = arith.constant 0 : index
    %c0_134 = arith.constant 0 : index
    %191 = vector.load %arg5[%c0_133, %c0_134] : memref<128x128xbf16, #tpu.memory_space<vmem>>, vector<128x128xbf16>
    %cst_135 = arith.constant dense<0.000000e+00> : vector<8x128xf32>
    %192 = tpu.matmul %190, %191, %cst_135 {dimension_numbers = #tpu.dot_dimension_numbers<[1], [0], [0], [1], [0, 0, 1, 1], [], []>} : vector<8x128xbf16>, vector<128x128xbf16>, vector<8x128xf32> -> vector<8x128xf32>
    %c0_136 = arith.constant 0 : index
    %c0_137 = arith.constant 0 : index
    %193 = vector.load %arg6[%c0_136, %c0_137] : memref<1x128xf32, #tpu.memory_space<vmem>>, vector<1x128xf32>
    %194 = vector.broadcast %193 : vector<1x128xf32> to vector<8x128xf32>
    %195 = arith.addf %192, %194 : vector<8x128xf32>
    %cst_138 = arith.constant 0.000000e+00 : f32
    %196 = vector.broadcast %cst_138 : f32 to vector<8x128xf32>
    %197 = arith.maximumf %195, %196 : vector<8x128xf32>
    %198 = arith.truncf %197 : vector<8x128xf32> to vector<8x128xbf16>
    %c0_139 = arith.constant 0 : index
    %c0_140 = arith.constant 0 : index
    %199 = vector.load %arg7[%c0_139, %c0_140] : memref<128x128xbf16, #tpu.memory_space<vmem>>, vector<128x128xbf16>
    %cst_141 = arith.constant dense<0.000000e+00> : vector<8x128xf32>
    %200 = tpu.matmul %198, %199, %cst_141 {dimension_numbers = #tpu.dot_dimension_numbers<[1], [0], [0], [1], [0, 0, 1, 1], [], []>} : vector<8x128xbf16>, vector<128x128xbf16>, vector<8x128xf32> -> vector<8x128xf32>
    %c0_142 = arith.constant 0 : index
    %c0_143 = arith.constant 0 : index
    %201 = vector.load %arg8[%c0_142, %c0_143] : memref<1x128xf32, #tpu.memory_space<vmem>>, vector<1x128xf32>
    %202 = vector.broadcast %201 : vector<1x128xf32> to vector<8x128xf32>
    %203 = arith.addf %200, %202 : vector<8x128xf32>
    %c0_144 = arith.constant 0 : index
    %c0_145 = arith.constant 0 : index
    %204 = vector.load %arg9[%c0_144, %c0_145] : memref<8x128xf32, #tpu.memory_space<vmem>>, vector<8x128xf32>
    tpu.vector_store %arg9[%c0_144, %c0_145], %203 {strides = array<i32>} : memref<8x128xf32, #tpu.memory_space<vmem>>, vector<8x128xf32>,
    return
  }
}

</mosaic_0001>

<bundles_post_ra>
// kernel: net_forward.2
= control target key start
LH: loop header
LB: loop body
LE: loop exit
PB: predicated region body
PF: predicated region fallthrough
CT: control target
= control target key end

     0   :  { %s2649_s12 = smov 0   ;;  %s2651_s13 = smov 0   ;;  %s3061_s0 = inlined_call_operand.vmem [shape: bf16[4,512,128], index: 0, kind: input, shape index: {}]   ;;  %s3062_s1 = inlined_call_operand.vmem [shape: bf16[128,128], index: 1, kind: input, shape index: {}]   ;;  %s3063_s2 = inlined_call_operand.vmem [shape: f32[1,128], index: 2, kind: input, shape index: {}]   ;;  %s3064_s3 = inlined_call_operand.vmem [shape: bf16[512,128], index: 3, kind: output, shape index: {}]  }
   0x1   :  { %s2653_s14 = smov 0  }
   0x2 LB: > { %s2014_s15 = sadd.s32 4294967295, %s2627_s14   ;;  %s2666_s16 = sadd.s32 1, %s2627_s14   ;;  %s2627_s14 = sphi %s2653_s14, %s3067_s14   ;;  %s2623_s13 = sphi %s2651_s13, %s3066_s13   ;;  %s2619_s12 = sphi %s2649_s12, %s3065_s12  }
   0x3   : > { %s17_s17 = ssub.s32 %s2627_s14, %s2666_s16  ;;  %s20_s18 = sadd.s32 1, %s2623_s13 }
   0x4   : > { %p18_p0 = scmp.eq.s32.totalorder %s17_s17, 0  ;;  %p27_p1 = scmp.ne.s32.totalorder %s2623_s13, %s2619_s12 }
   0x5   : > { %p28_p2 = scmp.eq.s32.totalorder %s2627_s14, 0  ;;  %p2017_p4 = scmp.ge.s32.totalorder %s2627_s14, 2 }
   0x6   : > { %s2675_s19 = scalar_select %p18_p0, %s2623_s13, %s20_s18  }
   0x7   : > { %p29_p3 = por %p28_p2, %p27_p1  ;;  %127 = sbr.rel (%p2017_p4) target bundleno = 80 (0x50), region = 24 }
   0xc   : > { %130 = sbr.rel (!%p29_p3) target bundleno = 80 (0x50), region = 28  ;;  %s132_s20 = sand.u32 (%p29_p3), 1, %s2623_s13  }
   0xd   : > { %s2411_s21 = sshll.u32 (%p29_p3), %s2627_s14, 7  ;;  %s2018_s22 = sshll.u32 (%p29_p3), %s132_s20, 9 }
   0xe   : > { %s2683_s25 = scalar_lea.vmem (%p29_p3), %s3061_s0, %s2411_s21  ;;  %s2688_s26 = scalar_lea.vmem (%p29_p3), [#allocation2], %s2018_s22 }
   0xf   : > { %v154_v0 = vld [vmem:[%s2683_s25] sm:$0xff] (%p29_p3)   ;;  %v158_v1 = vld [vmem:[%s2683_s25 + $0x8] sm:$0xff] (%p29_p3)   ;;  %v162_v2 = vld [vmem:[%s2683_s25 + $0x10] sm:$0xff] (%p29_p3)  }
  0x10   : > { %155 = vst [vmem:[%s2688_s26] sm:$0xff] (%p29_p3), %v154_v0   ;;  %v166_v3 = vld [vmem:[%s2683_s25 + $0x18] sm:$0xff] (%p29_p3)   ;;  %v170_v4 = vld [vmem:[%s2683_s25 + $0x20] sm:$0xff] (%p29_p3)   ;;  %v174_v5 = vld [vmem:[%s2683_s25 + $0x28] sm:$0xff] (%p29_p3)  }
  0x11   : > { %159 = vst [vmem:[%s2688_s26 + $0x8] sm:$0xff] %v158_v1   ;;  %v178_v6 = vld [vmem:[%s2683_s25 + $0x30] sm:$0xff]   ;;  %v182_v7 = vld [vmem:[%s2683_s25 + $0x38] sm:$0xff]   ;;  %v186_v8 = vld [vmem:[%s2683_s25 + $0x40] sm:$0xff]  }
  0x12   : > { %163 = vst [vmem:[%s2688_s26 + $0x10] sm:$0xff] %v162_v2   ;;  %v190_v9 = vld [vmem:[%s2683_s25 + $0x48] sm:$0xff]   ;;  %v194_v10 = vld [vmem:[%s2683_s25 + $0x50] sm:$0xff]   ;;  %v198_v11 = vld [vmem:[%s2683_s25 + $0x58] sm:$0xff]  }
  0x13   : > { %167 = vst [vmem:[%s2688_s26 + $0x18] sm:$0xff] %v166_v3   ;;  %v202_v12 = vld [vmem:[%s2683_s25 + $0x60] sm:$0xff]   ;;  %v206_v13 = vld [vmem:[%s2683_s25 + $0x68] sm:$0xff]   ;;  %v210_v14 = vld [vmem:[%s2683_s25 + $0x70] sm:$0xff]  }
  0x14   : > { %171 = vst [vmem:[%s2688_s26 + $0x20] sm:$0xff] %v170_v4   ;;  %v214_v15 = vld [vmem:[%s2683_s25 + $0x78] sm:$0xff]   ;;  %v218_v16 = vld [vmem:[%s2683_s25 + $0x100] sm:$0xff]   ;;  %v222_v17 = vld [vmem:[%s2683_s25 + $0x108] sm:$0xff]  }
  0x15   : > { %175 = vst [vmem:[%s2688_s26 + $0x28] sm:$0xff] %v174_v5   ;;  %v226_v18 = vld [vmem:[%s2683_s25 + $0x110] sm:$0xff]   ;;  %v230_v19 = vld [vmem:[%s2683_s25 + $0x118] sm:$0xff]   ;;  %v234_v20 = vld [vmem:[%s2683_s25 + $0x120] sm:$0xff]  }
  0x16   : > { %179 = vst [vmem:[%s2688_s26 + $0x30] sm:$0xff] %v178_v6   ;;  %v238_v21 = vld [vmem:[%s2683_s25 + $0x128] sm:$0xff]   ;;  %v242_v22 = vld [vmem:[%s2683_s25 + $0x130] sm:$0xff]   ;;  %v246_v23 = vld [vmem:[%s2683_s25 + $0x138] sm:$0xff]  }
  0x17   : > { %183 = vst [vmem:[%s2688_s26 + $0x38] sm:$0xff] %v182_v7   ;;  %v250_v24 = vld [vmem:[%s2683_s25 + $0x140] sm:$0xff]   ;;  %v254_v25 = vld [vmem:[%s2683_s25 + $0x148] sm:$0xff]   ;;  %v258_v26 = vld [vmem:[%s2683_s25 + $0x150] sm:$0xff]  }
  0x18   : > { %187 = vst [vmem:[%s2688_s26 + $0x40] sm:$0xff] %v186_v8   ;;  %v262_v27 = vld [vmem:[%s2683_s25 + $0x158] sm:$0xff]   ;;  %v266_v28 = vld [vmem:[%s2683_s25 + $0x160] sm:$0xff]   ;;  %v270_v29 = vld [vmem:[%s2683_s25 + $0x168] sm:$0xff]  }
  0x19   : > { %191 = vst [vmem:[%s2688_s26 + $0x48] sm:$0xff] %v190_v9   ;;  %v274_v30 = vld [vmem:[%s2683_s25 + $0x170] sm:$0xff]   ;;  %v278_v31 = vld [vmem:[%s2683_s25 + $0x178] sm:$0xff]   ;;  %v282_v32 = vld [vmem:[%s2683_s25 + $0x200] sm:$0xff]  }
  0x1a   : > { %195 = vst [vmem:[%s2688_s26 + $0x50] sm:$0xff] %v194_v10   ;;  %v286_v33 = vld [vmem:[%s2683_s25 + $0x208] sm:$0xff]   ;;  %v290_v34 = vld [vmem:[%s2683_s25 + $0x210] sm:$0xff]   ;;  %v294_v35 = vld [vmem:[%s2683_s25 + $0x218] sm:$0xff]  }
  0x1b   : > { %199 = vst [vmem:[%s2688_s26 + $0x58] sm:$0xff] %v198_v11   ;;  %v298_v36 = vld [vmem:[%s2683_s25 + $0x220] sm:$0xff]   ;;  %v302_v37 = vld [vmem:[%s2683_s25 + $0x228] sm:$0xff]   ;;  %v306_v38 = vld [vmem:[%s2683_s25 + $0x230] sm:$0xff]  }
  0x1c   : > { %203 = vst [vmem:[%s2688_s26 + $0x60] sm:$0xff] %v202_v12   ;;  %v310_v39 = vld [vmem:[%s2683_s25 + $0x238] sm:$0xff]   ;;  %v314_v40 = vld [vmem:[%s2683_s25 + $0x240] sm:$0xff]   ;;  %v318_v41 = vld [vmem:[%s2683_s25 + $0x248] sm:$0xff]  }
  0x1d   : > { %207 = vst [vmem:[%s2688_s26 + $0x68] sm:$0xff] %v206_v13   ;;  %v322_v42 = vld [vmem:[%s2683_s25 + $0x250] sm:$0xff]   ;;  %v326_v43 = vld [vmem:[%s2683_s25 + $0x258] sm:$0xff]   ;;  %v330_v44 = vld [vmem:[%s2683_s25 + $0x260] sm:$0xff]  }
  0x1e   : > { %211 = vst [vmem:[%s2688_s26 + $0x70] sm:$0xff] %v210_v14   ;;  %v334_v45 = vld [vmem:[%s2683_s25 + $0x268] sm:$0xff]   ;;  %v338_v46 = vld [vmem:[%s2683_s25 + $0x270] sm:$0xff]   ;;  %v342_v47 = vld [vmem:[%s2683_s25 + $0x278] sm:$0xff]  }
  0x1f   : > { %215 = vst [vmem:[%s2688_s26 + $0x78] sm:$0xff] %v214_v15   ;;  %v346_v48 = vld [vmem:[%s2683_s25 + $0x300] sm:$0xff]   ;;  %v350_v49 = vld [vmem:[%s2683_s25 + $0x308] sm:$0xff]   ;;  %v354_v50 = vld [vmem:[%s2683_s25 + $0x310] sm:$0xff]  }
  0x20   : > { %219 = vst [vmem:[%s2688_s26 + $0x80] sm:$0xff] %v218_v16   ;;  %v358_v51 = vld [vmem:[%s2683_s25 + $0x318] sm:$0xff]   ;;  %v362_v52 = vld [vmem:[%s2683_s25 + $0x320] sm:$0xff]   ;;  %v366_v53 = vld [vmem:[%s2683_s25 + $0x328] sm:$0xff]  }
  0x21   : > { %223 = vst [vmem:[%s2688_s26 + $0x88] sm:$0xff] %v222_v17   ;;  %v370_v54 = vld [vmem:[%s2683_s25 + $0x330] sm:$0xff]   ;;  %v374_v55 = vld [vmem:[%s2683_s25 + $0x338] sm:$0xff]   ;;  %v378_v56 = vld [vmem:[%s2683_s25 + $0x340] sm:$0xff]  }
  0x22   : > { %227 = vst [vmem:[%s2688_s26 + $0x90] sm:$0xff] %v226_v18   ;;  %v382_v57 = vld [vmem:[%s2683_s25 + $0x348] sm:$0xff]   ;;  %v386_v58 = vld [vmem:[%s2683_s25 + $0x350] sm:$0xff]   ;;  %v390_v59 = vld [vmem:[%s2683_s25 + $0x358] sm:$0xff]  }
  0x23   : > { %231 = vst [vmem:[%s2688_s26 + $0x98] sm:$0xff] %v230_v19   ;;  %v394_v60 = vld [vmem:[%s2683_s25 + $0x360] sm:$0xff]   ;;  %v398_v61 = vld [vmem:[%s2683_s25 + $0x368] sm:$0xff]   ;;  %v402_v62 = vld [vmem:[%s2683_s25 + $0x370] sm:$0xff]  }
  0x24   : > { %235 = vst [vmem:[%s2688_s26 + $0xa0] sm:$0xff] %v234_v20   ;;  %v406_v63 = vld [vmem:[%s2683_s25 + $0x378] sm:$0xff]  }
  0x25   : > { %239 = vst [vmem:[%s2688_s26 + $0xa8] sm:$0xff] %v238_v21  }
  0x26   : > { %243 = vst [vmem:[%s2688_s26 + $0xb0] sm:$0xff] %v242_v22  }
  0x27   : > { %247 = vst [vmem:[%s2688_s26 + $0xb8] sm:$0xff] %v246_v23  }
  0x28   : > { %251 = vst [vmem:[%s2688_s26 + $0xc0] sm:$0xff] %v250_v24  }
  0x29   : > { %255 = vst [vmem:[%s2688_s26 + $0xc8] sm:$0xff] %v254_v25  }
  0x2a   : > { %259 = vst [vmem:[%s2688_s26 + $0xd0] sm:$0xff] %v258_v26  }
  0x2b   : > { %263 = vst [vmem:[%s2688_s26 + $0xd8] sm:$0xff] %v262_v27  }
  0x2c   : > { %267 = vst [vmem:[%s2688_s26 + $0xe0] sm:$0xff] %v266_v28  }
  0x2d   : > { %271 = vst [vmem:[%s2688_s26 + $0xe8] sm:$0xff] %v270_v29  }
  0x2e   : > { %275 = vst [vmem:[%s2688_s26 + $0xf0] sm:$0xff] %v274_v30  }
  0x2f   : > { %279 = vst [vmem:[%s2688_s26 + $0xf8] sm:$0xff] %v278_v31  }
  0x30   : > { %283 = vst [vmem:[%s2688_s26 + $0x100] sm:$0xff] %v282_v32  }
  0x31   : > { %287 = vst [vmem:[%s2688_s26 + $0x108] sm:$0xff] %v286_v33  }
  0x32   : > { %291 = vst [vmem:[%s2688_s26 + $0x110] sm:$0xff] %v290_v34  }
  0x33   : > { %295 = vst [vmem:[%s2688_s26 + $0x118] sm:$0xff] %v294_v35  }
  0x34   : > { %299 = vst [vmem:[%s2688_s26 + $0x120] sm:$0xff] %v298_v36  }
  0x35   : > { %303 = vst [vmem:[%s2688_s26 + $0x128] sm:$0xff] %v302_v37  }
  0x36   : > { %307 = vst [vmem:[%s2688_s26 + $0x130] sm:$0xff] %v306_v38  }
  0x37   : > { %311 = vst [vmem:[%s2688_s26 + $0x138] sm:$0xff] %v310_v39  }
  0x38   : > { %315 = vst [vmem:[%s2688_s26 + $0x140] sm:$0xff] %v314_v40  }
  0x39   : > { %319 = vst [vmem:[%s2688_s26 + $0x148] sm:$0xff] %v318_v41  }
  0x3a   : > { %323 = vst [vmem:[%s2688_s26 + $0x150] sm:$0xff] %v322_v42  }
  0x3b   : > { %327 = vst [vmem:[%s2688_s26 + $0x158] sm:$0xff] %v326_v43  }
  0x3c   : > { %331 = vst [vmem:[%s2688_s26 + $0x160] sm:$0xff] %v330_v44  }
  0x3d   : > { %335 = vst [vmem:[%s2688_s26 + $0x168] sm:$0xff] %v334_v45  }
  0x3e   : > { %339 = vst [vmem:[%s2688_s26 + $0x170] sm:$0xff] %v338_v46  }
  0x3f   : > { %343 = vst [vmem:[%s2688_s26 + $0x178] sm:$0xff] %v342_v47  }
  0x40   : > { %347 = vst [vmem:[%s2688_s26 + $0x180] sm:$0xff] %v346_v48  }
  0x41   : > { %351 = vst [vmem:[%s2688_s26 + $0x188] sm:$0xff] %v350_v49  }
  0x42   : > { %355 = vst [vmem:[%s2688_s26 + $0x190] sm:$0xff] %v354_v50  }
  0x43   : > { %359 = vst [vmem:[%s2688_s26 + $0x198] sm:$0xff] %v358_v51  }
  0x44   : > { %363 = vst [vmem:[%s2688_s26 + $0x1a0] sm:$0xff] %v362_v52  }
  0x45   : > { %367 = vst [vmem:[%s2688_s26 + $0x1a8] sm:$0xff] %v366_v53  }
  0x46   : > { %371 = vst [vmem:[%s2688_s26 + $0x1b0] sm:$0xff] %v370_v54  }
  0x47   : > { %375 = vst [vmem:[%s2688_s26 + $0x1b8] sm:$0xff] %v374_v55  }
  0x48   : > { %379 = vst [vmem:[%s2688_s26 + $0x1c0] sm:$0xff] %v378_v56  }
  0x49   : > { %383 = vst [vmem:[%s2688_s26 + $0x1c8] sm:$0xff] %v382_v57  }
  0x4a   : > { %387 = vst [vmem:[%s2688_s26 + $0x1d0] sm:$0xff] %v386_v58  }
  0x4b   : > { %391 = vst [vmem:[%s2688_s26 + $0x1d8] sm:$0xff] %v390_v59  }
  0x4c   : > { %395 = vst [vmem:[%s2688_s26 + $0x1e0] sm:$0xff] %v394_v60  }
  0x4d   : > { %399 = vst [vmem:[%s2688_s26 + $0x1e8] sm:$0xff] %v398_v61  }
  0x4e   : > { %403 = vst [vmem:[%s2688_s26 + $0x1f0] sm:$0xff] %v402_v62  }
  0x4f   : > { %407 = vst [vmem:[%s2688_s26 + $0x1f8] sm:$0xff] %v406_v63  }
  0x50 PF: > { %p2021_p5 = scmp.ge.s32.totalorder %s2627_s14, 1  ;;  %p688_p6 = scmp.lt.s32.totalorder %s2627_s14, 3 }
  0x52   : > { %p689_p7 = pnand %p2021_p5, %p688_p6 }
  0x53   : > { %s695_s17 = sand.u32 (!%p689_p7), 1, %s2619_s12   ;;  %s2023_s26 = sshll.u32 (!%p689_p7), %s2014_s15, 5 }
  0x54   : > { %692 = sbr.rel (%p689_p7) target bundleno = 513 (0x201), region = 69  ;;  %s2022_s21 = sshll.u32 (!%p689_p7), %s695_s17, 9 }
  0x55   : > { %s2842_s24 = scalar_lea.vmem (!%p689_p7), [#allocation2], %s2022_s21  ;;  %p720_p8 = scmp.lt.s32.totalorder (!%p689_p7), %s2023_s26, 63 }
  0x59   : > { %v2419_v0 = vld [vmem:[%s3062_s1 + $0x38] sm:$0xff]  ;;  %v2418_v1 = vld [vmem:[%s3062_s1 + $0x30] sm:$0xff]  ;;  %v2417_v2 = vld [vmem:[%s3062_s1 + $0x28] sm:$0xff]  ;;  %s3069_s26 = smov (!%p720_p8, %s2023_s26), 63 }
  0x5a   : > { %921 = vmatpush.bf16.msra.mxu0 %v2419_v0  ;;  %1171 = vmatpush.bf16.msra.mxu1 %v2419_v0  ;;  %v2416_v3 = vld [vmem:[%s3062_s1 + $0x20] sm:$0xff]  ;;  %v2415_v4 = vld [vmem:[%s3062_s1 + $0x18] sm:$0xff]  ;;  %v2414_v5 = vld [vmem:[%s3062_s1 + $0x10] sm:$0xff]  ;;  %s2024_s14 = sshll.u32 %s3069_s26, 2 }
  0x5b   : > { %1453 = vmatpush.bf16.msra.mxu2 %v2419_v0  ;;  %1703 = vmatpush.bf16.msra.mxu3 %v2419_v0  ;;  %v2413_v6 = vld [vmem:[%s3062_s1 + $0x8] sm:$0xff]  ;;  %v2412_v7 = vld [vmem:[%s3062_s1] sm:$0xff]  ;;  %v2422_v16 = vld [vmem:[%s2842_s24 + $0x10] sm:$0xff]  ;;  %s2902_s28 = scalar_lea.vmem %s3064_s3, %s2024_s14 }
  0x5c   : > { %v2420_v8 = vld [vmem:[%s2842_s24] sm:$0xff]  ;;  %v2421_v12 = vld [vmem:[%s2842_s24 + $0x8] sm:$0xff]  ;;  %v2438_v17 = vld [vmem:[%s2842_s24 + $0x90] sm:$0xff] }
  0x5d   : > { %v2436_v9 = vld [vmem:[%s2842_s24 + $0x80] sm:$0xff]  ;;  %v2437_v13 = vld [vmem:[%s2842_s24 + $0x88] sm:$0xff]  ;;  %v2454_v18 = vld [vmem:[%s2842_s24 + $0x110] sm:$0xff] }
  0x5e   : > { %922 = vmatpush.bf16.msra.mxu0 %v2418_v1  ;;  %1172 = vmatpush.bf16.msra.mxu1 %v2418_v1  ;;  %v2452_v10 = vld [vmem:[%s2842_s24 + $0x100] sm:$0xff]  ;;  %v2453_v14 = vld [vmem:[%s2842_s24 + $0x108] sm:$0xff]  ;;  %v2470_v19 = vld [vmem:[%s2842_s24 + $0x190] sm:$0xff] }
  0x5f   : > { %1454 = vmatpush.bf16.msra.mxu2 %v2418_v1  ;;  %1704 = vmatpush.bf16.msra.mxu3 %v2418_v1  ;;  %v2468_v11 = vld [vmem:[%s2842_s24 + $0x180] sm:$0xff]  ;;  %v2469_v15 = vld [vmem:[%s2842_s24 + $0x188] sm:$0xff]  ;;  %v2423_v20 = vld [vmem:[%s2842_s24 + $0x18] sm:$0xff] }
  0x60   : > { %v2439_v21 = vld [vmem:[%s2842_s24 + $0x98] sm:$0xff]  ;;  %v2424_v24 = vld [vmem:[%s2842_s24 + $0x20] sm:$0xff]  ;;  %v2425_v28 = vld [vmem:[%s2842_s24 + $0x28] sm:$0xff] }
  0x61   : > { %v2455_v22 = vld [vmem:[%s2842_s24 + $0x118] sm:$0xff]  ;;  %v2440_v25 = vld [vmem:[%s2842_s24 + $0xa0] sm:$0xff]  ;;  %v2441_v29 = vld [vmem:[%s2842_s24 + $0xa8] sm:$0xff] }
  0x62   : > { %923 = vmatpush.bf16.msra.mxu0 %v2417_v2  ;;  %1173 = vmatpush.bf16.msra.mxu1 %v2417_v2  ;;  %v2471_v23 = vld [vmem:[%s2842_s24 + $0x198] sm:$0xff]  ;;  %v2456_v26 = vld [vmem:[%s2842_s24 + $0x120] sm:$0xff]  ;;  %v2457_v30 = vld [vmem:[%s2842_s24 + $0x128] sm:$0xff] }
  0x63   : > { %1455 = vmatpush.bf16.msra.mxu2 %v2417_v2  ;;  %1705 = vmatpush.bf16.msra.mxu3 %v2417_v2  ;;  %v2472_v27 = vld [vmem:[%s2842_s24 + $0x1a0] sm:$0xff]  ;;  %v2473_v31 = vld [vmem:[%s2842_s24 + $0x1a8] sm:$0xff]  ;;  %v2426_v32 = vld [vmem:[%s2842_s24 + $0x30] sm:$0xff] }
  0x64   : > { %v2442_v33 = vld [vmem:[%s2842_s24 + $0xb0] sm:$0xff]  ;;  %v2427_v36 = vld [vmem:[%s2842_s24 + $0x38] sm:$0xff]  ;;  %v2428_v40 = vld [vmem:[%s2842_s24 + $0x40] sm:$0xff] }
  0x65   : > { %v2458_v34 = vld [vmem:[%s2842_s24 + $0x130] sm:$0xff]  ;;  %v2443_v37 = vld [vmem:[%s2842_s24 + $0xb8] sm:$0xff]  ;;  %v2444_v41 = vld [vmem:[%s2842_s24 + $0xc0] sm:$0xff] }
  0x66   : > { %924 = vmatpush.bf16.msra.mxu0 %v2416_v3  ;;  %1174 = vmatpush.bf16.msra.mxu1 %v2416_v3  ;;  %v2474_v35 = vld [vmem:[%s2842_s24 + $0x1b0] sm:$0xff]  ;;  %v2459_v38 = vld [vmem:[%s2842_s24 + $0x138] sm:$0xff]  ;;  %v2460_v44 = vld [vmem:[%s2842_s24 + $0x140] sm:$0xff] }
  0x67   : > { %1456 = vmatpush.bf16.msra.mxu2 %v2416_v3  ;;  %1706 = vmatpush.bf16.msra.mxu3 %v2416_v3  ;;  %v2475_v39 = vld [vmem:[%s2842_s24 + $0x1b8] sm:$0xff]  ;;  %v2476_v45 = vld [vmem:[%s2842_s24 + $0x1c0] sm:$0xff]  ;;  %v2429_v63 = vld [vmem:[%s2842_s24 + $0x48] sm:$0xff] }
  0x68   : > { %v2883_v46 = vld [vmem:[%s3063_s2] ss:$0 sm:$0xff]  ;;  %v2445_v0 = vld [vmem:[%s2842_s24 + $0xc8] sm:$0xff] }
  0x6a   : > { %925 = vmatpush.bf16.msra.mxu0 %v2415_v4  ;;  %1175 = vmatpush.bf16.msra.mxu1 %v2415_v4 }
  0x6b   : > { %1457 = vmatpush.bf16.msra.mxu2 %v2415_v4  ;;  %1707 = vmatpush.bf16.msra.mxu3 %v2415_v4 }
  0x6e   : > { %926 = vmatpush.bf16.msra.mxu0 %v2414_v5  ;;  %1176 = vmatpush.bf16.msra.mxu1 %v2414_v5 }
  0x6f   : > { %1458 = vmatpush.bf16.msra.mxu2 %v2414_v5  ;;  %1708 = vmatpush.bf16.msra.mxu3 %v2414_v5 }
  0x72   : > { %927 = vmatpush.bf16.msra.mxu0 %v2413_v6  ;;  %1177 = vmatpush.bf16.msra.mxu1 %v2413_v6 }
  0x73   : > { %1459 = vmatpush.bf16.msra.mxu2 %v2413_v6  ;;  %1709 = vmatpush.bf16.msra.mxu3 %v2413_v6 }
  0x76   : > { %928 = vmatpush.bf16.msra.mxu0 %v2412_v7  ;;  %1178 = vmatpush.bf16.msra.mxu1 %v2412_v7 }
  0x77   : > { %1460 = vmatpush.bf16.msra.mxu2 %v2412_v7  ;;  %1710 = vmatpush.bf16.msra.mxu3 %v2412_v7  ;;  %v2461_v7 = vld [vmem:[%s2842_s24 + $0x148] sm:$0xff] }
  0x79   : > { %929 = vmatmul.bf16.vlgmr.msra.gmra.mxu0 %v2420_v8  ;;  %1179 = vmatmul.bf16.vlgmr.msra.gmra.mxu1 %v2436_v9  ;;  %v2477_v8 = vld [vmem:[%s2842_s24 + $0x1c8] sm:$0xff] }
  0x7a   : > { %1461 = vmatmul.bf16.vlgmr.msra.gmra.mxu2 %v2452_v10  ;;  %1711 = vmatmul.bf16.vlgmr.msra.gmra.mxu3 %v2468_v11 }
  0x89   : > { %934 = vmatmul.bf16.gmra.mxu0 %v2421_v12  ;;  %1184 = vmatmul.bf16.gmra.mxu1 %v2437_v13 }
  0x8a   : > { %1466 = vmatmul.bf16.gmra.mxu2 %v2453_v14  ;;  %1716 = vmatmul.bf16.gmra.mxu3 %v2469_v15 }
  0x99   : > { %939 = vmatmul.bf16.gmra.mxu0 %v2422_v16  ;;  %1189 = vmatmul.bf16.gmra.mxu1 %v2438_v17 }
  0x9a   : > { %1471 = vmatmul.bf16.gmra.mxu2 %v2454_v18  ;;  %1721 = vmatmul.bf16.gmra.mxu3 %v2470_v19 }
  0xa9   : > { %944 = vmatmul.bf16.gmra.mxu0 %v2423_v20  ;;  %1194 = vmatmul.bf16.gmra.mxu1 %v2439_v21 }
  0xaa   : > { %1476 = vmatmul.bf16.gmra.mxu2 %v2455_v22  ;;  %1726 = vmatmul.bf16.gmra.mxu3 %v2471_v23 }
  0xb9   : > { %949 = vmatmul.bf16.gmra.mxu0 %v2424_v24  ;;  %1199 = vmatmul.bf16.gmra.mxu1 %v2440_v25 }
  0xba   : > { %1481 = vmatmul.bf16.gmra.mxu2 %v2456_v26  ;;  %1731 = vmatmul.bf16.gmra.mxu3 %v2472_v27 }
  0xc9   : > { %954 = vmatmul.bf16.gmra.mxu0 %v2425_v28  ;;  %1204 = vmatmul.bf16.gmra.mxu1 %v2441_v29 }
  0xca   : > { %1486 = vmatmul.bf16.gmra.mxu2 %v2457_v30  ;;  %1736 = vmatmul.bf16.gmra.mxu3 %v2473_v31 }
  0xd9   : > { %959 = vmatmul.bf16.gmra.mxu0 %v2426_v32  ;;  %1209 = vmatmul.bf16.gmra.mxu1 %v2442_v33 }
  0xda   : > { %1491 = vmatmul.bf16.gmra.mxu2 %v2458_v34  ;;  %1741 = vmatmul.bf16.gmra.mxu3 %v2474_v35  ;;  %v2430_v34 = vld [vmem:[%s2842_s24 + $0x50] sm:$0xff] }
  0xdb   : > { %v2446_v35 = vld [vmem:[%s2842_s24 + $0xd0] sm:$0xff] }
  0xe9   : > { %964 = vmatmul.bf16.gmra.mxu0 %v2427_v36  ;;  %1214 = vmatmul.bf16.gmra.mxu1 %v2443_v37 }
  0xea   : > { %1496 = vmatmul.bf16.gmra.mxu2 %v2459_v38  ;;  %1746 = vmatmul.bf16.gmra.mxu3 %v2475_v39 }
  0xf6   : > { %v930_v42 = vpop.f32.mrf.mxu0  ;;  %v1180_v43 = vpop.f32.mrf.mxu1 }
  0xf7   : > { %v931_v51 = vadd.f32 %v2883_v46, %v930_v42  ;;  %v1181_v52 = vadd.f32 %v2883_v46, %v1180_v43  ;;  %v2462_v42 = vld [vmem:[%s2842_s24 + $0x150] sm:$0xff] }
  0xf8   : > { %v2478_v43 = vld [vmem:[%s2842_s24 + $0x1d0] sm:$0xff] }
  0xf9   : > { %969 = vmatmul.bf16.gmra.mxu0 %v2428_v40  ;;  %1219 = vmatmul.bf16.gmra.mxu1 %v2444_v41  ;;  %v1010_v57 = vmax.f32 %v931_v51, 0.0  ;;  %v1260_v58 = vmax.f32 %v1181_v52, 0.0 }
  0xfa   : > { %1501 = vmatmul.bf16.gmra.mxu2 %v2460_v44  ;;  %1751 = vmatmul.bf16.gmra.mxu3 %v2476_v45 }
  0xfb   : > { %v1292_v9 = vmax.f32 %v1010_v57, %v1260_v58 }
  0xfd   : > { %v1462_v47 = vpop.f32.mrf.mxu2  ;;  %v1712_v48 = vpop.f32.mrf.mxu3 }
  0xfe   : > { %v932_v49 = vpop.f32.mrf.mxu0  ;;  %v1182_v50 = vpop.f32.mrf.mxu1  ;;  %v1463_v53 = vadd.f32 %v2883_v46, %v1462_v47  ;;  %v1713_v54 = vadd.f32 %v2883_v46, %v1712_v48 }
  0xff   : > { %v933_v55 = vadd.f32 %v2883_v46, %v932_v49  ;;  %v1183_v56 = vadd.f32 %v2883_v46, %v1182_v50 }
 0x100   : > { %v1542_v59 = vmax.f32 %v1463_v53, 0.0  ;;  %v1792_v60 = vmax.f32 %v1713_v54, 0.0 }
 0x101   : > { %v1011_v1 = vmax.f32 %v933_v55, 0.0  ;;  %v1261_v2 = vmax.f32 %v1183_v56, 0.0 }
 0x102   : > { %v1824_v10 = vmax.f32 %v1542_v59, %v1792_v60 }
 0x103   : > { %v1293_v13 = vmax.f32 %v1011_v1, %v1261_v2 }
 0x104   : > { %v1856_v15 = vmax.f32 %v1292_v9, %v1824_v10 }
 0x105   : > { %v1464_v61 = vpop.f32.mrf.mxu2  ;;  %v1714_v62 = vpop.f32.mrf.mxu3 }
 0x106   : > { %v1465_v3 = vadd.f32 %v2883_v46, %v1464_v61  ;;  %v1715_v4 = vadd.f32 %v2883_v46, %v1714_v62  ;;  %v935_v5 = vpop.f32.mrf.mxu0  ;;  %v1185_v6 = vpop.f32.mrf.mxu1 }
 0x107   : > { %v936_v22 = vadd.f32 %v2883_v46, %v935_v5  ;;  %v1186_v23 = vadd.f32 %v2883_v46, %v1185_v6  ;;  %v2431_v6 = vld [vmem:[%s2842_s24 + $0x58] sm:$0xff] }
 0x108   : > { %v1543_v11 = vmax.f32 %v1465_v3, 0.0  ;;  %v1793_v12 = vmax.f32 %v1715_v4, 0.0 }
 0x109   : > { %974 = vmatmul.bf16.gmra.mxu0 %v2429_v63  ;;  %1224 = vmatmul.bf16.gmra.mxu1 %v2445_v0  ;;  %v1012_v28 = vmax.f32 %v936_v22, 0.0  ;;  %v1262_v29 = vmax.f32 %v1186_v23, 0.0 }
 0x10a   : > { %v1825_v14 = vmax.f32 %v1543_v11, %v1793_v12  ;;  %1506 = vmatmul.bf16.gmra.mxu2 %v2461_v7  ;;  %1756 = vmatmul.bf16.gmra.mxu3 %v2477_v8  ;;  %v2447_v7 = vld [vmem:[%s2842_s24 + $0xd8] sm:$0xff] }
 0x10b   : > { %v1294_v44 = vmax.f32 %v1012_v28, %v1262_v29 }
 0x10c   : > { %v1857_v16 = vmax.f32 %v1293_v13, %v1825_v14  ;;  %v2463_v14 = vld [vmem:[%s2842_s24 + $0x158] sm:$0xff] }
 0x10d   : > { %v1467_v17 = vpop.f32.mrf.mxu2  ;;  %v1717_v18 = vpop.f32.mrf.mxu3 }
 0x10e   : > { %v2487_v19 = vpack.c.bf16 %v1857_v16, %v1856_v15  ;;  %v937_v20 = vpop.f32.mrf.mxu0  ;;  %v1187_v21 = vpop.f32.mrf.mxu1  ;;  %v1468_v24 = vadd.f32 %v2883_v46, %v1467_v17  ;;  %v1718_v25 = vadd.f32 %v2883_v46, %v1717_v18  ;;  %v2479_v15 = vld [vmem:[%s2842_s24 + $0x1d8] sm:$0xff] }
 0x10f   : > { %v938_v26 = vadd.f32 %v2883_v46, %v937_v20  ;;  %v1188_v27 = vadd.f32 %v2883_v46, %v1187_v21 }
 0x110   : > { %2488 = vst [vmem:[%s2902_s28] sm:$0xff] %v2487_v19   ;;  %v1544_v30 = vmax.f32 %v1468_v24, 0.0  ;;  %v1794_v31 = vmax.f32 %v1718_v25, 0.0 }
 0x111   : > { %v1013_v36 = vmax.f32 %v938_v26, 0.0  ;;  %v1263_v37 = vmax.f32 %v1188_v27, 0.0 }
 0x112   : > { %v1826_v45 = vmax.f32 %v1544_v30, %v1794_v31 }
 0x113   : > { %v1295_v49 = vmax.f32 %v1013_v36, %v1263_v37 }
 0x114   : > { %v1858_v51 = vmax.f32 %v1294_v44, %v1826_v45 }
 0x115   : > { %v1469_v32 = vpop.f32.mrf.mxu2  ;;  %v1719_v33 = vpop.f32.mrf.mxu3 }
 0x116   : > { %v1470_v38 = vadd.f32 %v2883_v46, %v1469_v32  ;;  %v1720_v39 = vadd.f32 %v2883_v46, %v1719_v33  ;;  %v940_v40 = vpop.f32.mrf.mxu0  ;;  %v1190_v41 = vpop.f32.mrf.mxu1 }
 0x117   : > { %v941_v58 = vadd.f32 %v2883_v46, %v940_v40  ;;  %v1191_v59 = vadd.f32 %v2883_v46, %v1190_v41  ;;  %v2432_v41 = vld [vmem:[%s2842_s24 + $0x60] sm:$0xff] }
 0x118   : > { %v1545_v47 = vmax.f32 %v1470_v38, 0.0  ;;  %v1795_v48 = vmax.f32 %v1720_v39, 0.0 }
 0x119   : > { %979 = vmatmul.bf16.gmra.mxu0 %v2430_v34  ;;  %1229 = vmatmul.bf16.gmra.mxu1 %v2446_v35  ;;  %v1014_v0 = vmax.f32 %v941_v58, 0.0  ;;  %v1264_v1 = vmax.f32 %v1191_v59, 0.0 }
 0x11a   : > { %v1827_v50 = vmax.f32 %v1545_v47, %v1795_v48  ;;  %1511 = vmatmul.bf16.gmra.mxu2 %v2462_v42  ;;  %1761 = vmatmul.bf16.gmra.mxu3 %v2478_v43  ;;  %v2448_v42 = vld [vmem:[%s2842_s24 + $0xe0] sm:$0xff] }
 0x11b   : > { %v1296_v16 = vmax.f32 %v1014_v0, %v1264_v1 }
 0x11c   : > { %v1859_v52 = vmax.f32 %v1295_v49, %v1827_v50  ;;  %v2464_v50 = vld [vmem:[%s2842_s24 + $0x160] sm:$0xff] }
 0x11d   : > { %v1472_v53 = vpop.f32.mrf.mxu2  ;;  %v1722_v54 = vpop.f32.mrf.mxu3 }
 0x11e   : > { %v2492_v55 = vpack.c.bf16 %v1859_v52, %v1858_v51  ;;  %v942_v56 = vpop.f32.mrf.mxu0  ;;  %v1192_v57 = vpop.f32.mrf.mxu1  ;;  %v1473_v60 = vadd.f32 %v2883_v46, %v1472_v53  ;;  %v1723_v61 = vadd.f32 %v2883_v46, %v1722_v54  ;;  %v2480_v51 = vld [vmem:[%s2842_s24 + $0x1e0] sm:$0xff] }
 0x11f   : > { %v943_v62 = vadd.f32 %v2883_v46, %v942_v56  ;;  %v1193_v63 = vadd.f32 %v2883_v46, %v1192_v57 }
 0x120   : > { %2564 = vst [vmem:[%s2902_s28 + $0x8] sm:$0xff] %v2492_v55   ;;  %v1546_v2 = vmax.f32 %v1473_v60, 0.0  ;;  %v1796_v3 = vmax.f32 %v1723_v61, 0.0 }
 0x121   : > { %v1015_v8 = vmax.f32 %v943_v62, 0.0  ;;  %v1265_v9 = vmax.f32 %v1193_v63, 0.0 }
 0x122   : > { %v1828_v17 = vmax.f32 %v1546_v2, %v1796_v3 }
 0x123   : > { %v1297_v20 = vmax.f32 %v1015_v8, %v1265_v9 }
 0x124   : > { %v1860_v22 = vmax.f32 %v1296_v16, %v1828_v17 }
 0x125   : > { %v1474_v4 = vpop.f32.mrf.mxu2  ;;  %v1724_v5 = vpop.f32.mrf.mxu3 }
 0x126   : > { %v1475_v10 = vadd.f32 %v2883_v46, %v1474_v4  ;;  %v1725_v11 = vadd.f32 %v2883_v46, %v1724_v5  ;;  %v945_v12 = vpop.f32.mrf.mxu0  ;;  %v1195_v13 = vpop.f32.mrf.mxu1 }
 0x127   : > { %v946_v29 = vadd.f32 %v2883_v46, %v945_v12  ;;  %v1196_v30 = vadd.f32 %v2883_v46, %v1195_v13  ;;  %v2433_v13 = vld [vmem:[%s2842_s24 + $0x68] sm:$0xff] }
 0x128   : > { %v1547_v18 = vmax.f32 %v1475_v10, 0.0  ;;  %v1797_v19 = vmax.f32 %v1725_v11, 0.0 }
 0x129   : > { %984 = vmatmul.bf16.gmra.mxu0 %v2431_v6  ;;  %1234 = vmatmul.bf16.gmra.mxu1 %v2447_v7  ;;  %v1016_v35 = vmax.f32 %v946_v29, 0.0  ;;  %v1266_v36 = vmax.f32 %v1196_v30, 0.0 }
 0x12a   : > { %v1829_v21 = vmax.f32 %v1547_v18, %v1797_v19  ;;  %1516 = vmatmul.bf16.gmra.mxu2 %v2463_v14  ;;  %1766 = vmatmul.bf16.gmra.mxu3 %v2479_v15  ;;  %v2449_v14 = vld [vmem:[%s2842_s24 + $0xe8] sm:$0xff] }
 0x12b   : > { %v1298_v52 = vmax.f32 %v1016_v35, %v1266_v36 }
 0x12c   : > { %v1861_v23 = vmax.f32 %v1297_v20, %v1829_v21  ;;  %v2465_v21 = vld [vmem:[%s2842_s24 + $0x168] sm:$0xff] }
 0x12d   : > { %v1477_v24 = vpop.f32.mrf.mxu2  ;;  %v1727_v25 = vpop.f32.mrf.mxu3 }
 0x12e   : > { %v2497_v26 = vpack.c.bf16 %v1861_v23, %v1860_v22  ;;  %v947_v27 = vpop.f32.mrf.mxu0  ;;  %v1197_v28 = vpop.f32.mrf.mxu1  ;;  %v1478_v31 = vadd.f32 %v2883_v46, %v1477_v24  ;;  %v1728_v32 = vadd.f32 %v2883_v46, %v1727_v25  ;;  %v2481_v22 = vld [vmem:[%s2842_s24 + $0x1e8] sm:$0xff] }
 0x12f   : > { %v948_v33 = vadd.f32 %v2883_v46, %v947_v27  ;;  %v1198_v34 = vadd.f32 %v2883_v46, %v1197_v28 }
 0x130   : > { %2565 = vst [vmem:[%s2902_s28 + $0x10] sm:$0xff] %v2497_v26   ;;  %v1548_v37 = vmax.f32 %v1478_v31, 0.0  ;;  %v1798_v38 = vmax.f32 %v1728_v32, 0.0 }
 0x131   : > { %v1017_v43 = vmax.f32 %v948_v33, 0.0  ;;  %v1267_v44 = vmax.f32 %v1198_v34, 0.0 }
 0x132   : > { %v1830_v53 = vmax.f32 %v1548_v37, %v1798_v38 }
 0x133   : > { %v1299_v56 = vmax.f32 %v1017_v43, %v1267_v44 }
 0x134   : > { %v1862_v58 = vmax.f32 %v1298_v52, %v1830_v53 }
 0x135   : > { %v1479_v39 = vpop.f32.mrf.mxu2  ;;  %v1729_v40 = vpop.f32.mrf.mxu3 }
 0x136   : > { %v1480_v45 = vadd.f32 %v2883_v46, %v1479_v39  ;;  %v1730_v47 = vadd.f32 %v2883_v46, %v1729_v40  ;;  %v950_v48 = vpop.f32.mrf.mxu0  ;;  %v1200_v49 = vpop.f32.mrf.mxu1 }
 0x137   : > { %v951_v1 = vadd.f32 %v2883_v46, %v950_v48  ;;  %v1201_v2 = vadd.f32 %v2883_v46, %v1200_v49  ;;  %v2434_v49 = vld [vmem:[%s2842_s24 + $0x70] sm:$0xff] }
 0x138   : > { %v1549_v54 = vmax.f32 %v1480_v45, 0.0  ;;  %v1799_v55 = vmax.f32 %v1730_v47, 0.0 }
 0x139   : > { %989 = vmatmul.bf16.gmra.mxu0 %v2432_v41  ;;  %1239 = vmatmul.bf16.gmra.mxu1 %v2448_v42  ;;  %v1018_v7 = vmax.f32 %v951_v1, 0.0  ;;  %v1268_v8 = vmax.f32 %v1201_v2, 0.0 }
 0x13a   : > { %v1831_v57 = vmax.f32 %v1549_v54, %v1799_v55  ;;  %1521 = vmatmul.bf16.gmra.mxu2 %v2464_v50  ;;  %1771 = vmatmul.bf16.gmra.mxu3 %v2480_v51  ;;  %v2450_v50 = vld [vmem:[%s2842_s24 + $0xf0] sm:$0xff] }
 0x13b   : > { %v1300_v23 = vmax.f32 %v1018_v7, %v1268_v8 }
 0x13c   : > { %v1863_v59 = vmax.f32 %v1299_v56, %v1831_v57  ;;  %v2466_v57 = vld [vmem:[%s2842_s24 + $0x170] sm:$0xff] }
 0x13d   : > { %v1482_v60 = vpop.f32.mrf.mxu2  ;;  %v1732_v61 = vpop.f32.mrf.mxu3 }
 0x13e   : > { %v2502_v62 = vpack.c.bf16 %v1863_v59, %v1862_v58  ;;  %v952_v63 = vpop.f32.mrf.mxu0  ;;  %v1202_v0 = vpop.f32.mrf.mxu1  ;;  %v1483_v3 = vadd.f32 %v2883_v46, %v1482_v60  ;;  %v1733_v4 = vadd.f32 %v2883_v46, %v1732_v61  ;;  %v2482_v58 = vld [vmem:[%s2842_s24 + $0x1f0] sm:$0xff] }
 0x13f   : > { %v953_v5 = vadd.f32 %v2883_v46, %v952_v63  ;;  %v1203_v6 = vadd.f32 %v2883_v46, %v1202_v0 }
 0x140   : > { %2566 = vst [vmem:[%s2902_s28 + $0x18] sm:$0xff] %v2502_v62   ;;  %v1550_v9 = vmax.f32 %v1483_v3, 0.0  ;;  %v1800_v10 = vmax.f32 %v1733_v4, 0.0 }
 0x141   : > { %v1019_v15 = vmax.f32 %v953_v5, 0.0  ;;  %v1269_v16 = vmax.f32 %v1203_v6, 0.0 }
 0x142   : > { %v1832_v24 = vmax.f32 %v1550_v9, %v1800_v10 }
 0x143   : > { %v1301_v27 = vmax.f32 %v1019_v15, %v1269_v16 }
 0x144   : > { %v1864_v29 = vmax.f32 %v1300_v23, %v1832_v24 }
 0x145   : > { %v1484_v11 = vpop.f32.mrf.mxu2  ;;  %v1734_v12 = vpop.f32.mrf.mxu3 }
 0x146   : > { %v1485_v17 = vadd.f32 %v2883_v46, %v1484_v11  ;;  %v1735_v18 = vadd.f32 %v2883_v46, %v1734_v12  ;;  %v955_v19 = vpop.f32.mrf.mxu0  ;;  %v1205_v20 = vpop.f32.mrf.mxu1 }
 0x147   : > { %v956_v36 = vadd.f32 %v2883_v46, %v955_v19  ;;  %v1206_v37 = vadd.f32 %v2883_v46, %v1205_v20  ;;  %v2435_v20 = vld [vmem:[%s2842_s24 + $0x78] sm:$0xff] }
 0x148   : > { %v1551_v25 = vmax.f32 %v1485_v17, 0.0  ;;  %v1801_v26 = vmax.f32 %v1735_v18, 0.0 }
 0x149   : > { %994 = vmatmul.bf16.gmra.mxu0 %v2433_v13  ;;  %1244 = vmatmul.bf16.gmra.mxu1 %v2449_v14  ;;  %v1020_v42 = vmax.f32 %v956_v36, 0.0  ;;  %v1270_v43 = vmax.f32 %v1206_v37, 0.0 }
 0x14a   : > { %v1833_v28 = vmax.f32 %v1551_v25, %v1801_v26  ;;  %1526 = vmatmul.bf16.gmra.mxu2 %v2465_v21  ;;  %1776 = vmatmul.bf16.gmra.mxu3 %v2481_v22  ;;  %v2451_v21 = vld [vmem:[%s2842_s24 + $0xf8] sm:$0xff] }
 0x14b   : > { %v1302_v59 = vmax.f32 %v1020_v42, %v1270_v43 }
 0x14c   : > { %v1865_v30 = vmax.f32 %v1301_v27, %v1833_v28  ;;  %v2467_v28 = vld [vmem:[%s2842_s24 + $0x178] sm:$0xff] }
 0x14d   : > { %v1487_v31 = vpop.f32.mrf.mxu2  ;;  %v1737_v32 = vpop.f32.mrf.mxu3 }
 0x14e   : > { %v2507_v33 = vpack.c.bf16 %v1865_v30, %v1864_v29  ;;  %v957_v34 = vpop.f32.mrf.mxu0  ;;  %v1207_v35 = vpop.f32.mrf.mxu1  ;;  %v1488_v38 = vadd.f32 %v2883_v46, %v1487_v31  ;;  %v1738_v39 = vadd.f32 %v2883_v46, %v1737_v32  ;;  %v2483_v29 = vld [vmem:[%s2842_s24 + $0x1f8] sm:$0xff] }
 0x14f   : > { %v958_v40 = vadd.f32 %v2883_v46, %v957_v34  ;;  %v1208_v41 = vadd.f32 %v2883_v46, %v1207_v35 }
 0x150   : > { %2567 = vst [vmem:[%s2902_s28 + $0x20] sm:$0xff] %v2507_v33   ;;  %v1552_v44 = vmax.f32 %v1488_v38, 0.0  ;;  %v1802_v45 = vmax.f32 %v1738_v39, 0.0 }
 0x151   : > { %v1021_v51 = vmax.f32 %v958_v40, 0.0  ;;  %v1271_v52 = vmax.f32 %v1208_v41, 0.0 }
 0x152   : > { %v1834_v60 = vmax.f32 %v1552_v44, %v1802_v45 }
 0x153   : > { %v1303_v63 = vmax.f32 %v1021_v51, %v1271_v52 }
 0x154   : > { %v1866_v1 = vmax.f32 %v1302_v59, %v1834_v60 }
 0x155   : > { %v1489_v47 = vpop.f32.mrf.mxu2  ;;  %v1739_v48 = vpop.f32.mrf.mxu3 }
 0x156   : > { %v1490_v53 = vadd.f32 %v2883_v46, %v1489_v47  ;;  %v1740_v54 = vadd.f32 %v2883_v46, %v1739_v48  ;;  %v960_v55 = vpop.f32.mrf.mxu0  ;;  %v1210_v56 = vpop.f32.mrf.mxu1 }
 0x157   : > { %v961_v8 = vadd.f32 %v2883_v46, %v960_v55  ;;  %v1211_v9 = vadd.f32 %v2883_v46, %v1210_v56 }
 0x158   : > { %v1553_v61 = vmax.f32 %v1490_v53, 0.0  ;;  %v1803_v62 = vmax.f32 %v1740_v54, 0.0 }
 0x159   : > { %999 = vmatmul.bf16.gmra.mxu0 %v2434_v49  ;;  %1249 = vmatmul.bf16.gmra.mxu1 %v2450_v50  ;;  %v1022_v14 = vmax.f32 %v961_v8, 0.0  ;;  %v1272_v15 = vmax.f32 %v1211_v9, 0.0 }
 0x15a   : > { %v1835_v0 = vmax.f32 %v1553_v61, %v1803_v62  ;;  %1531 = vmatmul.bf16.gmra.mxu2 %v2466_v57  ;;  %1781 = vmatmul.bf16.gmra.mxu3 %v2482_v58 }
 0x15b   : > { %v1304_v30 = vmax.f32 %v1022_v14, %v1272_v15 }
 0x15c   : > { %v1867_v2 = vmax.f32 %v1303_v63, %v1835_v0 }
 0x15d   : > { %v1492_v3 = vpop.f32.mrf.mxu2  ;;  %v1742_v4 = vpop.f32.mrf.mxu3 }
 0x15e   : > { %v2512_v5 = vpack.c.bf16 %v1867_v2, %v1866_v1  ;;  %v962_v6 = vpop.f32.mrf.mxu0  ;;  %v1212_v7 = vpop.f32.mrf.mxu1  ;;  %v1493_v10 = vadd.f32 %v2883_v46, %v1492_v3  ;;  %v1743_v11 = vadd.f32 %v2883_v46, %v1742_v4 }
 0x15f   : > { %v963_v12 = vadd.f32 %v2883_v46, %v962_v6  ;;  %v1213_v13 = vadd.f32 %v2883_v46, %v1212_v7 }
 0x160   : > { %2568 = vst [vmem:[%s2902_s28 + $0x28] sm:$0xff] %v2512_v5   ;;  %v1554_v16 = vmax.f32 %v1493_v10, 0.0  ;;  %v1804_v17 = vmax.f32 %v1743_v11, 0.0 }
 0x161   : > { %v1023_v22 = vmax.f32 %v963_v12, 0.0  ;;  %v1273_v23 = vmax.f32 %v1213_v13, 0.0 }
 0x162   : > { %v1836_v31 = vmax.f32 %v1554_v16, %v1804_v17 }
 0x163   : > { %v1305_v34 = vmax.f32 %v1023_v22, %v1273_v23 }
 0x164   : > { %v1868_v36 = vmax.f32 %v1304_v30, %v1836_v31 }
 0x165   : > { %v1494_v18 = vpop.f32.mrf.mxu2  ;;  %v1744_v19 = vpop.f32.mrf.mxu3 }
 0x166   : > { %v1495_v24 = vadd.f32 %v2883_v46, %v1494_v18  ;;  %v1745_v25 = vadd.f32 %v2883_v46, %v1744_v19  ;;  %v965_v26 = vpop.f32.mrf.mxu0  ;;  %v1215_v27 = vpop.f32.mrf.mxu1 }
 0x167   : > { %v966_v43 = vadd.f32 %v2883_v46, %v965_v26  ;;  %v1216_v44 = vadd.f32 %v2883_v46, %v1215_v27 }
 0x168   : > { %v1555_v32 = vmax.f32 %v1495_v24, 0.0  ;;  %v1805_v33 = vmax.f32 %v1745_v25, 0.0 }
 0x169   : > { %1004 = vmatmul.bf16.gmra.mxu0 %v2435_v20  ;;  %1254 = vmatmul.bf16.gmra.mxu1 %v2451_v21  ;;  %v1024_v50 = vmax.f32 %v966_v43, 0.0  ;;  %v1274_v51 = vmax.f32 %v1216_v44, 0.0 }
 0x16a   : > { %v1837_v35 = vmax.f32 %v1555_v32, %v1805_v33  ;;  %1536 = vmatmul.bf16.gmra.mxu2 %v2467_v28  ;;  %1786 = vmatmul.bf16.gmra.mxu3 %v2483_v29 }
 0x16b   : > { %v1306_v62 = vmax.f32 %v1024_v50, %v1274_v51 }
 0x16c   : > { %v1869_v37 = vmax.f32 %v1305_v34, %v1837_v35 }
 0x16d   : > { %v1497_v38 = vpop.f32.mrf.mxu2  ;;  %v1747_v39 = vpop.f32.mrf.mxu3 }
 0x16e   : > { %v2517_v40 = vpack.c.bf16 %v1869_v37, %v1868_v36  ;;  %v967_v41 = vpop.f32.mrf.mxu0  ;;  %v1217_v42 = vpop.f32.mrf.mxu1  ;;  %v1498_v45 = vadd.f32 %v2883_v46, %v1497_v38  ;;  %v1748_v47 = vadd.f32 %v2883_v46, %v1747_v39 }
 0x16f   : > { %v968_v48 = vadd.f32 %v2883_v46, %v967_v41  ;;  %v1218_v49 = vadd.f32 %v2883_v46, %v1217_v42 }
 0x170   : > { %2569 = vst [vmem:[%s2902_s28 + $0x30] sm:$0xff] %v2517_v40   ;;  %v1556_v52 = vmax.f32 %v1498_v45, 0.0  ;;  %v1806_v53 = vmax.f32 %v1748_v47, 0.0 }
 0x171   : > { %v1025_v56 = vmax.f32 %v968_v48, 0.0  ;;  %v1275_v57 = vmax.f32 %v1218_v49, 0.0 }
 0x172   : > { %v1838_v63 = vmax.f32 %v1556_v52, %v1806_v53 }
 0x173   : > { %v1307_v2 = vmax.f32 %v1025_v56, %v1275_v57 }
 0x174   : > { %v1870_v4 = vmax.f32 %v1306_v62, %v1838_v63 }
 0x175   : > { %v1499_v54 = vpop.f32.mrf.mxu2  ;;  %v1749_v55 = vpop.f32.mrf.mxu3 }
 0x176   : > { %v1500_v58 = vadd.f32 %v2883_v46, %v1499_v54  ;;  %v1750_v59 = vadd.f32 %v2883_v46, %v1749_v55  ;;  %v970_v60 = vpop.f32.mrf.mxu0  ;;  %v1220_v61 = vpop.f32.mrf.mxu1 }
 0x177   : > { %v971_v11 = vadd.f32 %v2883_v46, %v970_v60  ;;  %v1221_v12 = vadd.f32 %v2883_v46, %v1220_v61 }
 0x178   : > { %v1557_v0 = vmax.f32 %v1500_v58, 0.0  ;;  %v1807_v1 = vmax.f32 %v1750_v59, 0.0 }
 0x179   : > { %v1026_v17 = vmax.f32 %v971_v11, 0.0  ;;  %v1276_v18 = vmax.f32 %v1221_v12, 0.0 }
 0x17a   : > { %v1839_v3 = vmax.f32 %v1557_v0, %v1807_v1 }
 0x17b   : > { %v1308_v29 = vmax.f32 %v1026_v17, %v1276_v18 }
 0x17c   : > { %v1871_v5 = vmax.f32 %v1307_v2, %v1839_v3 }
 0x17d   : > { %v1502_v6 = vpop.f32.mrf.mxu2  ;;  %v1752_v7 = vpop.f32.mrf.mxu3 }
 0x17e   : > { %v2522_v8 = vpack.c.bf16 %v1871_v5, %v1870_v4  ;;  %v972_v9 = vpop.f32.mrf.mxu0  ;;  %v1222_v10 = vpop.f32.mrf.mxu1  ;;  %v1503_v13 = vadd.f32 %v2883_v46, %v1502_v6  ;;  %v1753_v14 = vadd.f32 %v2883_v46, %v1752_v7 }
 0x17f   : > { %v973_v15 = vadd.f32 %v2883_v46, %v972_v9  ;;  %v1223_v16 = vadd.f32 %v2883_v46, %v1222_v10 }
 0x180   : > { %2570 = vst [vmem:[%s2902_s28 + $0x38] sm:$0xff] %v2522_v8   ;;  %v1558_v19 = vmax.f32 %v1503_v13, 0.0  ;;  %v1808_v20 = vmax.f32 %v1753_v14, 0.0 }
 0x181   : > { %v1027_v23 = vmax.f32 %v973_v15, 0.0  ;;  %v1277_v24 = vmax.f32 %v1223_v16, 0.0 }
 0x182   : > { %v1840_v30 = vmax.f32 %v1558_v19, %v1808_v20 }
 0x183   : > { %v1309_v33 = vmax.f32 %v1027_v23, %v1277_v24 }
 0x184   : > { %v1872_v35 = vmax.f32 %v1308_v29, %v1840_v30 }
 0x185   : > { %v1504_v21 = vpop.f32.mrf.mxu2  ;;  %v1754_v22 = vpop.f32.mrf.mxu3 }
 0x186   : > { %v1505_v25 = vadd.f32 %v2883_v46, %v1504_v21  ;;  %v1755_v26 = vadd.f32 %v2883_v46, %v1754_v22  ;;  %v975_v27 = vpop.f32.mrf.mxu0  ;;  %v1225_v28 = vpop.f32.mrf.mxu1 }
 0x187   : > { %v976_v42 = vadd.f32 %v2883_v46, %v975_v27  ;;  %v1226_v43 = vadd.f32 %v2883_v46, %v1225_v28 }
 0x188   : > { %v1559_v31 = vmax.f32 %v1505_v25, 0.0  ;;  %v1809_v32 = vmax.f32 %v1755_v26, 0.0 }
 0x189   : > { %v1028_v49 = vmax.f32 %v976_v42, 0.0  ;;  %v1278_v50 = vmax.f32 %v1226_v43, 0.0 }
 0x18a   : > { %v1841_v34 = vmax.f32 %v1559_v31, %v1809_v32 }
 0x18b   : > { %v1310_v61 = vmax.f32 %v1028_v49, %v1278_v50 }
 0x18c   : > { %v1873_v36 = vmax.f32 %v1309_v33, %v1841_v34 }
 0x18d   : > { %v1507_v37 = vpop.f32.mrf.mxu2  ;;  %v1757_v38 = vpop.f32.mrf.mxu3 }
 0x18e   : > { %v2527_v39 = vpack.c.bf16 %v1873_v36, %v1872_v35  ;;  %v977_v40 = vpop.f32.mrf.mxu0  ;;  %v1227_v41 = vpop.f32.mrf.mxu1  ;;  %v1508_v44 = vadd.f32 %v2883_v46, %v1507_v37  ;;  %v1758_v45 = vadd.f32 %v2883_v46, %v1757_v38 }
 0x18f   : > { %v978_v47 = vadd.f32 %v2883_v46, %v977_v40  ;;  %v1228_v48 = vadd.f32 %v2883_v46, %v1227_v41 }
 0x190   : > { %2571 = vst [vmem:[%s2902_s28 + $0x40] sm:$0xff] %v2527_v39   ;;  %v1560_v51 = vmax.f32 %v1508_v44, 0.0  ;;  %v1810_v52 = vmax.f32 %v1758_v45, 0.0 }
 0x191   : > { %v1029_v55 = vmax.f32 %v978_v47, 0.0  ;;  %v1279_v56 = vmax.f32 %v1228_v48, 0.0 }
 0x192   : > { %v1842_v62 = vmax.f32 %v1560_v51, %v1810_v52 }
 0x193   : > { %v1311_v1 = vmax.f32 %v1029_v55, %v1279_v56 }
 0x194   : > { %v1874_v3 = vmax.f32 %v1310_v61, %v1842_v62 }
 0x195   : > { %v1509_v53 = vpop.f32.mrf.mxu2  ;;  %v1759_v54 = vpop.f32.mrf.mxu3 }
 0x196   : > { %v1510_v57 = vadd.f32 %v2883_v46, %v1509_v53  ;;  %v1760_v58 = vadd.f32 %v2883_v46, %v1759_v54  ;;  %v980_v59 = vpop.f32.mrf.mxu0  ;;  %v1230_v60 = vpop.f32.mrf.mxu1 }
 0x197   : > { %v981_v10 = vadd.f32 %v2883_v46, %v980_v59  ;;  %v1231_v11 = vadd.f32 %v2883_v46, %v1230_v60 }
 0x198   : > { %v1561_v63 = vmax.f32 %v1510_v57, 0.0  ;;  %v1811_v0 = vmax.f32 %v1760_v58, 0.0 }
 0x199   : > { %v1030_v16 = vmax.f32 %v981_v10, 0.0  ;;  %v1280_v17 = vmax.f32 %v1231_v11, 0.0 }
 0x19a   : > { %v1843_v2 = vmax.f32 %v1561_v63, %v1811_v0 }
 0x19b   : > { %v1312_v28 = vmax.f32 %v1030_v16, %v1280_v17 }
 0x19c   : > { %v1875_v4 = vmax.f32 %v1311_v1, %v1843_v2 }
 0x19d   : > { %v1512_v5 = vpop.f32.mrf.mxu2  ;;  %v1762_v6 = vpop.f32.mrf.mxu3 }
 0x19e   : > { %v2532_v7 = vpack.c.bf16 %v1875_v4, %v1874_v3  ;;  %v982_v8 = vpop.f32.mrf.mxu0  ;;  %v1232_v9 = vpop.f32.mrf.mxu1  ;;  %v1513_v12 = vadd.f32 %v2883_v46, %v1512_v5  ;;  %v1763_v13 = vadd.f32 %v2883_v46, %v1762_v6 }
 0x19f   : > { %v983_v14 = vadd.f32 %v2883_v46, %v982_v8  ;;  %v1233_v15 = vadd.f32 %v2883_v46, %v1232_v9 }
 0x1a0   : > { %2572 = vst [vmem:[%s2902_s28 + $0x48] sm:$0xff] %v2532_v7   ;;  %v1562_v18 = vmax.f32 %v1513_v12, 0.0  ;;  %v1812_v19 = vmax.f32 %v1763_v13, 0.0 }
 0x1a1   : > { %v1031_v22 = vmax.f32 %v983_v14, 0.0  ;;  %v1281_v23 = vmax.f32 %v1233_v15, 0.0 }
 0x1a2   : > { %v1844_v29 = vmax.f32 %v1562_v18, %v1812_v19 }
 0x1a3   : > { %v1313_v32 = vmax.f32 %v1031_v22, %v1281_v23 }
 0x1a4   : > { %v1876_v34 = vmax.f32 %v1312_v28, %v1844_v29 }
 0x1a5   : > { %v1514_v20 = vpop.f32.mrf.mxu2  ;;  %v1764_v21 = vpop.f32.mrf.mxu3 }
 0x1a6   : > { %v1515_v24 = vadd.f32 %v2883_v46, %v1514_v20  ;;  %v1765_v25 = vadd.f32 %v2883_v46, %v1764_v21  ;;  %v985_v26 = vpop.f32.mrf.mxu0  ;;  %v1235_v27 = vpop.f32.mrf.mxu1 }
 0x1a7   : > { %v986_v41 = vadd.f32 %v2883_v46, %v985_v26  ;;  %v1236_v42 = vadd.f32 %v2883_v46, %v1235_v27 }
 0x1a8   : > { %v1563_v30 = vmax.f32 %v1515_v24, 0.0  ;;  %v1813_v31 = vmax.f32 %v1765_v25, 0.0 }
 0x1a9   : > { %v1032_v48 = vmax.f32 %v986_v41, 0.0  ;;  %v1282_v49 = vmax.f32 %v1236_v42, 0.0 }
 0x1aa   : > { %v1845_v33 = vmax.f32 %v1563_v30, %v1813_v31 }
 0x1ab   : > { %v1314_v60 = vmax.f32 %v1032_v48, %v1282_v49 }
 0x1ac   : > { %v1877_v35 = vmax.f32 %v1313_v32, %v1845_v33 }
 0x1ad   : > { %v1517_v36 = vpop.f32.mrf.mxu2  ;;  %v1767_v37 = vpop.f32.mrf.mxu3 }
 0x1ae   : > { %v2537_v38 = vpack.c.bf16 %v1877_v35, %v1876_v34  ;;  %v987_v39 = vpop.f32.mrf.mxu0  ;;  %v1237_v40 = vpop.f32.mrf.mxu1  ;;  %v1518_v43 = vadd.f32 %v2883_v46, %v1517_v36  ;;  %v1768_v44 = vadd.f32 %v2883_v46, %v1767_v37 }
 0x1af   : > { %v988_v45 = vadd.f32 %v2883_v46, %v987_v39  ;;  %v1238_v47 = vadd.f32 %v2883_v46, %v1237_v40 }
 0x1b0   : > { %2573 = vst [vmem:[%s2902_s28 + $0x50] sm:$0xff] %v2537_v38   ;;  %v1564_v50 = vmax.f32 %v1518_v43, 0.0  ;;  %v1814_v51 = vmax.f32 %v1768_v44, 0.0 }
 0x1b1   : > { %v1033_v54 = vmax.f32 %v988_v45, 0.0  ;;  %v1283_v55 = vmax.f32 %v1238_v47, 0.0 }
 0x1b2   : > { %v1846_v61 = vmax.f32 %v1564_v50, %v1814_v51 }
 0x1b3   : > { %v1315_v0 = vmax.f32 %v1033_v54, %v1283_v55 }
 0x1b4   : > { %v1878_v2 = vmax.f32 %v1314_v60, %v1846_v61 }
 0x1b5   : > { %v1519_v52 = vpop.f32.mrf.mxu2  ;;  %v1769_v53 = vpop.f32.mrf.mxu3 }
 0x1b6   : > { %v1520_v56 = vadd.f32 %v2883_v46, %v1519_v52  ;;  %v1770_v57 = vadd.f32 %v2883_v46, %v1769_v53  ;;  %v990_v58 = vpop.f32.mrf.mxu0  ;;  %v1240_v59 = vpop.f32.mrf.mxu1 }
 0x1b7   : > { %v991_v9 = vadd.f32 %v2883_v46, %v990_v58  ;;  %v1241_v10 = vadd.f32 %v2883_v46, %v1240_v59 }
 0x1b8   : > { %v1565_v62 = vmax.f32 %v1520_v56, 0.0  ;;  %v1815_v63 = vmax.f32 %v1770_v57, 0.0 }
 0x1b9   : > { %v1034_v15 = vmax.f32 %v991_v9, 0.0  ;;  %v1284_v16 = vmax.f32 %v1241_v10, 0.0 }
 0x1ba   : > { %v1847_v1 = vmax.f32 %v1565_v62, %v1815_v63 }
 0x1bb   : > { %v1316_v27 = vmax.f32 %v1034_v15, %v1284_v16 }
 0x1bc   : > { %v1879_v3 = vmax.f32 %v1315_v0, %v1847_v1 }
 0x1bd   : > { %v1522_v4 = vpop.f32.mrf.mxu2  ;;  %v1772_v5 = vpop.f32.mrf.mxu3 }
 0x1be   : > { %v2542_v6 = vpack.c.bf16 %v1879_v3, %v1878_v2  ;;  %v992_v7 = vpop.f32.mrf.mxu0  ;;  %v1242_v8 = vpop.f32.mrf.mxu1  ;;  %v1523_v11 = vadd.f32 %v2883_v46, %v1522_v4  ;;  %v1773_v12 = vadd.f32 %v2883_v46, %v1772_v5 }
 0x1bf   : > { %v993_v13 = vadd.f32 %v2883_v46, %v992_v7  ;;  %v1243_v14 = vadd.f32 %v2883_v46, %v1242_v8 }
 0x1c0   : > { %2574 = vst [vmem:[%s2902_s28 + $0x58] sm:$0xff] %v2542_v6   ;;  %v1566_v17 = vmax.f32 %v1523_v11, 0.0  ;;  %v1816_v18 = vmax.f32 %v1773_v12, 0.0 }
 0x1c1   : > { %v1035_v21 = vmax.f32 %v993_v13, 0.0  ;;  %v1285_v22 = vmax.f32 %v1243_v14, 0.0 }
 0x1c2   : > { %v1848_v28 = vmax.f32 %v1566_v17, %v1816_v18 }
 0x1c3   : > { %v1317_v31 = vmax.f32 %v1035_v21, %v1285_v22 }
 0x1c4   : > { %v1880_v33 = vmax.f32 %v1316_v27, %v1848_v28 }
 0x1c5   : > { %v1524_v19 = vpop.f32.mrf.mxu2  ;;  %v1774_v20 = vpop.f32.mrf.mxu3 }
 0x1c6   : > { %v1525_v23 = vadd.f32 %v2883_v46, %v1524_v19  ;;  %v1775_v24 = vadd.f32 %v2883_v46, %v1774_v20  ;;  %v995_v25 = vpop.f32.mrf.mxu0  ;;  %v1245_v26 = vpop.f32.mrf.mxu1 }
 0x1c7   : > { %v996_v40 = vadd.f32 %v2883_v46, %v995_v25  ;;  %v1246_v41 = vadd.f32 %v2883_v46, %v1245_v26 }
 0x1c8   : > { %v1567_v29 = vmax.f32 %v1525_v23, 0.0  ;;  %v1817_v30 = vmax.f32 %v1775_v24, 0.0 }
 0x1c9   : > { %v1036_v47 = vmax.f32 %v996_v40, 0.0  ;;  %v1286_v48 = vmax.f32 %v1246_v41, 0.0 }
 0x1ca   : > { %v1849_v32 = vmax.f32 %v1567_v29, %v1817_v30 }
 0x1cb   : > { %v1318_v59 = vmax.f32 %v1036_v47, %v1286_v48 }
 0x1cc   : > { %v1881_v34 = vmax.f32 %v1317_v31, %v1849_v32 }
 0x1cd   : > { %v1527_v35 = vpop.f32.mrf.mxu2  ;;  %v1777_v36 = vpop.f32.mrf.mxu3 }
 0x1ce   : > { %v2547_v37 = vpack.c.bf16 %v1881_v34, %v1880_v33  ;;  %v997_v38 = vpop.f32.mrf.mxu0  ;;  %v1247_v39 = vpop.f32.mrf.mxu1  ;;  %v1528_v42 = vadd.f32 %v2883_v46, %v1527_v35  ;;  %v1778_v43 = vadd.f32 %v2883_v46, %v1777_v36 }
 0x1cf   : > { %v998_v44 = vadd.f32 %v2883_v46, %v997_v38  ;;  %v1248_v45 = vadd.f32 %v2883_v46, %v1247_v39 }
 0x1d0   : > { %2575 = vst [vmem:[%s2902_s28 + $0x60] sm:$0xff] %v2547_v37   ;;  %v1568_v49 = vmax.f32 %v1528_v42, 0.0  ;;  %v1818_v50 = vmax.f32 %v1778_v43, 0.0 }
 0x1d1   : > { %v1037_v53 = vmax.f32 %v998_v44, 0.0  ;;  %v1287_v54 = vmax.f32 %v1248_v45, 0.0 }
 0x1d2   : > { %v1850_v60 = vmax.f32 %v1568_v49, %v1818_v50 }
 0x1d3   : > { %v1319_v63 = vmax.f32 %v1037_v53, %v1287_v54 }
 0x1d4   : > { %v1882_v1 = vmax.f32 %v1318_v59, %v1850_v60 }
 0x1d5   : > { %v1529_v51 = vpop.f32.mrf.mxu2  ;;  %v1779_v52 = vpop.f32.mrf.mxu3 }
 0x1d6   : > { %v1530_v55 = vadd.f32 %v2883_v46, %v1529_v51  ;;  %v1780_v56 = vadd.f32 %v2883_v46, %v1779_v52  ;;  %v1000_v57 = vpop.f32.mrf.mxu0  ;;  %v1250_v58 = vpop.f32.mrf.mxu1  ;;  %v2604_v46 = vld [vmem:[%s3063_s2] ss:$0 sm:$0xff] }
 0x1d7   : > { %v1001_v8 = vadd.f32 %v2604_v46, %v1000_v57  ;;  %v1251_v9 = vadd.f32 %v2604_v46, %v1250_v58 }
 0x1d8   : > { %v1569_v61 = vmax.f32 %v1530_v55, 0.0  ;;  %v1819_v62 = vmax.f32 %v1780_v56, 0.0 }
 0x1d9   : > { %v1038_v14 = vmax.f32 %v1001_v8, 0.0  ;;  %v1288_v15 = vmax.f32 %v1251_v9, 0.0 }
 0x1da   : > { %v1851_v0 = vmax.f32 %v1569_v61, %v1819_v62 }
 0x1db   : > { %v1320_v26 = vmax.f32 %v1038_v14, %v1288_v15 }
 0x1dc   : > { %v1883_v2 = vmax.f32 %v1319_v63, %v1851_v0 }
 0x1dd   : > { %v1532_v3 = vpop.f32.mrf.mxu2  ;;  %v1782_v4 = vpop.f32.mrf.mxu3 }
 0x1de   : > { %v2552_v5 = vpack.c.bf16 %v1883_v2, %v1882_v1  ;;  %v1002_v6 = vpop.f32.mrf.mxu0  ;;  %v1252_v7 = vpop.f32.mrf.mxu1  ;;  %v1533_v10 = vadd.f32 %v2604_v46, %v1532_v3  ;;  %v1783_v11 = vadd.f32 %v2604_v46, %v1782_v4 }
 0x1df   : > { %v1003_v12 = vadd.f32 %v2604_v46, %v1002_v6  ;;  %v1253_v13 = vadd.f32 %v2604_v46, %v1252_v7 }
 0x1e0   : > { %2576 = vst [vmem:[%s2902_s28 + $0x68] sm:$0xff] %v2552_v5   ;;  %v1570_v16 = vmax.f32 %v1533_v10, 0.0  ;;  %v1820_v17 = vmax.f32 %v1783_v11, 0.0 }
 0x1e1   : > { %v1039_v20 = vmax.f32 %v1003_v12, 0.0  ;;  %v1289_v21 = vmax.f32 %v1253_v13, 0.0 }
 0x1e2   : > { %v1852_v27 = vmax.f32 %v1570_v16, %v1820_v17 }
 0x1e3   : > { %v1321_v30 = vmax.f32 %v1039_v20, %v1289_v21 }
 0x1e4   : > { %v1884_v32 = vmax.f32 %v1320_v26, %v1852_v27 }
 0x1e5   : > { %v1534_v18 = vpop.f32.mrf.mxu2  ;;  %v1784_v19 = vpop.f32.mrf.mxu3 }
 0x1e6   : > { %v1535_v22 = vadd.f32 %v2604_v46, %v1534_v18  ;;  %v1785_v23 = vadd.f32 %v2604_v46, %v1784_v19  ;;  %v1005_v24 = vpop.f32.mrf.mxu0  ;;  %v1255_v25 = vpop.f32.mrf.mxu1 }
 0x1e7   : > { %v1006_v39 = vadd.f32 %v2604_v46, %v1005_v24  ;;  %v1256_v40 = vadd.f32 %v2604_v46, %v1255_v25 }
 0x1e8   : > { %v1571_v28 = vmax.f32 %v1535_v22, 0.0  ;;  %v1821_v29 = vmax.f32 %v1785_v23, 0.0 }
 0x1e9   : > { %v1040_v45 = vmax.f32 %v1006_v39, 0.0  ;;  %v1290_v47 = vmax.f32 %v1256_v40, 0.0 }
 0x1ea   : > { %v1853_v31 = vmax.f32 %v1571_v28, %v1821_v29 }
 0x1eb   : > { %v1322_v56 = vmax.f32 %v1040_v45, %v1290_v47 }
 0x1ec   : > { %v1885_v33 = vmax.f32 %v1321_v30, %v1853_v31 }
 0x1ed   : > { %v1537_v34 = vpop.f32.mrf.mxu2  ;;  %v1787_v35 = vpop.f32.mrf.mxu3 }
 0x1ee   : > { %v2557_v36 = vpack.c.bf16 %v1885_v33, %v1884_v32  ;;  %v1007_v37 = vpop.f32.mrf.mxu0  ;;  %v1257_v38 = vpop.f32.mrf.mxu1  ;;  %v1538_v41 = vadd.f32 %v2604_v46, %v1537_v34  ;;  %v1788_v42 = vadd.f32 %v2604_v46, %v1787_v35 }
 0x1ef   : > { %v1008_v43 = vadd.f32 %v2604_v46, %v1007_v37  ;;  %v1258_v44 = vadd.f32 %v2604_v46, %v1257_v38 }
 0x1f0   : > { %2577 = vst [vmem:[%s2902_s28 + $0x70] sm:$0xff] %v2557_v36   ;;  %v1572_v48 = vmax.f32 %v1538_v41, 0.0  ;;  %v1822_v49 = vmax.f32 %v1788_v42, 0.0 }
 0x1f1   : > { %v1041_v52 = vmax.f32 %v1008_v43, 0.0  ;;  %v1291_v53 = vmax.f32 %v1258_v44, 0.0 }
 0x1f2   : > { %v1854_v57 = vmax.f32 %v1572_v48, %v1822_v49 }
 0x1f3   : > { %v1323_v60 = vmax.f32 %v1041_v52, %v1291_v53 }
 0x1f4   : > { %v1886_v62 = vmax.f32 %v1322_v56, %v1854_v57 }
 0x1f5   : > { %v1539_v50 = vpop.f32.mrf.mxu2  ;;  %v1789_v51 = vpop.f32.mrf.mxu3 }
 0x1f6   : > { %v1540_v54 = vadd.f32 %v2604_v46, %v1539_v50  ;;  %v1790_v55 = vadd.f32 %v2604_v46, %v1789_v51 }
 0x1f8   : > { %v1573_v58 = vmax.f32 %v1540_v54, 0.0  ;;  %v1823_v59 = vmax.f32 %v1790_v55, 0.0 }
 0x1fa   : > { %v1855_v61 = vmax.f32 %v1573_v58, %v1823_v59 }
 0x1fc   : > { %v1887_v63 = vmax.f32 %v1323_v60, %v1855_v61 }
 0x1fe   : > { %v2562_v0 = vpack.c.bf16 %v1887_v63, %v1886_v62 }
 0x200   : > { %2578 = vst [vmem:[%s2902_s28 + $0x78] sm:$0xff] %v2562_v0  }
 0x201 PF: > { %p10_p9 = scmp.ge.s32.totalorder %s2666_s16, 4   ;;  %s3065_s12 = smov %s2623_s13 }
 0x202   : > { %s3066_s13 = smov %s2675_s19  ;;  %s3067_s14 = smov %s2666_s16 }
 0x203   :  { %12 = sbr.rel (!%p10_p9) target bundleno = 2 (0x2), region = 111 }

// kernel: net_forward.3
= control target key start
LH: loop header
LB: loop body
LE: loop exit
PB: predicated region body
PF: predicated region fallthrough
CT: control target
= control target key end

     0   :  { %s7678_s1 = inlined_call_operand.vmem [shape: bf16[256,128], index: 1, kind: input, shape index: {}]   ;;  %s7679_s2 = inlined_call_operand.vmem [shape: f32[1,128], index: 2, kind: input, shape index: {}]   ;;  %s7680_s0 = inlined_call_operand.vmem [shape: bf16[4,200,256], index: 0, kind: input, shape index: {}]   ;;  %s7681_s3 = inlined_call_operand.vmem [shape: bf16[25,128,128], index: 3, kind: input, shape index: {}]   ;;  %s7682_s4 = inlined_call_operand.vmem [shape: f32[1,128], index: 4, kind: input, shape index: {}]   ;;  %s7683_s6 = inlined_call_operand.vmem [shape: f32[1,128], index: 6, kind: input, shape index: {}]   ;;  %s7684_s5 = inlined_call_operand.vmem [shape: bf16[128,128], index: 5, kind: input, shape index: {}]   ;;  %s7685_s7 = inlined_call_operand.vmem [shape: bf16[128,128], index: 7, kind: input, shape index: {}]   ;;  %s7686_s8 = inlined_call_operand.vmem [shape: f32[1,128], index: 8, kind: input, shape index: {}]   ;;  %s7687_s9 = inlined_call_operand.vmem [shape: f32[8,128], index: 9, kind: output, shape index: {}]  }
   0x1   :  { %v5915_v0 = vld [vmem:[%s7678_s1 + $0x38] sm:$0xff]  ;;  %v5927_v2 = vld [vmem:[%s7678_s1 + $0x30] sm:$0xff]  ;;  %v5941_v4 = vld [vmem:[%s7678_s1 + $0x28] sm:$0xff] }
   0x2   :  { %v5920_v1 = vld [vmem:[%s7678_s1 + $0x78] sm:$0xff]  ;;  %316 = vmatpush.bf16.msra.mxu0 %v5915_v0  ;;  %v5932_v3 = vld [vmem:[%s7678_s1 + $0x70] sm:$0xff]  ;;  %640 = vmatpush.bf16.msra.mxu2 %v5915_v0  ;;  %v5946_v5 = vld [vmem:[%s7678_s1 + $0x68] sm:$0xff] }
   0x3   :  { %389 = vmatpush.bf16.msra.mxu1 %v5920_v1  ;;  %713 = vmatpush.bf16.msra.mxu3 %v5920_v1  ;;  %v5955_v6 = vld [vmem:[%s7678_s1 + $0x20] sm:$0xff]  ;;  %v5969_v8 = vld [vmem:[%s7678_s1 + $0x18] sm:$0xff]  ;;  %v5983_v10 = vld [vmem:[%s7678_s1 + $0x10] sm:$0xff] }
   0x4   :  { %v5960_v7 = vld [vmem:[%s7678_s1 + $0x60] sm:$0xff]  ;;  %v5974_v9 = vld [vmem:[%s7678_s1 + $0x58] sm:$0xff]  ;;  %v5988_v11 = vld [vmem:[%s7678_s1 + $0x50] sm:$0xff] }
   0x5   :  { %v5997_v12 = vld [vmem:[%s7678_s1 + $0x8] sm:$0xff]  ;;  %v6009_v14 = vld [vmem:[%s7678_s1] sm:$0xff]  ;;  %v5569_v21 = vld [vmem:[%s7680_s0 + $0xcc] sm:$0xf0] }
   0x6   :  { %317 = vmatpush.bf16.msra.mxu0 %v5927_v2  ;;  %641 = vmatpush.bf16.msra.mxu2 %v5927_v2  ;;  %v6002_v13 = vld [vmem:[%s7678_s1 + $0x48] sm:$0xff]  ;;  %v6014_v15 = vld [vmem:[%s7678_s1 + $0x40] sm:$0xff]  ;;  %v3946_v23 = vld [vmem:[%s7680_s0 + $0xd0] sm:$0xf0] }
   0x7   :  { %390 = vmatpush.bf16.msra.mxu1 %v5932_v3  ;;  %714 = vmatpush.bf16.msra.mxu3 %v5932_v3  ;;  %v3759_v16 = vld [vmem:[%s7680_s0] sm:$0xf]  ;;  %v5545_v17 = vld [vmem:[%s7680_s0 + $0x4] sm:$0xf0]  ;;  %v5544_v18 = vld [vmem:[%s7680_s0 + $0x4] sm:$0xf] }
   0x8   :  { %v3761_v19 = vld [vmem:[%s7680_s0 + $0x8] sm:$0xf0]  ;;  %v3944_v20 = vld [vmem:[%s7680_s0 + $0xc8] sm:$0xf]  ;;  %v3760_v24 = vor.u32 %v5545_v17, %v3759_v16  ;;  %v3767_v28 = vld [vmem:[%s7680_s0 + $0x10] sm:$0xf] }
   0x9   :  { %v5568_v22 = vld [vmem:[%s7680_s0 + $0xcc] sm:$0xf]  ;;  %v3764_v25 = vor.u32 %v5544_v18, %v3761_v19  ;;  %v3945_v26 = vor.u32 %v5569_v21, %v3944_v20  ;;  %v5547_v29 = vld [vmem:[%s7680_s0 + $0x14] sm:$0xf0]  ;;  %v5546_v30 = vld [vmem:[%s7680_s0 + $0x14] sm:$0xf] }
   0xa   :  { %318 = vmatpush.bf16.msra.mxu0 %v5941_v4  ;;  %642 = vmatpush.bf16.msra.mxu2 %v5941_v4  ;;  %v3949_v27 = vor.u32 %v5568_v22, %v3946_v23  ;;  %v3769_v31 = vld [vmem:[%s7680_s0 + $0x18] sm:$0xf0]  ;;  %v3952_v32 = vld [vmem:[%s7680_s0 + $0xd8] sm:$0xf]  ;;  %v5571_v33 = vld [vmem:[%s7680_s0 + $0xdc] sm:$0xf0]  ;;  %v3768_v36 = vor.u32 %v5547_v29, %v3767_v28 }
   0xb   :  { %391 = vmatpush.bf16.msra.mxu1 %v5946_v5  ;;  %715 = vmatpush.bf16.msra.mxu3 %v5946_v5  ;;  %v5570_v34 = vld [vmem:[%s7680_s0 + $0xdc] sm:$0xf]  ;;  %v3954_v35 = vld [vmem:[%s7680_s0 + $0xe0] sm:$0xf0]  ;;  %v3772_v37 = vor.u32 %v5546_v30, %v3769_v31  ;;  %v3953_v38 = vor.u32 %v5571_v33, %v3952_v32  ;;  %v3775_v40 = vld [vmem:[%s7680_s0 + $0x20] sm:$0xf] }
   0xc   :  { %v3957_v39 = vor.u32 %v5570_v34, %v3954_v35  ;;  %v5549_v41 = vld [vmem:[%s7680_s0 + $0x24] sm:$0xf0]  ;;  %v5548_v42 = vld [vmem:[%s7680_s0 + $0x24] sm:$0xf]  ;;  %v3777_v43 = vld [vmem:[%s7680_s0 + $0x28] sm:$0xf0] }
   0xd   :  { %v3960_v44 = vld [vmem:[%s7680_s0 + $0xe8] sm:$0xf]  ;;  %v5573_v45 = vld [vmem:[%s7680_s0 + $0xec] sm:$0xf0]  ;;  %v5572_v46 = vld [vmem:[%s7680_s0 + $0xec] sm:$0xf]  ;;  %v3776_v48 = vor.u32 %v5549_v41, %v3775_v40  ;;  %v3780_v49 = vor.u32 %v5548_v42, %v3777_v43 }
   0xe   :  { %319 = vmatpush.bf16.msra.mxu0 %v5955_v6  ;;  %643 = vmatpush.bf16.msra.mxu2 %v5955_v6  ;;  %v3962_v47 = vld [vmem:[%s7680_s0 + $0xf0] sm:$0xf0]  ;;  %v3961_v50 = vor.u32 %v5573_v45, %v3960_v44  ;;  %v3783_v52 = vld [vmem:[%s7680_s0 + $0x30] sm:$0xf]  ;;  %v5551_v53 = vld [vmem:[%s7680_s0 + $0x34] sm:$0xf0] }
   0xf   :  { %392 = vmatpush.bf16.msra.mxu1 %v5960_v7  ;;  %716 = vmatpush.bf16.msra.mxu3 %v5960_v7  ;;  %v3965_v51 = vor.u32 %v5572_v46, %v3962_v47  ;;  %v5550_v54 = vld [vmem:[%s7680_s0 + $0x34] sm:$0xf]  ;;  %v3785_v55 = vld [vmem:[%s7680_s0 + $0x38] sm:$0xf0]  ;;  %v3968_v56 = vld [vmem:[%s7680_s0 + $0xf8] sm:$0xf]  ;;  %v3784_v60 = vor.u32 %v5551_v53, %v3783_v52 }
  0x10   :  { %v5575_v57 = vld [vmem:[%s7680_s0 + $0xfc] sm:$0xf0]  ;;  %v5574_v58 = vld [vmem:[%s7680_s0 + $0xfc] sm:$0xf]  ;;  %v3970_v59 = vld [vmem:[%s7680_s0 + $0x100] sm:$0xf0]  ;;  %v3788_v61 = vor.u32 %v5550_v54, %v3785_v55 }
  0x11   :  { %v3969_v62 = vor.u32 %v5575_v57, %v3968_v56  ;;  %v3973_v63 = vor.u32 %v5574_v58, %v3970_v59  ;;  %v3984_v16 = vld [vmem:[%s7680_s0 + $0x118] sm:$0xf]  ;;  %v5579_v17 = vld [vmem:[%s7680_s0 + $0x11c] sm:$0xf0]  ;;  %v5578_v18 = vld [vmem:[%s7680_s0 + $0x11c] sm:$0xf] }
  0x12   :  { %320 = vmatpush.bf16.msra.mxu0 %v5969_v8  ;;  %644 = vmatpush.bf16.msra.mxu2 %v5969_v8  ;;  %v3986_v19 = vld [vmem:[%s7680_s0 + $0x120] sm:$0xf0]  ;;  %v3985_v22 = vor.u32 %v5579_v17, %v3984_v16  ;;  %v3992_v28 = vld [vmem:[%s7680_s0 + $0x128] sm:$0xf]  ;;  %v5581_v29 = vld [vmem:[%s7680_s0 + $0x12c] sm:$0xf0] }
  0x13   :  { %393 = vmatpush.bf16.msra.mxu1 %v5974_v9  ;;  %717 = vmatpush.bf16.msra.mxu3 %v5974_v9  ;;  %v3989_v23 = vor.u32 %v5578_v18, %v3986_v19  ;;  %v5580_v30 = vld [vmem:[%s7680_s0 + $0x12c] sm:$0xf]  ;;  %v3994_v31 = vld [vmem:[%s7680_s0 + $0x130] sm:$0xf0]  ;;  %v3993_v34 = vor.u32 %v5581_v29, %v3992_v28  ;;  %v4000_v40 = vld [vmem:[%s7680_s0 + $0x138] sm:$0xf] }
  0x14   :  { %v3997_v35 = vor.u32 %v5580_v30, %v3994_v31  ;;  %v5583_v41 = vld [vmem:[%s7680_s0 + $0x13c] sm:$0xf0]  ;;  %v5582_v42 = vld [vmem:[%s7680_s0 + $0x13c] sm:$0xf]  ;;  %v4002_v43 = vld [vmem:[%s7680_s0 + $0x140] sm:$0xf0] }
  0x15   :  { %v4001_v46 = vor.u32 %v5583_v41, %v4000_v40  ;;  %v4005_v47 = vor.u32 %v5582_v42, %v4002_v43  ;;  %v3825_v52 = vld [vmem:[%s7680_s0 + $0x88] sm:$0xf0]  ;;  %v4008_v53 = vld [vmem:[%s7680_s0 + $0x148] sm:$0xf]  ;;  %v5585_v54 = vld [vmem:[%s7680_s0 + $0x14c] sm:$0xf0] }
  0x16   :  { %321 = vmatpush.bf16.msra.mxu0 %v5983_v10  ;;  %645 = vmatpush.bf16.msra.mxu2 %v5983_v10  ;;  %v5584_v55 = vld [vmem:[%s7680_s0 + $0x14c] sm:$0xf]  ;;  %v4010_v56 = vld [vmem:[%s7680_s0 + $0x150] sm:$0xf0]  ;;  %v5587_v16 = vld [vmem:[%s7680_s0 + $0x15c] sm:$0xf0] }
  0x17   :  { %394 = vmatpush.bf16.msra.mxu1 %v5988_v11  ;;  %718 = vmatpush.bf16.msra.mxu3 %v5988_v11  ;;  %v5586_v17 = vld [vmem:[%s7680_s0 + $0x15c] sm:$0xf]  ;;  %v4018_v18 = vld [vmem:[%s7680_s0 + $0x160] sm:$0xf0]  ;;  %v3839_v43 = vld [vmem:[%s7680_s0 + $0xa0] sm:$0xf] }
  0x18   :  { %v4021_v28 = vor.u32 %v5586_v17, %v4018_v18 }
  0x1a   :  { %322 = vmatpush.bf16.msra.mxu0 %v5997_v12  ;;  %646 = vmatpush.bf16.msra.mxu2 %v5997_v12 }
  0x1b   :  { %395 = vmatpush.bf16.msra.mxu1 %v6002_v13  ;;  %719 = vmatpush.bf16.msra.mxu3 %v6002_v13 }
  0x1e   :  { %323 = vmatpush.bf16.msra.mxu0 %v6009_v14  ;;  %647 = vmatpush.bf16.msra.mxu2 %v6009_v14 }
  0x1f   :  { %396 = vmatpush.bf16.msra.mxu1 %v6014_v15  ;;  %720 = vmatpush.bf16.msra.mxu3 %v6014_v15 }
  0x21   :  { %324 = vmatmul.bf16.vlgmr.msra.gmra.mxu0 %v3760_v24  ;;  %648 = vmatmul.bf16.vlgmr.msra.gmra.mxu2 %v3945_v26  ;;  %v3807_v24 = vld [vmem:[%s7680_s0 + $0x60] sm:$0xf]  ;;  %v5556_v26 = vld [vmem:[%s7680_s0 + $0x64] sm:$0xf] }
  0x22   :  { %1338 = vmatpush.bf16.msrb.mxu2 %v5915_v0  ;;  %397 = vmatmul.bf16.vlgmr.msra.gmra.mxu1 %v3764_v25  ;;  %v5557_v25 = vld [vmem:[%s7680_s0 + $0x64] sm:$0xf0] }
  0x23   :  { %1411 = vmatpush.bf16.msrb.mxu3 %v5920_v1  ;;  %989 = vmatpush.bf16.msrb.mxu0 %v5915_v0  ;;  %v3791_v0 = vld [vmem:[%s7680_s0 + $0x40] sm:$0xf]  ;;  %v3808_v32 = vor.u32 %v5557_v25, %v3807_v24 }
  0x24   :  { %721 = vmatmul.bf16.vlgmr.msra.gmra.mxu3 %v3949_v27  ;;  %1062 = vmatpush.bf16.msrb.mxu1 %v5920_v1  ;;  %v5553_v1 = vld [vmem:[%s7680_s0 + $0x44] sm:$0xf0]  ;;  %v3809_v27 = vld [vmem:[%s7680_s0 + $0x68] sm:$0xf0] }
  0x25   :  { %v3812_v33 = vor.u32 %v5556_v26, %v3809_v27 }
  0x26   :  { %1339 = vmatpush.bf16.msrb.mxu2 %v5927_v2 }
  0x27   :  { %1412 = vmatpush.bf16.msrb.mxu3 %v5932_v3  ;;  %990 = vmatpush.bf16.msrb.mxu0 %v5927_v2  ;;  %v5552_v2 = vld [vmem:[%s7680_s0 + $0x44] sm:$0xf] }
  0x28   :  { %1063 = vmatpush.bf16.msrb.mxu1 %v5932_v3  ;;  %v3793_v3 = vld [vmem:[%s7680_s0 + $0x48] sm:$0xf0] }
  0x2a   :  { %1340 = vmatpush.bf16.msrb.mxu2 %v5941_v4 }
  0x2b   :  { %1413 = vmatpush.bf16.msrb.mxu3 %v5946_v5  ;;  %991 = vmatpush.bf16.msrb.mxu0 %v5941_v4  ;;  %v3976_v4 = vld [vmem:[%s7680_s0 + $0x108] sm:$0xf] }
  0x2c   :  { %1064 = vmatpush.bf16.msrb.mxu1 %v5946_v5  ;;  %v5577_v5 = vld [vmem:[%s7680_s0 + $0x10c] sm:$0xf0] }
  0x2e   :  { %1341 = vmatpush.bf16.msrb.mxu2 %v5955_v6 }
  0x2f   :  { %1414 = vmatpush.bf16.msrb.mxu3 %v5960_v7  ;;  %992 = vmatpush.bf16.msrb.mxu0 %v5955_v6  ;;  %v5576_v6 = vld [vmem:[%s7680_s0 + $0x10c] sm:$0xf] }
  0x30   :  { %1065 = vmatpush.bf16.msrb.mxu1 %v5960_v7  ;;  %v3978_v7 = vld [vmem:[%s7680_s0 + $0x110] sm:$0xf0] }
  0x31   :  { %329 = vmatmul.bf16.gmra.mxu0 %v3768_v36  ;;  %653 = vmatmul.bf16.gmra.mxu2 %v3953_v38  ;;  %v3815_v36 = vld [vmem:[%s7680_s0 + $0x70] sm:$0xf]  ;;  %v5558_v38 = vld [vmem:[%s7680_s0 + $0x74] sm:$0xf] }
  0x32   :  { %1342 = vmatpush.bf16.msrb.mxu2 %v5969_v8  ;;  %402 = vmatmul.bf16.gmra.mxu1 %v3772_v37  ;;  %v5559_v37 = vld [vmem:[%s7680_s0 + $0x74] sm:$0xf0] }
  0x33   :  { %1415 = vmatpush.bf16.msrb.mxu3 %v5974_v9  ;;  %993 = vmatpush.bf16.msrb.mxu0 %v5969_v8  ;;  %v3792_v8 = vor.u32 %v5553_v1, %v3791_v0  ;;  %v3816_v44 = vor.u32 %v5559_v37, %v3815_v36 }
  0x34   :  { %726 = vmatmul.bf16.gmra.mxu3 %v3957_v39  ;;  %1066 = vmatpush.bf16.msrb.mxu1 %v5974_v9  ;;  %v3796_v9 = vor.u32 %v5552_v2, %v3793_v3  ;;  %v3817_v39 = vld [vmem:[%s7680_s0 + $0x78] sm:$0xf0] }
  0x35   :  { %v3820_v45 = vor.u32 %v5558_v38, %v3817_v39 }
  0x36   :  { %1343 = vmatpush.bf16.msrb.mxu2 %v5983_v10 }
  0x37   :  { %1416 = vmatpush.bf16.msrb.mxu3 %v5988_v11  ;;  %994 = vmatpush.bf16.msrb.mxu0 %v5983_v10  ;;  %v3977_v10 = vor.u32 %v5577_v5, %v3976_v4 }
  0x38   :  { %1067 = vmatpush.bf16.msrb.mxu1 %v5988_v11  ;;  %v3981_v11 = vor.u32 %v5576_v6, %v3978_v7 }
  0x3a   :  { %1344 = vmatpush.bf16.msrb.mxu2 %v5997_v12 }
  0x3b   :  { %1417 = vmatpush.bf16.msrb.mxu3 %v6002_v13  ;;  %995 = vmatpush.bf16.msrb.mxu0 %v5997_v12  ;;  %v3799_v12 = vld [vmem:[%s7680_s0 + $0x50] sm:$0xf] }
  0x3c   :  { %1068 = vmatpush.bf16.msrb.mxu1 %v6002_v13  ;;  %v5555_v13 = vld [vmem:[%s7680_s0 + $0x54] sm:$0xf0] }
  0x3d   :  { %v3800_v20 = vor.u32 %v5555_v13, %v3799_v12 }
  0x3e   :  { %1345 = vmatpush.bf16.msrb.mxu2 %v6009_v14 }
  0x3f   :  { %1418 = vmatpush.bf16.msrb.mxu3 %v6014_v15  ;;  %996 = vmatpush.bf16.msrb.mxu0 %v6009_v14  ;;  %v5554_v14 = vld [vmem:[%s7680_s0 + $0x54] sm:$0xf] }
  0x40   :  { %1069 = vmatpush.bf16.msrb.mxu1 %v6014_v15  ;;  %v3801_v15 = vld [vmem:[%s7680_s0 + $0x58] sm:$0xf0] }
  0x41   :  { %334 = vmatmul.bf16.gmra.mxu0 %v3776_v48  ;;  %658 = vmatmul.bf16.gmra.mxu2 %v3961_v50  ;;  %v3804_v21 = vor.u32 %v5554_v14, %v3801_v15  ;;  %v6251_v48 = vld [vmem:[%s7679_s2] ss:$0 sm:$0xff]  ;;  %v5561_v50 = vld [vmem:[%s7680_s0 + $0x84] sm:$0xf0]  ;;  %v3833_v14 = vld [vmem:[%s7680_s0 + $0x98] sm:$0xf0] }
  0x42   :  { %407 = vmatmul.bf16.gmra.mxu1 %v3780_v49  ;;  %v3823_v49 = vld [vmem:[%s7680_s0 + $0x80] sm:$0xf]  ;;  %v4016_v15 = vld [vmem:[%s7680_s0 + $0x158] sm:$0xf] }
  0x43   :  { %v3824_v57 = vor.u32 %v5561_v50, %v3823_v49  ;;  %v4017_v27 = vor.u32 %v5587_v16, %v4016_v15  ;;  %v3841_v49 = vld [vmem:[%s7680_s0 + $0xa8] sm:$0xf0]  ;;  %v4024_v50 = vld [vmem:[%s7680_s0 + $0x168] sm:$0xf]  ;;  %v5567_v15 = vld [vmem:[%s7680_s0 + $0xb4] sm:$0xf0] }
  0x44   :  { %731 = vmatmul.bf16.gmra.mxu3 %v3965_v51  ;;  %v5560_v51 = vld [vmem:[%s7680_s0 + $0x84] sm:$0xf]  ;;  %v5566_v16 = vld [vmem:[%s7680_s0 + $0xb4] sm:$0xf] }
  0x45   :  { %v3828_v58 = vor.u32 %v5560_v51, %v3825_v52  ;;  %v5589_v51 = vld [vmem:[%s7680_s0 + $0x16c] sm:$0xf0]  ;;  %v5588_v52 = vld [vmem:[%s7680_s0 + $0x16c] sm:$0xf] }
  0x51   :  { %339 = vmatmul.bf16.gmra.mxu0 %v3784_v60  ;;  %663 = vmatmul.bf16.gmra.mxu2 %v3969_v62  ;;  %v4013_v62 = vor.u32 %v5584_v55, %v4010_v56 }
  0x52   :  { %412 = vmatmul.bf16.gmra.mxu1 %v3788_v61  ;;  %v4009_v61 = vor.u32 %v5585_v54, %v4008_v53  ;;  %v4026_v53 = vld [vmem:[%s7680_s0 + $0x170] sm:$0xf0] }
  0x54   :  { %736 = vmatmul.bf16.gmra.mxu3 %v3973_v63 }
  0x61   :  { %344 = vmatmul.bf16.gmra.mxu0 %v3792_v8  ;;  %668 = vmatmul.bf16.gmra.mxu2 %v3977_v10  ;;  %v5563_v10 = vld [vmem:[%s7680_s0 + $0x94] sm:$0xf0] }
  0x62   :  { %417 = vmatmul.bf16.gmra.mxu1 %v3796_v9  ;;  %v3831_v9 = vld [vmem:[%s7680_s0 + $0x90] sm:$0xf] }
  0x64   :  { %741 = vmatmul.bf16.gmra.mxu3 %v3981_v11  ;;  %v5562_v11 = vld [vmem:[%s7680_s0 + $0x94] sm:$0xf] }
  0x71   :  { %349 = vmatmul.bf16.gmra.mxu0 %v3800_v20  ;;  %673 = vmatmul.bf16.gmra.mxu2 %v3985_v22  ;;  %v3832_v22 = vor.u32 %v5563_v10, %v3831_v9 }
  0x72   :  { %422 = vmatmul.bf16.gmra.mxu1 %v3804_v21 }
  0x74   :  { %746 = vmatmul.bf16.gmra.mxu3 %v3989_v23  ;;  %v3836_v23 = vor.u32 %v5562_v11, %v3833_v14  ;;  %v3847_v14 = vld [vmem:[%s7680_s0 + $0xb0] sm:$0xf] }
  0x81   :  { %354 = vmatmul.bf16.gmra.mxu0 %v3808_v32  ;;  %678 = vmatmul.bf16.gmra.mxu2 %v3993_v34 }
  0x82   :  { %427 = vmatmul.bf16.gmra.mxu1 %v3812_v33 }
  0x84   :  { %751 = vmatmul.bf16.gmra.mxu3 %v3997_v35 }
  0x91   :  { %359 = vmatmul.bf16.gmra.mxu0 %v3816_v44  ;;  %683 = vmatmul.bf16.gmra.mxu2 %v4001_v46  ;;  %v5565_v44 = vld [vmem:[%s7680_s0 + $0xa4] sm:$0xf0] }
  0x92   :  { %432 = vmatmul.bf16.gmra.mxu1 %v3820_v45  ;;  %v5564_v45 = vld [vmem:[%s7680_s0 + $0xa4] sm:$0xf] }
  0x94   :  { %756 = vmatmul.bf16.gmra.mxu3 %v4005_v47 }
  0x9e   :  { %v325_v59 = vpop.f32.mrf.mxu0 }
  0x9f   :  { %v398_v60 = vpop.f32.mrf.mxu1  ;;  %v326_v63 = vadd.f32 %v6251_v48, %v325_v59 }
  0xa1   :  { %v399_v0 = vadd.f32 %v398_v60, %v326_v63  ;;  %364 = vmatmul.bf16.gmra.mxu0 %v3824_v57  ;;  %688 = vmatmul.bf16.gmra.mxu2 %v4009_v61  ;;  %v3840_v57 = vor.u32 %v5565_v44, %v3839_v43  ;;  %v4029_v63 = vor.u32 %v5588_v52, %v4026_v53 }
  0xa2   :  { %437 = vmatmul.bf16.gmra.mxu1 %v3828_v58  ;;  %v3844_v58 = vor.u32 %v5564_v45, %v3841_v49 }
  0xa3   :  { %v462_v12 = vmax.f32 %v399_v0, 0.0 }
  0xa4   :  { %761 = vmatmul.bf16.gmra.mxu3 %v4013_v62  ;;  %v649_v1 = vpop.f32.mrf.mxu2  ;;  %v4025_v62 = vor.u32 %v5589_v51, %v4024_v50  ;;  %v3941_v50 = vld [vmem:[%s7680_s0 + $0x188] sm:$0xff] }
  0xa5   :  { %v650_v3 = vadd.f32 %v6251_v48, %v649_v1 }
  0xa6   :  { %v327_v4 = vpop.f32.mrf.mxu0 }
  0xa7   :  { %v722_v2 = vpop.f32.mrf.mxu3  ;;  %v400_v5 = vpop.f32.mrf.mxu1  ;;  %v328_v6 = vadd.f32 %v6251_v48, %v327_v4 }
  0xa8   :  { %v723_v7 = vadd.f32 %v722_v2, %v650_v3 }
  0xa9   :  { %v401_v8 = vadd.f32 %v400_v5, %v328_v6 }
  0xaa   :  { %v786_v13 = vmax.f32 %v723_v7, 0.0 }
  0xab   :  { %v463_v32 = vmax.f32 %v401_v8, 0.0 }
  0xac   :  { %v6304_v19 = vmax.f32 %v462_v12, %v786_v13  ;;  %v651_v20 = vpop.f32.mrf.mxu2 }
  0xad   :  { %v652_v24 = vadd.f32 %v6251_v48, %v651_v20  ;;  %v3849_v20 = vld [vmem:[%s7680_s0 + $0xb8] sm:$0xf0] }
  0xae   :  { %v330_v25 = vpop.f32.mrf.mxu0 }
  0xaf   :  { %v724_v21 = vpop.f32.mrf.mxu3  ;;  %v403_v26 = vpop.f32.mrf.mxu1  ;;  %v331_v29 = vadd.f32 %v6251_v48, %v330_v25 }
  0xb0   :  { %v725_v30 = vadd.f32 %v724_v21, %v652_v24  ;;  %v4032_v21 = vld [vmem:[%s7680_s0 + $0x178] sm:$0xf]  ;;  %v4034_v24 = vld [vmem:[%s7680_s0 + $0x180] sm:$0xf0] }
  0xb1   :  { %v404_v31 = vadd.f32 %v403_v26, %v331_v29  ;;  %369 = vmatmul.bf16.gmra.mxu0 %v3832_v22  ;;  %693 = vmatmul.bf16.gmra.mxu2 %v4017_v27  ;;  %v5591_v22 = vld [vmem:[%s7680_s0 + $0x17c] sm:$0xf0]  ;;  %v3852_v29 = vor.u32 %v5566_v16, %v3849_v20 }
  0xb2   :  { %442 = vmatmul.bf16.gmra.mxu1 %v3836_v23  ;;  %v787_v33 = vmax.f32 %v725_v30, 0.0  ;;  %v5590_v23 = vld [vmem:[%s7680_s0 + $0x17c] sm:$0xf] }
  0xb3   :  { %v464_v46 = vmax.f32 %v404_v31, 0.0 }
  0xb4   :  { %766 = vmatmul.bf16.gmra.mxu3 %v4021_v28  ;;  %v6308_v34 = vmax.f32 %v463_v32, %v787_v33  ;;  %v654_v35 = vpop.f32.mrf.mxu2  ;;  %v3848_v28 = vor.u32 %v5567_v15, %v3847_v14  ;;  %v4033_v33 = vor.u32 %v5591_v22, %v4032_v21  ;;  %v4065_v22 = vld [vmem:[%s7680_s0 + $0x190] sm:$0xf] }
  0xb5   :  { %v655_v37 = vadd.f32 %v6251_v48, %v654_v35  ;;  %v4037_v35 = vor.u32 %v5590_v23, %v4034_v24  ;;  %v5593_v23 = vld [vmem:[%s7680_s0 + $0x194] sm:$0xf0]  ;;  %v5592_v24 = vld [vmem:[%s7680_s0 + $0x194] sm:$0xf] }
  0xb6   :  { %v332_v38 = vpop.f32.mrf.mxu0 }
  0xb7   :  { %v727_v36 = vpop.f32.mrf.mxu3  ;;  %v405_v39 = vpop.f32.mrf.mxu1  ;;  %v333_v40 = vadd.f32 %v6251_v48, %v332_v38 }
  0xb8   :  { %v728_v41 = vadd.f32 %v727_v36, %v655_v37 }
  0xb9   :  { %v406_v42 = vadd.f32 %v405_v39, %v333_v40 }
  0xba   :  { %v788_v47 = vmax.f32 %v728_v41, 0.0 }
  0xbb   :  { %v465_v3 = vmax.f32 %v406_v42, 0.0 }
  0xbc   :  { %v6336_v54 = vmax.f32 %v464_v46, %v788_v47  ;;  %v656_v55 = vpop.f32.mrf.mxu2  ;;  %v89_v47 = vld [vmem:[%s7680_s0 + $0xc0] sm:$0xff] }
  0xbd   :  { %v657_v59 = vadd.f32 %v6251_v48, %v656_v55  ;;  %v166_v53 = vunpack.c.l.b16 %v89_v47  ;;  %v167_v55 = vunpack.c.h.b16 %v89_v47 }
  0xbe   :  { %v335_v60 = vpop.f32.mrf.mxu0 }
  0xbf   :  { %v729_v56 = vpop.f32.mrf.mxu3  ;;  %v408_v61 = vpop.f32.mrf.mxu1  ;;  %v336_v0 = vadd.f32 %v6251_v48, %v335_v60 }
  0xc0   :  { %v730_v1 = vadd.f32 %v729_v56, %v657_v59  ;;  %v587_v59 = vunpack.c.h.b16 %v3941_v50 }
  0xc1   :  { %v409_v2 = vadd.f32 %v408_v61, %v336_v0  ;;  %374 = vmatmul.bf16.gmra.mxu0 %v3840_v57  ;;  %698 = vmatmul.bf16.gmra.mxu2 %v4025_v62  ;;  %v193_v0 = vpack.c.b16 %v167_v55, %v167_v55 }
  0xc2   :  { %447 = vmatmul.bf16.gmra.mxu1 %v3844_v58  ;;  %v789_v4 = vmax.f32 %v730_v1, 0.0  ;;  %v586_v58 = vunpack.c.l.b16 %v3941_v50 }
  0xc3   :  { %v466_v17 = vmax.f32 %v409_v2, 0.0 }
  0xc4   :  { %771 = vmatmul.bf16.gmra.mxu3 %v4029_v63  ;;  %v6340_v5 = vmax.f32 %v465_v3, %v789_v4  ;;  %v659_v6 = vpop.f32.mrf.mxu2  ;;  %v192_v63 = vpack.c.b16 %v166_v53, %v166_v53  ;;  %v612_v4 = vpack.c.b16 %v586_v58, %v586_v58 }
  0xc5   :  { %v660_v8 = vadd.f32 %v6251_v48, %v659_v6  ;;  %v613_v6 = vpack.c.b16 %v587_v59, %v587_v59 }
  0xc6   :  { %v337_v9 = vpop.f32.mrf.mxu0 }
  0xc7   :  { %v732_v7 = vpop.f32.mrf.mxu3  ;;  %v410_v10 = vpop.f32.mrf.mxu1  ;;  %v338_v11 = vadd.f32 %v6251_v48, %v337_v9 }
  0xc8   :  { %v733_v12 = vadd.f32 %v732_v7, %v660_v8 }
  0xc9   :  { %v411_v13 = vadd.f32 %v410_v10, %v338_v11 }
  0xca   :  { %v790_v18 = vmax.f32 %v733_v12, 0.0 }
  0xcb   :  { %v467_v39 = vmax.f32 %v411_v13, 0.0 }
  0xcc   :  { %v6368_v25 = vmax.f32 %v466_v17, %v790_v18  ;;  %v661_v26 = vpop.f32.mrf.mxu2 }
  0xcd   :  { %v662_v30 = vadd.f32 %v6251_v48, %v661_v26 }
  0xce   :  { %v340_v31 = vpop.f32.mrf.mxu0 }
  0xcf   :  { %v734_v27 = vpop.f32.mrf.mxu3  ;;  %v413_v32 = vpop.f32.mrf.mxu1  ;;  %v341_v36 = vadd.f32 %v6251_v48, %v340_v31  ;;  %v5616_v31 = vld [vmem:[%s7680_s0 + $0x25c] sm:$0xf] }
  0xd0   :  { %v735_v37 = vadd.f32 %v734_v27, %v662_v30  ;;  %v5617_v30 = vld [vmem:[%s7680_s0 + $0x25c] sm:$0xf0] }
  0xd1   :  { %v414_v38 = vadd.f32 %v413_v32, %v341_v36  ;;  %379 = vmatmul.bf16.gmra.mxu0 %v3848_v28  ;;  %703 = vmatmul.bf16.gmra.mxu2 %v4033_v33  ;;  %v4067_v28 = vld [vmem:[%s7680_s0 + $0x198] sm:$0xf0]  ;;  %v4188_v32 = vld [vmem:[%s7680_s0 + $0x260] sm:$0xf0] }
  0xd2   :  { %452 = vmatmul.bf16.gmra.mxu1 %v3852_v29  ;;  %v791_v40 = vmax.f32 %v735_v37, 0.0  ;;  %v4186_v29 = vld [vmem:[%s7680_s0 + $0x258] sm:$0xf]  ;;  %v4066_v37 = vor.u32 %v5593_v23, %v4065_v22 }
  0xd3   :  { %v468_v56 = vmax.f32 %v414_v38, 0.0  ;;  %v4070_v38 = vor.u32 %v5592_v24, %v4067_v28 }
  0xd4   :  { %776 = vmatmul.bf16.gmra.mxu3 %v4037_v35  ;;  %v6372_v41 = vmax.f32 %v467_v39, %v791_v40  ;;  %v664_v42 = vpop.f32.mrf.mxu2 }
  0xd5   :  { %v665_v44 = vadd.f32 %v6251_v48, %v664_v42 }
  0xd6   :  { %v342_v45 = vpop.f32.mrf.mxu0 }
  0xd7   :  { %v737_v43 = vpop.f32.mrf.mxu3  ;;  %v415_v46 = vpop.f32.mrf.mxu1  ;;  %v343_v49 = vadd.f32 %v6251_v48, %v342_v45 }
  0xd8   :  { %v738_v51 = vadd.f32 %v737_v43, %v665_v44  ;;  %v4187_v43 = vor.u32 %v5617_v30, %v4186_v29  ;;  %v4191_v44 = vor.u32 %v5616_v31, %v4188_v32 }
  0xd9   :  { %v416_v52 = vadd.f32 %v415_v46, %v343_v49 }
  0xda   :  { %v792_v57 = vmax.f32 %v738_v51, 0.0 }
  0xdb   :  { %v469_v10 = vmax.f32 %v416_v52, 0.0 }
  0xdc   :  { %v6382_v60 = vmax.f32 %v468_v56, %v792_v57  ;;  %v666_v61 = vpop.f32.mrf.mxu2 }
  0xdd   :  { %v667_v1 = vadd.f32 %v6251_v48, %v666_v61 }
  0xde   :  { %v345_v2 = vpop.f32.mrf.mxu0 }
  0xdf   :  { %v739_v62 = vpop.f32.mrf.mxu3  ;;  %v418_v3 = vpop.f32.mrf.mxu1  ;;  %v346_v7 = vadd.f32 %v6251_v48, %v345_v2 }
  0xe0   :  { %v740_v8 = vadd.f32 %v739_v62, %v667_v1  ;;  %v4073_v62 = vld [vmem:[%s7680_s0 + $0x1a0] sm:$0xf] }
  0xe1   :  { %v419_v9 = vadd.f32 %v418_v3, %v346_v7  ;;  %384 = vmatmul.bf16.gmra.mxu0 %v192_v63  ;;  %708 = vmatmul.bf16.gmra.mxu2 %v612_v4  ;;  %v5595_v63 = vld [vmem:[%s7680_s0 + $0x1a4] sm:$0xf0]  ;;  %v4075_v3 = vld [vmem:[%s7680_s0 + $0x1a8] sm:$0xf0] }
  0xe2   :  { %457 = vmatmul.bf16.gmra.mxu1 %v193_v0  ;;  %v793_v11 = vmax.f32 %v740_v8, 0.0  ;;  %v5594_v0 = vld [vmem:[%s7680_s0 + $0x1a4] sm:$0xf]  ;;  %v4194_v4 = vld [vmem:[%s7680_s0 + $0x268] sm:$0xf] }
  0xe3   :  { %v470_v26 = vmax.f32 %v419_v9, 0.0  ;;  %v5618_v7 = vld [vmem:[%s7680_s0 + $0x26c] sm:$0xf]  ;;  %v4196_v8 = vld [vmem:[%s7680_s0 + $0x270] sm:$0xf0] }
  0xe4   :  { %781 = vmatmul.bf16.gmra.mxu3 %v613_v6  ;;  %v6386_v12 = vmax.f32 %v469_v10, %v793_v11  ;;  %v669_v13 = vpop.f32.mrf.mxu2  ;;  %v5619_v6 = vld [vmem:[%s7680_s0 + $0x26c] sm:$0xf0] }
  0xe5   :  { %v670_v15 = vadd.f32 %v6251_v48, %v669_v13  ;;  %v4074_v13 = vor.u32 %v5595_v63, %v4073_v62 }
  0xe6   :  { %v347_v16 = vpop.f32.mrf.mxu0 }
  0xe7   :  { %v742_v14 = vpop.f32.mrf.mxu3  ;;  %v420_v17 = vpop.f32.mrf.mxu1  ;;  %v348_v18 = vadd.f32 %v6251_v48, %v347_v16 }
  0xe8   :  { %v743_v20 = vadd.f32 %v742_v14, %v670_v15  ;;  %v4078_v14 = vor.u32 %v5594_v0, %v4075_v3 }
  0xe9   :  { %v421_v21 = vadd.f32 %v420_v17, %v348_v18  ;;  %v4195_v18 = vor.u32 %v5619_v6, %v4194_v4 }
  0xea   :  { %v794_v27 = vmax.f32 %v743_v20, 0.0  ;;  %v4199_v20 = vor.u32 %v5618_v7, %v4196_v8  ;;  %v5671_v8 = vld [vmem:[%s7681_s3 + $0xf8] sm:$0xff] }
  0xeb   :  { %v471_v49 = vmax.f32 %v421_v21, 0.0  ;;  %1866 = vmatpush.bf16.msra.mxu3 %v5671_v8 }
  0xec   :  { %v6414_v33 = vmax.f32 %v470_v26, %v794_v27  ;;  %v671_v35 = vpop.f32.mrf.mxu2 }
  0xed   :  { %v672_v39 = vadd.f32 %v6251_v48, %v671_v35 }
  0xee   :  { %v350_v40 = vpop.f32.mrf.mxu0 }
  0xef   :  { %v744_v36 = vpop.f32.mrf.mxu3  ;;  %v423_v42 = vpop.f32.mrf.mxu1  ;;  %v351_v45 = vadd.f32 %v6251_v48, %v350_v40  ;;  %v5596_v40 = vld [vmem:[%s7680_s0 + $0x1b4] sm:$0xf] }
  0xf0   :  { %v745_v46 = vadd.f32 %v744_v36, %v672_v39  ;;  %v5597_v39 = vld [vmem:[%s7680_s0 + $0x1b4] sm:$0xf0] }
  0xf1   :  { %v424_v47 = vadd.f32 %v423_v42, %v351_v45  ;;  %997 = vmatmul.bf16.vlgmr.msrb.gmra.mxu0 %v4066_v37  ;;  %1346 = vmatmul.bf16.vlgmr.msrb.gmra.mxu2 %v4187_v43  ;;  %v4202_v45 = vld [vmem:[%s7680_s0 + $0x278] sm:$0xf] }
  0xf2   :  { %1070 = vmatmul.bf16.vlgmr.msrb.gmra.mxu1 %v4070_v38  ;;  %v795_v50 = vmax.f32 %v745_v46, 0.0  ;;  %v4081_v38 = vld [vmem:[%s7680_s0 + $0x1b0] sm:$0xf]  ;;  %v5621_v46 = vld [vmem:[%s7680_s0 + $0x27c] sm:$0xf0] }
  0xf3   :  { %v472_v1 = vmax.f32 %v424_v47, 0.0  ;;  %v5620_v47 = vld [vmem:[%s7680_s0 + $0x27c] sm:$0xf]  ;;  %v4203_v63 = vor.u32 %v5621_v46, %v4202_v45 }
  0xf4   :  { %1419 = vmatmul.bf16.vlgmr.msrb.gmra.mxu3 %v4191_v44  ;;  %v6418_v51 = vmax.f32 %v471_v49, %v795_v50  ;;  %v674_v52 = vpop.f32.mrf.mxu2  ;;  %v4083_v44 = vld [vmem:[%s7680_s0 + $0x1b8] sm:$0xf0]  ;;  %v4204_v49 = vld [vmem:[%s7680_s0 + $0x280] sm:$0xf0] }
  0xf5   :  { %v675_v55 = vadd.f32 %v6251_v48, %v674_v52  ;;  %v5655_v52 = vld [vmem:[%s7681_s3 + $0x78] sm:$0xff]  ;;  %v4207_v0 = vor.u32 %v5620_v47, %v4204_v49 }
  0xf6   :  { %v352_v56 = vpop.f32.mrf.mxu0  ;;  %1644 = vmatpush.bf16.msra.mxu0 %v5655_v52 }
  0xf7   :  { %v747_v53 = vpop.f32.mrf.mxu3  ;;  %v425_v57 = vpop.f32.mrf.mxu1  ;;  %v353_v58 = vadd.f32 %v6251_v48, %v352_v56 }
  0xf8   :  { %v748_v59 = vadd.f32 %v747_v53, %v675_v55  ;;  %v5663_v53 = vld [vmem:[%s7681_s3 + $0xb8] sm:$0xff] }
  0xf9   :  { %v426_v61 = vadd.f32 %v425_v57, %v353_v58  ;;  %v4082_v57 = vor.u32 %v5597_v39, %v4081_v38  ;;  %v4086_v58 = vor.u32 %v5596_v40, %v4083_v44  ;;  %1785 = vmatpush.bf16.msra.mxu2 %v5663_v53 }
  0xfa   :  { %v796_v2 = vmax.f32 %v748_v59, 0.0 }
  0xfb   :  { %v473_v24 = vmax.f32 %v426_v61, 0.0 }
  0xfc   :  { %v6446_v9 = vmax.f32 %v472_v1, %v796_v2  ;;  %v676_v10 = vpop.f32.mrf.mxu2 }
  0xfd   :  { %v677_v15 = vadd.f32 %v6251_v48, %v676_v10  ;;  %v5647_v10 = vld [vmem:[%s7681_s3 + $0x38] sm:$0xff] }
  0xfe   :  { %v355_v16 = vpop.f32.mrf.mxu0  ;;  %1705 = vmatpush.bf16.msra.mxu1 %v5647_v10  ;;  %v4099_v10 = vld [vmem:[%s7680_s0 + $0x1d8] sm:$0xf0] }
  0xff   :  { %v749_v11 = vpop.f32.mrf.mxu3  ;;  %v428_v17 = vpop.f32.mrf.mxu1  ;;  %v356_v21 = vadd.f32 %v6251_v48, %v355_v16 }
 0x100   :  { %v750_v22 = vadd.f32 %v749_v11, %v677_v15 }
 0x101   :  { %v429_v23 = vadd.f32 %v428_v17, %v356_v21  ;;  %1002 = vmatmul.bf16.gmra.mxu0 %v4074_v13  ;;  %1351 = vmatmul.bf16.gmra.mxu2 %v4195_v18  ;;  %v4089_v21 = vld [vmem:[%s7680_s0 + $0x1c0] sm:$0xf] }
 0x102   :  { %1075 = vmatmul.bf16.gmra.mxu1 %v4078_v14  ;;  %v797_v26 = vmax.f32 %v750_v22, 0.0  ;;  %v5599_v22 = vld [vmem:[%s7680_s0 + $0x1c4] sm:$0xf0] }
 0x103   :  { %v474_v42 = vmax.f32 %v429_v23, 0.0  ;;  %v5598_v23 = vld [vmem:[%s7680_s0 + $0x1c4] sm:$0xf]  ;;  %v4090_v38 = vor.u32 %v5599_v22, %v4089_v21 }
 0x104   :  { %1424 = vmatmul.bf16.gmra.mxu3 %v4199_v20  ;;  %v6450_v27 = vmax.f32 %v473_v24, %v797_v26  ;;  %v679_v28 = vpop.f32.mrf.mxu2 }
 0x105   :  { %v680_v30 = vadd.f32 %v6251_v48, %v679_v28  ;;  %v4091_v28 = vld [vmem:[%s7680_s0 + $0x1c8] sm:$0xf0] }
 0x106   :  { %v357_v31 = vpop.f32.mrf.mxu0  ;;  %v4094_v39 = vor.u32 %v5598_v23, %v4091_v28 }
 0x107   :  { %v752_v29 = vpop.f32.mrf.mxu3  ;;  %v430_v32 = vpop.f32.mrf.mxu1  ;;  %v358_v35 = vadd.f32 %v6251_v48, %v357_v31  ;;  %v5622_v31 = vld [vmem:[%s7680_s0 + $0x28c] sm:$0xf] }
 0x108   :  { %v753_v36 = vadd.f32 %v752_v29, %v680_v30  ;;  %v4210_v29 = vld [vmem:[%s7680_s0 + $0x288] sm:$0xf]  ;;  %v5623_v30 = vld [vmem:[%s7680_s0 + $0x28c] sm:$0xf0] }
 0x109   :  { %v431_v37 = vadd.f32 %v430_v32, %v358_v35  ;;  %v4212_v32 = vld [vmem:[%s7680_s0 + $0x290] sm:$0xf0]  ;;  %v4211_v44 = vor.u32 %v5623_v30, %v4210_v29 }
 0x10a   :  { %v798_v43 = vmax.f32 %v753_v36, 0.0  ;;  %v4215_v45 = vor.u32 %v5622_v31, %v4212_v32 }
 0x10b   :  { %v475_v4 = vmax.f32 %v431_v37, 0.0 }
 0x10c   :  { %v6478_v50 = vmax.f32 %v474_v42, %v798_v43  ;;  %v681_v55 = vpop.f32.mrf.mxu2 }
 0x10d   :  { %v682_v59 = vadd.f32 %v6251_v48, %v681_v55 }
 0x10e   :  { %v360_v61 = vpop.f32.mrf.mxu0 }
 0x10f   :  { %v754_v56 = vpop.f32.mrf.mxu3  ;;  %v433_v62 = vpop.f32.mrf.mxu1  ;;  %v361_v1 = vadd.f32 %v6251_v48, %v360_v61 }
 0x110   :  { %v755_v2 = vadd.f32 %v754_v56, %v682_v59  ;;  %v5654_v56 = vld [vmem:[%s7681_s3 + $0x70] sm:$0xff] }
 0x111   :  { %v434_v3 = vadd.f32 %v433_v62, %v361_v1  ;;  %1007 = vmatmul.bf16.gmra.mxu0 %v4082_v57  ;;  %1356 = vmatmul.bf16.gmra.mxu2 %v4203_v63 }
 0x112   :  { %1080 = vmatmul.bf16.gmra.mxu1 %v4086_v58  ;;  %v799_v6 = vmax.f32 %v755_v2, 0.0  ;;  %1645 = vmatpush.bf16.msra.mxu0 %v5654_v56  ;;  %v4097_v2 = vld [vmem:[%s7680_s0 + $0x1d0] sm:$0xf]  ;;  %v5603_v56 = vld [vmem:[%s7680_s0 + $0x1e4] sm:$0xf0] }
 0x113   :  { %v476_v24 = vmax.f32 %v434_v3, 0.0  ;;  %v5601_v3 = vld [vmem:[%s7680_s0 + $0x1d4] sm:$0xf0] }
 0x114   :  { %1429 = vmatmul.bf16.gmra.mxu3 %v4207_v0  ;;  %v6488_v7 = vmax.f32 %v475_v4, %v799_v6  ;;  %v684_v11 = vpop.f32.mrf.mxu2  ;;  %v5600_v4 = vld [vmem:[%s7680_s0 + $0x1d4] sm:$0xf]  ;;  %v4098_v23 = vor.u32 %v5601_v3, %v4097_v2  ;;  %v5653_v3 = vld [vmem:[%s7681_s3 + $0x68] sm:$0xff] }
 0x115   :  { %v685_v14 = vadd.f32 %v6251_v48, %v684_v11  ;;  %v4218_v11 = vld [vmem:[%s7680_s0 + $0x298] sm:$0xf] }
 0x116   :  { %v362_v15 = vpop.f32.mrf.mxu0  ;;  %1646 = vmatpush.bf16.msra.mxu0 %v5653_v3 }
 0x117   :  { %v757_v13 = vpop.f32.mrf.mxu3  ;;  %v435_v16 = vpop.f32.mrf.mxu1  ;;  %v363_v17 = vadd.f32 %v6251_v48, %v362_v15  ;;  %v4220_v15 = vld [vmem:[%s7680_s0 + $0x2a0] sm:$0xf0] }
 0x118   :  { %v758_v18 = vadd.f32 %v757_v13, %v685_v14  ;;  %v5625_v13 = vld [vmem:[%s7680_s0 + $0x29c] sm:$0xf0]  ;;  %v5624_v14 = vld [vmem:[%s7680_s0 + $0x29c] sm:$0xf] }
 0x119   :  { %v436_v20 = vadd.f32 %v435_v16, %v363_v17  ;;  %v5662_v17 = vld [vmem:[%s7681_s3 + $0xb0] sm:$0xff]  ;;  %v4219_v30 = vor.u32 %v5625_v13, %v4218_v11  ;;  %v4223_v31 = vor.u32 %v5624_v14, %v4220_v15 }
 0x11a   :  { %v800_v26 = vmax.f32 %v758_v18, 0.0  ;;  %v5670_v18 = vld [vmem:[%s7681_s3 + $0xf0] sm:$0xff]  ;;  %1786 = vmatpush.bf16.msra.mxu2 %v5662_v17 }
 0x11b   :  { %v477_v52 = vmax.f32 %v436_v20, 0.0  ;;  %v5646_v20 = vld [vmem:[%s7681_s3 + $0x30] sm:$0xff]  ;;  %1867 = vmatpush.bf16.msra.mxu3 %v5670_v18 }
 0x11c   :  { %v6522_v35 = vmax.f32 %v476_v24, %v800_v26  ;;  %v686_v36 = vpop.f32.mrf.mxu2  ;;  %v4102_v24 = vor.u32 %v5600_v4, %v4099_v10  ;;  %1706 = vmatpush.bf16.msra.mxu1 %v5646_v20 }
 0x11d   :  { %v687_v40 = vadd.f32 %v6251_v48, %v686_v36 }
 0x11e   :  { %v365_v42 = vpop.f32.mrf.mxu0 }
 0x11f   :  { %v759_v37 = vpop.f32.mrf.mxu3  ;;  %v438_v43 = vpop.f32.mrf.mxu1  ;;  %v366_v46 = vadd.f32 %v6251_v48, %v365_v42 }
 0x120   :  { %v760_v47 = vadd.f32 %v759_v37, %v687_v40 }
 0x121   :  { %v439_v49 = vadd.f32 %v438_v43, %v366_v46  ;;  %1012 = vmatmul.bf16.gmra.mxu0 %v4090_v38  ;;  %1361 = vmatmul.bf16.gmra.mxu2 %v4211_v44 }
 0x122   :  { %1085 = vmatmul.bf16.gmra.mxu1 %v4094_v39  ;;  %v801_v53 = vmax.f32 %v760_v47, 0.0 }
 0x123   :  { %v478_v6 = vmax.f32 %v439_v49, 0.0 }
 0x124   :  { %1434 = vmatmul.bf16.gmra.mxu3 %v4215_v45  ;;  %v6526_v55 = vmax.f32 %v477_v52, %v801_v53  ;;  %v689_v57 = vpop.f32.mrf.mxu2  ;;  %v4105_v53 = vld [vmem:[%s7680_s0 + $0x1e0] sm:$0xf] }
 0x125   :  { %v690_v59 = vadd.f32 %v6251_v48, %v689_v57  ;;  %v5602_v57 = vld [vmem:[%s7680_s0 + $0x1e4] sm:$0xf] }
 0x126   :  { %v367_v61 = vpop.f32.mrf.mxu0 }
 0x127   :  { %v762_v58 = vpop.f32.mrf.mxu3  ;;  %v440_v62 = vpop.f32.mrf.mxu1  ;;  %v368_v63 = vadd.f32 %v6251_v48, %v367_v61  ;;  %v4107_v61 = vld [vmem:[%s7680_s0 + $0x1e8] sm:$0xf0] }
 0x128   :  { %v763_v0 = vadd.f32 %v762_v58, %v690_v59  ;;  %v4110_v10 = vor.u32 %v5602_v57, %v4107_v61  ;;  %v4236_v57 = vld [vmem:[%s7680_s0 + $0x2c0] sm:$0xf0] }
 0x129   :  { %v441_v1 = vadd.f32 %v440_v62, %v368_v63  ;;  %v4226_v62 = vld [vmem:[%s7680_s0 + $0x2a8] sm:$0xf]  ;;  %v5627_v63 = vld [vmem:[%s7680_s0 + $0x2ac] sm:$0xf0] }
 0x12a   :  { %v802_v8 = vmax.f32 %v763_v0, 0.0  ;;  %v5626_v0 = vld [vmem:[%s7680_s0 + $0x2ac] sm:$0xf]  ;;  %v4227_v15 = vor.u32 %v5627_v63, %v4226_v62 }
 0x12b   :  { %v479_v38 = vmax.f32 %v441_v1, 0.0  ;;  %v4228_v1 = vld [vmem:[%s7680_s0 + $0x2b0] sm:$0xf0] }
 0x12c   :  { %v6557_v16 = vmax.f32 %v478_v6, %v802_v8  ;;  %v691_v21 = vpop.f32.mrf.mxu2  ;;  %v4106_v8 = vor.u32 %v5603_v56, %v4105_v53  ;;  %v4231_v17 = vor.u32 %v5626_v0, %v4228_v1  ;;  %v5629_v53 = vld [vmem:[%s7680_s0 + $0x2bc] sm:$0xf0]  ;;  %v5628_v56 = vld [vmem:[%s7680_s0 + $0x2bc] sm:$0xf] }
 0x12d   :  { %v692_v26 = vadd.f32 %v6251_v48, %v691_v21 }
 0x12e   :  { %v370_v28 = vpop.f32.mrf.mxu0 }
 0x12f   :  { %v764_v22 = vpop.f32.mrf.mxu3  ;;  %v443_v29 = vpop.f32.mrf.mxu1  ;;  %v371_v32 = vadd.f32 %v6251_v48, %v370_v28  ;;  %v5669_v28 = vld [vmem:[%s7681_s3 + $0xe8] sm:$0xff] }
 0x130   :  { %v765_v36 = vadd.f32 %v764_v22, %v692_v26  ;;  %v5661_v26 = vld [vmem:[%s7681_s3 + $0xa8] sm:$0xff]  ;;  %1868 = vmatpush.bf16.msra.mxu3 %v5669_v28 }
 0x131   :  { %v444_v37 = vadd.f32 %v443_v29, %v371_v32  ;;  %1017 = vmatmul.bf16.gmra.mxu0 %v4098_v23  ;;  %1366 = vmatmul.bf16.gmra.mxu2 %v4219_v30  ;;  %v5645_v29 = vld [vmem:[%s7681_s3 + $0x28] sm:$0xff] }
 0x132   :  { %1090 = vmatmul.bf16.gmra.mxu1 %v4102_v24  ;;  %v803_v39 = vmax.f32 %v765_v36, 0.0  ;;  %1787 = vmatpush.bf16.msra.mxu2 %v5661_v26 }
 0x133   :  { %v480_v58 = vmax.f32 %v444_v37, 0.0  ;;  %1707 = vmatpush.bf16.msra.mxu1 %v5645_v29 }
 0x134   :  { %1439 = vmatmul.bf16.gmra.mxu3 %v4223_v31  ;;  %v6570_v40 = vmax.f32 %v479_v38, %v803_v39  ;;  %v694_v42 = vpop.f32.mrf.mxu2 }
 0x135   :  { %v695_v44 = vadd.f32 %v6251_v48, %v694_v42 }
 0x136   :  { %v372_v45 = vpop.f32.mrf.mxu0 }
 0x137   :  { %v767_v43 = vpop.f32.mrf.mxu3  ;;  %v445_v46 = vpop.f32.mrf.mxu1  ;;  %v373_v47 = vadd.f32 %v6251_v48, %v372_v45  ;;  %v5604_v45 = vld [vmem:[%s7680_s0 + $0x1f4] sm:$0xf] }
 0x138   :  { %v768_v49 = vadd.f32 %v767_v43, %v695_v44  ;;  %v4113_v43 = vld [vmem:[%s7680_s0 + $0x1f0] sm:$0xf]  ;;  %v5605_v44 = vld [vmem:[%s7680_s0 + $0x1f4] sm:$0xf0] }
 0x139   :  { %v446_v52 = vadd.f32 %v445_v46, %v373_v47  ;;  %v4114_v62 = vor.u32 %v5605_v44, %v4113_v43  ;;  %v5630_v43 = vld [vmem:[%s7680_s0 + $0x2cc] sm:$0xf]  ;;  %v4244_v44 = vld [vmem:[%s7680_s0 + $0x2d0] sm:$0xf0] }
 0x13a   :  { %v804_v59 = vmax.f32 %v768_v49, 0.0  ;;  %v4115_v49 = vld [vmem:[%s7680_s0 + $0x1f8] sm:$0xf0] }
 0x13b   :  { %v481_v22 = vmax.f32 %v446_v52, 0.0  ;;  %v4234_v52 = vld [vmem:[%s7680_s0 + $0x2b8] sm:$0xf]  ;;  %v4118_v63 = vor.u32 %v5604_v45, %v4115_v49 }
 0x13c   :  { %v6598_v2 = vmax.f32 %v480_v58, %v804_v59  ;;  %v696_v4 = vpop.f32.mrf.mxu2 }
 0x13d   :  { %v697_v11 = vadd.f32 %v6251_v48, %v696_v4  ;;  %v4235_v4 = vor.u32 %v5629_v53, %v4234_v52 }
 0x13e   :  { %v375_v13 = vpop.f32.mrf.mxu0 }
 0x13f   :  { %v769_v6 = vpop.f32.mrf.mxu3  ;;  %v448_v14 = vpop.f32.mrf.mxu1  ;;  %v376_v18 = vadd.f32 %v6251_v48, %v375_v13 }
 0x140   :  { %v770_v20 = vadd.f32 %v769_v6, %v697_v11  ;;  %v4239_v6 = vor.u32 %v5628_v56, %v4236_v57 }
 0x141   :  { %v449_v21 = vadd.f32 %v448_v14, %v376_v18  ;;  %1022 = vmatmul.bf16.gmra.mxu0 %v4106_v8  ;;  %1371 = vmatmul.bf16.gmra.mxu2 %v4227_v15 }
 0x142   :  { %1095 = vmatmul.bf16.gmra.mxu1 %v4110_v10  ;;  %v805_v23 = vmax.f32 %v770_v20, 0.0  ;;  %v5652_v20 = vld [vmem:[%s7681_s3 + $0x60] sm:$0xff] }
 0x143   :  { %v482_v46 = vmax.f32 %v449_v21, 0.0  ;;  %1647 = vmatpush.bf16.msra.mxu0 %v5652_v20 }
 0x144   :  { %1444 = vmatmul.bf16.gmra.mxu3 %v4231_v17  ;;  %v6605_v24 = vmax.f32 %v481_v22, %v805_v23  ;;  %v699_v30 = vpop.f32.mrf.mxu2 }
 0x145   :  { %v700_v32 = vadd.f32 %v6251_v48, %v699_v30  ;;  %v4121_v30 = vld [vmem:[%s7680_s0 + $0x200] sm:$0xf] }
 0x146   :  { %v377_v36 = vpop.f32.mrf.mxu0 }
 0x147   :  { %v772_v31 = vpop.f32.mrf.mxu3  ;;  %v450_v37 = vpop.f32.mrf.mxu1  ;;  %v378_v38 = vadd.f32 %v6251_v48, %v377_v36 }
 0x148   :  { %v773_v39 = vadd.f32 %v772_v31, %v700_v32  ;;  %v5607_v31 = vld [vmem:[%s7680_s0 + $0x204] sm:$0xf0]  ;;  %v5606_v32 = vld [vmem:[%s7680_s0 + $0x204] sm:$0xf] }
 0x149   :  { %v451_v42 = vadd.f32 %v450_v37, %v378_v38  ;;  %v4123_v38 = vld [vmem:[%s7680_s0 + $0x208] sm:$0xf0]  ;;  %v4122_v49 = vor.u32 %v5607_v31, %v4121_v30  ;;  %v5633_v30 = vld [vmem:[%s7680_s0 + $0x2dc] sm:$0xf0]  ;;  %v5632_v31 = vld [vmem:[%s7680_s0 + $0x2dc] sm:$0xf] }
 0x14a   :  { %v806_v47 = vmax.f32 %v773_v39, 0.0  ;;  %v4242_v39 = vld [vmem:[%s7680_s0 + $0x2c8] sm:$0xf]  ;;  %v4126_v52 = vor.u32 %v5606_v32, %v4123_v38  ;;  %v4252_v32 = vld [vmem:[%s7680_s0 + $0x2e0] sm:$0xf0] }
 0x14b   :  { %v483_v13 = vmax.f32 %v451_v42, 0.0  ;;  %v5631_v42 = vld [vmem:[%s7680_s0 + $0x2cc] sm:$0xf0] }
 0x14c   :  { %v6642_v58 = vmax.f32 %v482_v46, %v806_v47  ;;  %v701_v59 = vpop.f32.mrf.mxu2 }
 0x14d   :  { %v702_v0 = vadd.f32 %v6251_v48, %v701_v59  ;;  %v4243_v59 = vor.u32 %v5631_v42, %v4242_v39 }
 0x14e   :  { %7688 = vst [vmem:[#allocation3_spill] sm:$0xff] %v6642_v58  ;;  %v380_v1 = vpop.f32.mrf.mxu0 }
 0x14f   :  { %v774_v61 = vpop.f32.mrf.mxu3  ;;  %v453_v3 = vpop.f32.mrf.mxu1  ;;  %v381_v8 = vadd.f32 %v6251_v48, %v380_v1 }
 0x150   :  { %v775_v10 = vadd.f32 %v774_v61, %v702_v0  ;;  %v4247_v61 = vor.u32 %v5630_v43, %v4244_v44 }
 0x151   :  { %v454_v11 = vadd.f32 %v453_v3, %v381_v8  ;;  %1027 = vmatmul.bf16.gmra.mxu0 %v4114_v62  ;;  %1376 = vmatmul.bf16.gmra.mxu2 %v4235_v4  ;;  %v5660_v62 = vld [vmem:[%s7681_s3 + $0xa0] sm:$0xff] }
 0x152   :  { %1100 = vmatmul.bf16.gmra.mxu1 %v4118_v63  ;;  %v807_v14 = vmax.f32 %v775_v10, 0.0  ;;  %v5668_v63 = vld [vmem:[%s7681_s3 + $0xe0] sm:$0xff]  ;;  %1788 = vmatpush.bf16.msra.mxu2 %v5660_v62 }
 0x153   :  { %v484_v36 = vmax.f32 %v454_v11, 0.0  ;;  %1869 = vmatpush.bf16.msra.mxu3 %v5668_v63 }
 0x154   :  { %1449 = vmatmul.bf16.gmra.mxu3 %v4239_v6  ;;  %v6646_v15 = vmax.f32 %v483_v13, %v807_v14  ;;  %v704_v17 = vpop.f32.mrf.mxu2 }
 0x155   :  { %v705_v21 = vadd.f32 %v6251_v48, %v704_v17 }
 0x156   :  { %7689 = vst [vmem:[#allocation4_spill] sm:$0xff] %v6646_v15  ;;  %v382_v22 = vpop.f32.mrf.mxu0 }
 0x157   :  { %v777_v18 = vpop.f32.mrf.mxu3  ;;  %v455_v23 = vpop.f32.mrf.mxu1  ;;  %v383_v26 = vadd.f32 %v6251_v48, %v382_v22  ;;  %v5609_v22 = vld [vmem:[%s7680_s0 + $0x214] sm:$0xf0] }
 0x158   :  { %v778_v28 = vadd.f32 %v777_v18, %v705_v21  ;;  %v5644_v18 = vld [vmem:[%s7681_s3 + $0x20] sm:$0xff]  ;;  %v4129_v21 = vld [vmem:[%s7680_s0 + $0x210] sm:$0xf] }
 0x159   :  { %v456_v29 = vadd.f32 %v455_v23, %v383_v26  ;;  %1708 = vmatpush.bf16.msra.mxu1 %v5644_v18  ;;  %v4130_v39 = vor.u32 %v5609_v22, %v4129_v21  ;;  %v4139_v18 = vld [vmem:[%s7680_s0 + $0x228] sm:$0xf0]  ;;  %v5635_v21 = vld [vmem:[%s7680_s0 + $0x2ec] sm:$0xf0] }
 0x15a   :  { %v808_v37 = vmax.f32 %v778_v28, 0.0  ;;  %v4131_v28 = vld [vmem:[%s7680_s0 + $0x218] sm:$0xf0] }
 0x15b   :  { %v485_v4 = vmax.f32 %v456_v29, 0.0  ;;  %v4250_v29 = vld [vmem:[%s7680_s0 + $0x2d8] sm:$0xf] }
 0x15c   :  { %v6677_v45 = vmax.f32 %v484_v36, %v808_v37  ;;  %v706_v46 = vpop.f32.mrf.mxu2 }
 0x15d   :  { %v707_v53 = vadd.f32 %v6251_v48, %v706_v46  ;;  %v4251_v46 = vor.u32 %v5633_v30, %v4250_v29  ;;  %v5634_v29 = vld [vmem:[%s7680_s0 + $0x2ec] sm:$0xf]  ;;  %v4260_v30 = vld [vmem:[%s7680_s0 + $0x2f0] sm:$0xf0] }
 0x15e   :  { %7690 = vst [vmem:[#allocation5_spill] sm:$0xff] %v6677_v45  ;;  %v385_v56 = vpop.f32.mrf.mxu0 }
 0x15f   :  { %v779_v47 = vpop.f32.mrf.mxu3  ;;  %v458_v57 = vpop.f32.mrf.mxu1  ;;  %v386_v0 = vadd.f32 %v6251_v48, %v385_v56 }
 0x160   :  { %v780_v1 = vadd.f32 %v779_v47, %v707_v53  ;;  %v4255_v47 = vor.u32 %v5632_v31, %v4252_v32  ;;  %v5666_v31 = vld [vmem:[%s7681_s3 + $0xd0] sm:$0xff] }
 0x161   :  { %v459_v3 = vadd.f32 %v458_v57, %v386_v0  ;;  %1032 = vmatmul.bf16.gmra.mxu0 %v4122_v49  ;;  %1381 = vmatmul.bf16.gmra.mxu2 %v4243_v59  ;;  %v6722_v49 = vld [vmem:[%s7679_s2] ss:$0 sm:$0xff] }
 0x162   :  { %1105 = vmatmul.bf16.gmra.mxu1 %v4126_v52  ;;  %v809_v6 = vmax.f32 %v780_v1, 0.0  ;;  %v5651_v1 = vld [vmem:[%s7681_s3 + $0x58] sm:$0xff] }
 0x163   :  { %v486_v23 = vmax.f32 %v459_v3, 0.0  ;;  %v5659_v3 = vld [vmem:[%s7681_s3 + $0x98] sm:$0xff]  ;;  %1648 = vmatpush.bf16.msra.mxu0 %v5651_v1 }
 0x164   :  { %1454 = vmatmul.bf16.gmra.mxu3 %v4247_v61  ;;  %v6687_v8 = vmax.f32 %v485_v4, %v809_v6  ;;  %v709_v10 = vpop.f32.mrf.mxu2  ;;  %v5667_v4 = vld [vmem:[%s7681_s3 + $0xd8] sm:$0xff]  ;;  %1789 = vmatpush.bf16.msra.mxu2 %v5659_v3 }
 0x165   :  { %v710_v13 = vadd.f32 %v6251_v48, %v709_v10  ;;  %v5608_v48 = vld [vmem:[%s7680_s0 + $0x214] sm:$0xf]  ;;  %v5643_v6 = vld [vmem:[%s7681_s3 + $0x18] sm:$0xff]  ;;  %1870 = vmatpush.bf16.msra.mxu3 %v5667_v4 }
 0x166   :  { %v387_v14 = vpop.f32.mrf.mxu0  ;;  %v4134_v42 = vor.u32 %v5608_v48, %v4131_v28  ;;  %1709 = vmatpush.bf16.msra.mxu1 %v5643_v6  ;;  %v5650_v48 = vld [vmem:[%s7681_s3 + $0x50] sm:$0xff]  ;;  %v5687_v1 = vld [vmem:[%s7681_s3 + $0x178] sm:$0xff] }
 0x167   :  { %v782_v11 = vpop.f32.mrf.mxu3  ;;  %v460_v17 = vpop.f32.mrf.mxu1  ;;  %v5610_v14 = vld [vmem:[%s7680_s0 + $0x224] sm:$0xf]  ;;  %1649 = vmatpush.bf16.msra.mxu0 %v5650_v48  ;;  %v5695_v3 = vld [vmem:[%s7681_s3 + $0x1b8] sm:$0xff] }
 0x168   :  { %v783_v20 = vadd.f32 %v782_v11, %v710_v13  ;;  %v4137_v11 = vld [vmem:[%s7680_s0 + $0x220] sm:$0xf]  ;;  %v5611_v13 = vld [vmem:[%s7680_s0 + $0x224] sm:$0xf0]  ;;  %v5703_v4 = vld [vmem:[%s7681_s3 + $0x1f8] sm:$0xff] }
 0x169   :  { %1871 = vmatpush.bf16.msra.mxu3 %v5666_v31  ;;  %v4147_v48 = vld [vmem:[%s7680_s0 + $0x238] sm:$0xf0]  ;;  %v5693_v31 = vld [vmem:[%s7681_s3 + $0x1a8] sm:$0xff] }
 0x16a   :  { %v810_v26 = vmax.f32 %v783_v20, 0.0  ;;  %v4258_v20 = vld [vmem:[%s7680_s0 + $0x2e8] sm:$0xf] }
 0x16c   :  { %v6717_v36 = vmax.f32 %v486_v23, %v810_v26  ;;  %v711_v37 = vpop.f32.mrf.mxu2  ;;  %v5642_v23 = vld [vmem:[%s7681_s3 + $0x10] sm:$0xff] }
 0x16d   :  { %v5658_v26 = vld [vmem:[%s7681_s3 + $0x90] sm:$0xff]  ;;  %1710 = vmatpush.bf16.msra.mxu1 %v5642_v23  ;;  %v4266_v23 = vld [vmem:[%s7680_s0 + $0x2f8] sm:$0xf] }
 0x16e   :  { %7691 = vst [vmem:[#allocation6_spill] sm:$0xff] %v6717_v36  ;;  %v998_v43 = vpop.f32.mrf.mxu0  ;;  %1790 = vmatpush.bf16.msra.mxu2 %v5658_v26  ;;  %v5637_v26 = vld [vmem:[%s7680_s0 + $0x2fc] sm:$0xf0] }
 0x16f   :  { %v784_v38 = vpop.f32.mrf.mxu3  ;;  %v1071_v44 = vpop.f32.mrf.mxu1  ;;  %v999_v52 = vadd.f32 %v6722_v49, %v998_v43  ;;  %v4142_v43 = vor.u32 %v5610_v14, %v4139_v18  ;;  %v5694_v14 = vld [vmem:[%s7681_s3 + $0x1b0] sm:$0xff] }
 0x170   :  { %v5686_v18 = vld [vmem:[%s7681_s3 + $0x170] sm:$0xff] }
 0x171   :  { %v1072_v53 = vadd.f32 %v1071_v44, %v999_v52  ;;  %1037 = vmatmul.bf16.gmra.mxu0 %v4130_v39  ;;  %1386 = vmatmul.bf16.gmra.mxu2 %v4251_v46  ;;  %v4263_v52 = vor.u32 %v5634_v29, %v4260_v30  ;;  %v4268_v29 = vld [vmem:[%s7680_s0 + $0x300] sm:$0xf0]  ;;  %v5677_v30 = vld [vmem:[%s7681_s3 + $0x128] sm:$0xff] }
 0x172   :  { %1110 = vmatmul.bf16.gmra.mxu1 %v4134_v42  ;;  %v4138_v42 = vor.u32 %v5611_v13, %v4137_v11  ;;  %v5678_v13 = vld [vmem:[%s7681_s3 + $0x130] sm:$0xff] }
 0x173   :  { %v1135_v56 = vmax.f32 %v1072_v53, 0.0  ;;  %v5649_v53 = vld [vmem:[%s7681_s3 + $0x48] sm:$0xff] }
 0x174   :  { %1459 = vmatmul.bf16.gmra.mxu3 %v4255_v47  ;;  %v1347_v59 = vpop.f32.mrf.mxu2  ;;  %v4259_v47 = vor.u32 %v5635_v21, %v4258_v20  ;;  %1650 = vmatpush.bf16.msra.mxu0 %v5649_v53  ;;  %v5702_v20 = vld [vmem:[%s7681_s3 + $0x1f0] sm:$0xff]  ;;  %v5613_v21 = vld [vmem:[%s7680_s0 + $0x234] sm:$0xf0] }
 0x175   :  { %v1160_v57 = vmax.f32 %v6304_v19, %v1135_v56  ;;  %v1348_v62 = vadd.f32 %v6722_v49, %v1347_v59  ;;  %v5641_v56 = vld [vmem:[%s7681_s3 + $0x8] sm:$0xff]  ;;  %v5648_v59 = vld [vmem:[%s7681_s3 + $0x40] sm:$0xff] }
 0x176   :  { %v1000_v63 = vpop.f32.mrf.mxu0  ;;  %1711 = vmatpush.bf16.msra.mxu1 %v5641_v56 }
 0x177   :  { %v1420_v61 = vpop.f32.mrf.mxu3  ;;  %v1073_v0 = vpop.f32.mrf.mxu1  ;;  %v1001_v19 = vadd.f32 %v6722_v49, %v1000_v63  ;;  %v5664_v63 = vld [vmem:[%s7681_s3 + $0xc0] sm:$0xff] }
 0x178   :  { %v1421_v10 = vadd.f32 %v1420_v61, %v1348_v62  ;;  %v5656_v61 = vld [vmem:[%s7681_s3 + $0x80] sm:$0xff]  ;;  %1651 = vmatpush.bf16.msra.mxu0 %v5648_v59  ;;  %v4267_v59 = vor.u32 %v5637_v26, %v4266_v23  ;;  %v5682_v26 = vld [vmem:[%s7681_s3 + $0x150] sm:$0xff] }
 0x179   :  { %v1074_v17 = vadd.f32 %v1073_v0, %v1001_v19  ;;  %v5640_v62 = vld [vmem:[%s7681_s3] sm:$0xff]  ;;  %v5679_v0 = vld [vmem:[%s7681_s3 + $0x138] sm:$0xff] }
 0x17a   :  { %v1484_v22 = vmax.f32 %v1421_v10, 0.0  ;;  %1712 = vmatpush.bf16.msra.mxu1 %v5640_v62  ;;  %v5676_v62 = vld [vmem:[%s7681_s3 + $0x120] sm:$0xff] }
 0x17b   :  { %v1136_v28 = vmax.f32 %v1074_v17, 0.0  ;;  %v4145_v17 = vld [vmem:[%s7680_s0 + $0x230] sm:$0xf]  ;;  %v4153_v23 = vld [vmem:[%s7680_s0 + $0x240] sm:$0xf] }
 0x17c   :  { %v6776_v32 = vmax.f32 %v1160_v57, %v1484_v22  ;;  %v6781_v38 = vpop.f32.mrf.mxu2  ;;  %v5665_v57 = vld [vmem:[%s7681_s3 + $0xc8] sm:$0xff]  ;;  %1947 = vmatpush.bf16.msrb.mxu0 %v5679_v0  ;;  %v5612_v22 = vld [vmem:[%s7680_s0 + $0x234] sm:$0xf]  ;;  %v4146_v53 = vor.u32 %v5613_v21, %v4145_v17  ;;  %v5684_v0 = vld [vmem:[%s7681_s3 + $0x160] sm:$0xff] }
 0x17d   :  { %v6779_v37 = vmax.f32 %v6308_v34, %v1136_v28  ;;  %v5657_v34 = vld [vmem:[%s7681_s3 + $0x88] sm:$0xff]  ;;  %1872 = vmatpush.bf16.msra.mxu3 %v5665_v57  ;;  %v5636_v28 = vld [vmem:[%s7680_s0 + $0x2fc] sm:$0xf] }
 0x17e   :  { %v6785_v44 = vpop.f32.mrf.mxu0  ;;  %1791 = vmatpush.bf16.msra.mxu2 %v5657_v34  ;;  %2028 = vmatpush.bf16.msrb.mxu1 %v5687_v1  ;;  %v4150_v34 = vor.u32 %v5612_v22, %v4147_v48  ;;  %v5700_v1 = vld [vmem:[%s7681_s3 + $0x1e0] sm:$0xff]  ;;  %v5674_v22 = vld [vmem:[%s7681_s3 + $0x110] sm:$0xff] }
 0x17f   :  { %v6783_v39 = vpop.f32.mrf.mxu3  ;;  %v6787_v46 = vpop.f32.mrf.mxu1  ;;  %v5690_v48 = vld [vmem:[%s7681_s3 + $0x190] sm:$0xff] }
 0x180   :  { %1948 = vmatpush.bf16.msrb.mxu0 %v5678_v13  ;;  %v5683_v13 = vld [vmem:[%s7681_s3 + $0x158] sm:$0xff] }
 0x181   :  { %1042 = vmatmul.bf16.gmra.mxu0 %v4138_v42  ;;  %1391 = vmatmul.bf16.gmra.mxu2 %v4259_v47  ;;  %v5685_v42 = vld [vmem:[%s7681_s3 + $0x168] sm:$0xff] }
 0x182   :  { %1115 = vmatmul.bf16.gmra.mxu1 %v4142_v43  ;;  %1792 = vmatpush.bf16.msra.mxu2 %v5656_v61  ;;  %v5701_v43 = vld [vmem:[%s7681_s3 + $0x1e8] sm:$0xff]  ;;  %v4271_v61 = vor.u32 %v5636_v28, %v4268_v29  ;;  %v5698_v28 = vld [vmem:[%s7681_s3 + $0x1d0] sm:$0xff] }
 0x183   :  { %1873 = vmatpush.bf16.msra.mxu3 %v5664_v63  ;;  %2029 = vmatpush.bf16.msrb.mxu1 %v5686_v18  ;;  %v5692_v63 = vld [vmem:[%s7681_s3 + $0x1a0] sm:$0xff]  ;;  %v5615_v29 = vld [vmem:[%s7680_s0 + $0x244] sm:$0xf0] }
 0x184   :  { %1464 = vmatmul.bf16.gmra.mxu3 %v4263_v52  ;;  %v6825_v19 = vpop.f32.mrf.mxu2  ;;  %1949 = vmatpush.bf16.msrb.mxu0 %v5677_v30  ;;  %v5614_v30 = vld [vmem:[%s7680_s0 + $0x244] sm:$0xf] }
 0x186   :  { %v6829_v10 = vpop.f32.mrf.mxu0  ;;  %2109 = vmatpush.bf16.msrb.mxu2 %v5695_v3  ;;  %v5675_v3 = vld [vmem:[%s7681_s3 + $0x118] sm:$0xff] }
 0x187   :  { %v6827_v6 = vpop.f32.mrf.mxu3  ;;  %v6831_v11 = vpop.f32.mrf.mxu1  ;;  %2190 = vmatpush.bf16.msrb.mxu3 %v5703_v4  ;;  %2030 = vmatpush.bf16.msrb.mxu1 %v5685_v42  ;;  %v5691_v4 = vld [vmem:[%s7681_s3 + $0x198] sm:$0xff]  ;;  %v4274_v42 = vld [vmem:[%s7680_s0 + $0x308] sm:$0xf] }
 0x188   :  { %1950 = vmatpush.bf16.msrb.mxu0 %v5676_v62  ;;  %v5681_v62 = vld [vmem:[%s7681_s3 + $0x148] sm:$0xff] }
 0x18a   :  { %2110 = vmatpush.bf16.msrb.mxu2 %v5694_v14  ;;  %v5699_v14 = vld [vmem:[%s7681_s3 + $0x1d8] sm:$0xff] }
 0x18b   :  { %2191 = vmatpush.bf16.msrb.mxu3 %v5702_v20  ;;  %2031 = vmatpush.bf16.msrb.mxu1 %v5684_v0 }
 0x18c   :  { %v6881_v47 = vpop.f32.mrf.mxu2  ;;  %1951 = vmatpush.bf16.msrb.mxu0 %v5675_v3  ;;  %v4154_v3 = vor.u32 %v5615_v29, %v4153_v23  ;;  %v5680_v23 = vld [vmem:[%s7681_s3 + $0x140] sm:$0xff] }
 0x18d   :  { %v5696_v29 = vld [vmem:[%s7681_s3 + $0x1c0] sm:$0xff] }
 0x18e   :  { %v6885_v56 = vpop.f32.mrf.mxu0  ;;  %2111 = vmatpush.bf16.msrb.mxu2 %v5693_v31  ;;  %v4155_v31 = vld [vmem:[%s7680_s0 + $0x248] sm:$0xf0] }
 0x18f   :  { %v6883_v52 = vpop.f32.mrf.mxu3  ;;  %v6887_v57 = vpop.f32.mrf.mxu1  ;;  %2192 = vmatpush.bf16.msrb.mxu3 %v5701_v43  ;;  %2032 = vmatpush.bf16.msrb.mxu1 %v5683_v13  ;;  %v5639_v43 = vld [vmem:[%s7680_s0 + $0x30c] sm:$0xf0] }
 0x190   :  { %1952 = vmatpush.bf16.msrb.mxu0 %v5674_v22  ;;  %v4275_v22 = vor.u32 %v5639_v43, %v4274_v42 }
 0x191   :  { %1047 = vmatmul.bf16.gmra.mxu0 %v4146_v53  ;;  %1396 = vmatmul.bf16.gmra.mxu2 %v4267_v59  ;;  %v5638_v53 = vld [vmem:[%s7680_s0 + $0x30c] sm:$0xf] }
 0x192   :  { %1120 = vmatmul.bf16.gmra.mxu1 %v4150_v34  ;;  %2112 = vmatpush.bf16.msrb.mxu2 %v5692_v63  ;;  %v4276_v34 = vld [vmem:[%s7680_s0 + $0x310] sm:$0xf0]  ;;  %v5673_v59 = vld [vmem:[%s7681_s3 + $0x108] sm:$0xff] }
 0x193   :  { %2193 = vmatpush.bf16.msrb.mxu3 %v5700_v1  ;;  %2033 = vmatpush.bf16.msrb.mxu1 %v5682_v26  ;;  %v5697_v63 = vld [vmem:[%s7681_s3 + $0x1c8] sm:$0xff]  ;;  %v5672_v26 = vld [vmem:[%s7681_s3 + $0x100] sm:$0xff] }
 0x194   :  { %1469 = vmatmul.bf16.gmra.mxu3 %v4271_v61  ;;  %v6913_v17 = vpop.f32.mrf.mxu2  ;;  %v5689_v61 = vld [vmem:[%s7681_s3 + $0x188] sm:$0xff]  ;;  %1953 = vmatpush.bf16.msrb.mxu0 %v5673_v59 }
 0x196   :  { %v6917_v20 = vpop.f32.mrf.mxu0  ;;  %2113 = vmatpush.bf16.msrb.mxu2 %v5691_v4  ;;  %v4158_v4 = vor.u32 %v5614_v30, %v4155_v31 }
 0x197   :  { %v6915_v18 = vpop.f32.mrf.mxu3  ;;  %v6919_v21 = vpop.f32.mrf.mxu1  ;;  %2194 = vmatpush.bf16.msrb.mxu3 %v5699_v14  ;;  %2034 = vmatpush.bf16.msrb.mxu1 %v5681_v62 }
 0x198   :  { %1954 = vmatpush.bf16.msrb.mxu0 %v5672_v26 }
 0x19a   :  { %2114 = vmatpush.bf16.msrb.mxu2 %v5690_v48  ;;  %v4279_v48 = vor.u32 %v5638_v53, %v4276_v34  ;;  %v4062_v53 = vld [vmem:[%s7680_s0 + $0x250] sm:$0xff]  ;;  %v4183_v34 = vld [vmem:[%s7680_s0 + $0x318] sm:$0xff] }
 0x19b   :  { %2195 = vmatpush.bf16.msrb.mxu3 %v5698_v28  ;;  %v5688_v28 = vld [vmem:[%s7681_s3 + $0x180] sm:$0xff]  ;;  %2035 = vmatpush.bf16.msrb.mxu1 %v5680_v23  ;;  %v935_v59 = vunpack.c.l.b16 %v4062_v53  ;;  %v1284_v62 = vunpack.c.l.b16 %v4183_v34 }
 0x19c   :  { %v6969_v0 = vpop.f32.mrf.mxu2 }
 0x19d   :  { %v1310_v36 = vpack.c.b16 %v1284_v62, %v1284_v62 }
 0x19e   :  { %v6973_v13 = vpop.f32.mrf.mxu0  ;;  %2115 = vmatpush.bf16.msrb.mxu2 %v5689_v61  ;;  %v936_v61 = vunpack.c.h.b16 %v4062_v53  ;;  %v1350_v53 = vadd.f32 %v6722_v49, %v6781_v38 }
 0x19f   :  { %v6971_v1 = vpop.f32.mrf.mxu3  ;;  %v6975_v14 = vpop.f32.mrf.mxu1  ;;  %2196 = vmatpush.bf16.msrb.mxu3 %v5697_v63  ;;  %v1285_v63 = vunpack.c.h.b16 %v4183_v34  ;;  %v1355_v34 = vadd.f32 %v6722_v49, %v6881_v47 }
 0x1a0   :  { %v962_v26 = vpack.c.b16 %v936_v61, %v936_v61  ;;  %v1423_v61 = vadd.f32 %v6783_v39, %v1350_v53  ;;  %v1014_v53 = vadd.f32 %v6722_v49, %v6973_v13 }
 0x1a1   :  { %1052 = vmatmul.bf16.gmra.mxu0 %v4154_v3  ;;  %1401 = vmatmul.bf16.gmra.mxu2 %v4275_v22  ;;  %v1004_v3 = vadd.f32 %v6722_v49, %v6785_v44  ;;  %v1311_v45 = vpack.c.b16 %v1285_v63, %v1285_v63  ;;  %v1353_v44 = vadd.f32 %v6722_v49, %v6825_v19 }
 0x1a2   :  { %1125 = vmatmul.bf16.gmra.mxu1 %v4158_v4  ;;  %2116 = vmatpush.bf16.msrb.mxu2 %v5688_v28  ;;  %v1006_v28 = vadd.f32 %v6722_v49, %v6829_v10  ;;  %v1428_v38 = vadd.f32 %v6883_v52, %v1355_v34 }
 0x1a3   :  { %2197 = vmatpush.bf16.msrb.mxu3 %v5696_v29  ;;  %v1426_v62 = vadd.f32 %v6827_v6, %v1353_v44 }
 0x1a4   :  { %1474 = vmatmul.bf16.gmra.mxu3 %v4279_v48  ;;  %v1362_v30 = vpop.f32.mrf.mxu2  ;;  %v961_v48 = vpack.c.b16 %v935_v59, %v935_v59  ;;  %v1077_v59 = vadd.f32 %v6787_v46, %v1004_v3  ;;  %v1079_v10 = vadd.f32 %v6831_v11, %v1006_v28  ;;  %v1485_v3 = vmax.f32 %v1423_v61, 0.0 }
 0x1a5   :  { %v1486_v11 = vmax.f32 %v1426_v62, 0.0  ;;  %v1011_v28 = vadd.f32 %v6722_v49, %v6917_v20  ;;  %v1560_v20 = vpack.c.bf16 %v6776_v32, %v6776_v32  ;;  %v1363_v61 = vadd.f32 %v6722_v49, %v1362_v30  ;;  %v5727_v32 = vld [vmem:[%s7681_s3 + $0x2b8] sm:$0xff] }
 0x1a6   :  { %v1015_v42 = vpop.f32.mrf.mxu0  ;;  %v1137_v63 = vmax.f32 %v1077_v59, 0.0  ;;  %v1138_v47 = vmax.f32 %v1079_v10, 0.0  ;;  %v1510_v6 = vmax.f32 %v6779_v37, %v1485_v3  ;;  %v5735_v30 = vld [vmem:[%s7681_s3 + $0x2f8] sm:$0xff] }
 0x1a7   :  { %v6989_v31 = vpop.f32.mrf.mxu3  ;;  %v6991_v43 = vpop.f32.mrf.mxu1  ;;  %v1016_v37 = vadd.f32 %v6722_v49, %v1015_v42 }
 0x1a8   :  { %v1163_v39 = vmax.f32 %v6340_v5, %v1138_v47  ;;  %v1360_v5 = vadd.f32 %v6722_v49, %v6969_v0  ;;  %v1578_v13 = vpack.c.bf16 %v1510_v6, %v1510_v6  ;;  %v5719_v0 = vld [vmem:[%s7681_s3 + $0x278] sm:$0xff]  ;;  %v1087_v47 = vadd.f32 %v6975_v14, %v1014_v53  ;;  %v5718_v14 = vld [vmem:[%s7681_s3 + $0x270] sm:$0xff] }
 0x1ac   :  { %v1364_v4 = vpop.f32.mrf.mxu2 }
 0x1ae   :  { %v7005_v23 = vpop.f32.mrf.mxu0 }
 0x1af   :  { %v7001_v22 = vpop.f32.mrf.mxu3  ;;  %v7007_v29 = vpop.f32.mrf.mxu1 }
 0x1b1   :  { %1057 = vmatmul.bf16.gmra.mxu0 %v961_v48  ;;  %1406 = vmatmul.bf16.gmra.mxu2 %v1310_v36  ;;  %v1487_v36 = vmax.f32 %v1428_v38, 0.0  ;;  %v1084_v38 = vadd.f32 %v6919_v21, %v1011_v28  ;;  %v1089_v21 = vadd.f32 %v6991_v43, %v1016_v37  ;;  %v5734_v43 = vld [vmem:[%s7681_s3 + $0x2f0] sm:$0xff] }
 0x1b2   :  { %1130 = vmatmul.bf16.gmra.mxu1 %v962_v26  ;;  %v1009_v26 = vadd.f32 %v6722_v49, %v6885_v56 }
 0x1b3   :  { %v1512_v48 = vmax.f32 %v1163_v39, %v1487_v36 }
 0x1b4   :  { %1479 = vmatmul.bf16.gmra.mxu3 %v1311_v45  ;;  %v7020_v15 = vpop.f32.mrf.mxu2  ;;  %v1162_v45 = vmax.f32 %v6336_v54, %v1137_v63  ;;  %v1358_v54 = vadd.f32 %v6722_v49, %v6913_v17  ;;  %v5711_v17 = vld [vmem:[%s7681_s3 + $0x238] sm:$0xff]  ;;  %v1082_v62 = vadd.f32 %v6887_v57, %v1009_v26  ;;  %v1365_v63 = vadd.f32 %v6722_v49, %v1364_v4 }
 0x1b5   :  { %v1800_v42 = vpack.c.bf16 %v1512_v48, %v1512_v48  ;;  %v1433_v57 = vadd.f32 %v6971_v1, %v1360_v5  ;;  %v1436_v4 = vadd.f32 %v6989_v31, %v1363_v61  ;;  %v5726_v31 = vld [vmem:[%s7681_s3 + $0x2b0] sm:$0xff]  ;;  %v1142_v26 = vmax.f32 %v1089_v21, 0.0  ;;  %v5717_v5 = vld [vmem:[%s7681_s3 + $0x268] sm:$0xff] }
 0x1b6   :  { %v7024_v58 = vpop.f32.mrf.mxu0  ;;  %v1511_v52 = vmax.f32 %v1162_v45, %v1486_v11  ;;  %v1431_v3 = vadd.f32 %v6915_v18, %v1358_v54  ;;  %v5710_v11 = vld [vmem:[%s7681_s3 + $0x230] sm:$0xff]  ;;  %v1139_v36 = vmax.f32 %v1082_v62, 0.0  ;;  %v1140_v18 = vmax.f32 %v1084_v38, 0.0  ;;  %v5709_v54 = vld [vmem:[%s7681_s3 + $0x228] sm:$0xff]  ;;  %v5716_v38 = vld [vmem:[%s7681_s3 + $0x260] sm:$0xff] }
 0x1b7   :  { %v7022_v19 = vpop.f32.mrf.mxu3  ;;  %v7026_v46 = vpop.f32.mrf.mxu1  ;;  %v1438_v1 = vadd.f32 %v7001_v22, %v1365_v63  ;;  %v1141_v45 = vmax.f32 %v1087_v47, 0.0  ;;  %v1489_v48 = vmax.f32 %v1433_v57, 0.0  ;;  %v1490_v22 = vmax.f32 %v1436_v4, 0.0  ;;  %v5733_v61 = vld [vmem:[%s7681_s3 + $0x2e8] sm:$0xff] }
 0x1b8   :  { %v1719_v10 = vpack.c.bf16 %v1511_v52, %v1511_v52  ;;  %v1488_v52 = vmax.f32 %v1431_v3, 0.0  ;;  %v1164_v37 = vmax.f32 %v6368_v25, %v1139_v36  ;;  %v1167_v62 = vmax.f32 %v6386_v12, %v1142_v26  ;;  %v5732_v12 = vld [vmem:[%s7681_s3 + $0x2e0] sm:$0xff]  ;;  %v5707_v36 = vld [vmem:[%s7681_s3 + $0x218] sm:$0xff] }
 0x1bc   :  { %v7037_v44 = vpop.f32.mrf.mxu2 }
 0x1be   :  { %v7046_v59 = vpop.f32.mrf.mxu0 }
 0x1bf   :  { %v7039_v34 = vpop.f32.mrf.mxu3  ;;  %v7048_v56 = vpop.f32.mrf.mxu1 }
 0x1c1   :  { %1652 = vmatmul.bf16.vlgmr.msra.gmra.mxu0 %v1578_v13  ;;  %1793 = vmatmul.bf16.vlgmr.msra.gmra.mxu2 %v1719_v10  ;;  %v1491_v13 = vmax.f32 %v1438_v1, 0.0  ;;  %v5725_v10 = vld [vmem:[%s7681_s3 + $0x2a8] sm:$0xff] }
 0x1c2   :  { %1713 = vmatmul.bf16.vlgmr.msra.gmra.mxu1 %v1560_v20  ;;  %2271 = vmatpush.bf16.msra.mxu0 %v5711_v17  ;;  %v1165_v20 = vmax.f32 %v6372_v41, %v1140_v18  ;;  %v1166_v17 = vmax.f32 %v6382_v60, %v1141_v45  ;;  %v5708_v41 = vld [vmem:[%s7681_s3 + $0x220] sm:$0xff]  ;;  %v5715_v18 = vld [vmem:[%s7681_s3 + $0x258] sm:$0xff]  ;;  %v1368_v45 = vadd.f32 %v6722_v49, %v7020_v15  ;;  %v5706_v15 = vld [vmem:[%s7681_s3 + $0x210] sm:$0xff] }
 0x1c3   :  { %2352 = vmatpush.bf16.msra.mxu1 %v5719_v0  ;;  %2433 = vmatpush.bf16.msra.mxu2 %v5727_v32  ;;  %v1513_v0 = vmax.f32 %v1164_v37, %v1488_v52  ;;  %v1516_v63 = vmax.f32 %v1167_v62, %v1491_v13  ;;  %v5724_v60 = vld [vmem:[%s7681_s3 + $0x2a0] sm:$0xff]  ;;  %v1370_v52 = vadd.f32 %v6722_v49, %v7037_v44  ;;  %v5714_v44 = vld [vmem:[%s7681_s3 + $0x250] sm:$0xff]  ;;  %v5729_v62 = vld [vmem:[%s7681_s3 + $0x2c8] sm:$0xff] }
 0x1c4   :  { %1874 = vmatmul.bf16.vlgmr.msra.gmra.mxu3 %v1800_v42  ;;  %v1372_v39 = vpop.f32.mrf.mxu2  ;;  %v1514_v42 = vmax.f32 %v1165_v20, %v1489_v48  ;;  %v1515_v25 = vmax.f32 %v1166_v17, %v1490_v22 }
 0x1c5   :  { %2514 = vmatpush.bf16.msra.mxu3 %v5735_v30  ;;  %v1881_v47 = vpack.c.bf16 %v1513_v0, %v1513_v0  ;;  %v2124_v1 = vpack.c.bf16 %v1516_v63, %v1516_v63 }
 0x1c6   :  { %v1025_v28 = vpop.f32.mrf.mxu0  ;;  %2272 = vmatpush.bf16.msra.mxu0 %v5710_v11  ;;  %v1962_v3 = vpack.c.bf16 %v1514_v42, %v1514_v42  ;;  %v2043_v4 = vpack.c.bf16 %v1515_v25, %v1515_v25  ;;  %v1019_v11 = vadd.f32 %v6722_v49, %v7005_v23  ;;  %v5731_v23 = vld [vmem:[%s7681_s3 + $0x2d8] sm:$0xff] }
 0x1c7   :  { %v7086_v6 = vpop.f32.mrf.mxu3  ;;  %v1098_v53 = vpop.f32.mrf.mxu1  ;;  %2353 = vmatpush.bf16.msra.mxu1 %v5718_v14  ;;  %2434 = vmatpush.bf16.msra.mxu2 %v5726_v31  ;;  %v1021_v14 = vadd.f32 %v6722_v49, %v7024_v58  ;;  %v1024_v31 = vadd.f32 %v6722_v49, %v7046_v59  ;;  %v5723_v58 = vld [vmem:[%s7681_s3 + $0x298] sm:$0xff]  ;;  %v1373_v59 = vadd.f32 %v6722_v49, %v1372_v39 }
 0x1c8   :  { %v1092_v26 = vadd.f32 %v7007_v29, %v1019_v11  ;;  %v5722_v29 = vld [vmem:[%s7681_s3 + $0x290] sm:$0xff] }
 0x1c9   :  { %2515 = vmatpush.bf16.msra.mxu3 %v5734_v43  ;;  %v1026_v43 = vadd.f32 %v6722_v49, %v1025_v28  ;;  %v1094_v28 = vadd.f32 %v7026_v46, %v1021_v14  ;;  %v1097_v39 = vadd.f32 %v7048_v56, %v1024_v31  ;;  %v5730_v46 = vld [vmem:[%s7681_s3 + $0x2d0] sm:$0xff]  ;;  %v1446_v56 = vadd.f32 %v7086_v6, %v1373_v59  ;;  %v5721_v6 = vld [vmem:[%s7681_s3 + $0x288] sm:$0xff] }
 0x1ca   :  { %2273 = vmatpush.bf16.msra.mxu0 %v5709_v54  ;;  %v1441_v54 = vadd.f32 %v7022_v19, %v1368_v45  ;;  %v5705_v19 = vld [vmem:[%s7681_s3 + $0x208] sm:$0xff]  ;;  %v5742_v59 = vld [vmem:[%s7681_s3 + $0x330] sm:$0xff] }
 0x1cb   :  { %2354 = vmatpush.bf16.msra.mxu1 %v5717_v5  ;;  %2435 = vmatpush.bf16.msra.mxu2 %v5725_v10  ;;  %v1099_v22 = vadd.f32 %v1098_v53, %v1026_v43  ;;  %v1443_v5 = vadd.f32 %v7039_v34, %v1370_v52  ;;  %v1144_v17 = vmax.f32 %v1094_v28, 0.0  ;;  %v5713_v34 = vld [vmem:[%s7681_s3 + $0x248] sm:$0xff]  ;;  %v1145_v0 = vmax.f32 %v1097_v39, 0.0 }
 0x1cc   :  { %v1374_v32 = vpop.f32.mrf.mxu2  ;;  %v1492_v25 = vmax.f32 %v1441_v54, 0.0 }
 0x1cd   :  { %2516 = vmatpush.bf16.msra.mxu3 %v5733_v61  ;;  %v1375_v48 = vadd.f32 %v6722_v49, %v1374_v32  ;;  %v1143_v61 = vmax.f32 %v1092_v26, 0.0  ;;  %v1146_v42 = vmax.f32 %v1099_v22, 0.0  ;;  %v5704_v32 = vld [vmem:[%s7681_s3 + $0x200] sm:$0xff] }
 0x1ce   :  { %v7116_v57 = vpop.f32.mrf.mxu0  ;;  %2274 = vmatpush.bf16.msra.mxu0 %v5708_v41  ;;  %v1493_v41 = vmax.f32 %v1443_v5, 0.0 }
 0x1cf   :  { %v1447_v30 = vpop.f32.mrf.mxu3  ;;  %v7118_v21 = vpop.f32.mrf.mxu1  ;;  %2355 = vmatpush.bf16.msra.mxu1 %v5716_v38  ;;  %2436 = vmatpush.bf16.msra.mxu2 %v5724_v60  ;;  %v1494_v38 = vmax.f32 %v1446_v56, 0.0  ;;  %v1168_v60 = vmax.f32 %v6414_v33, %v1143_v61  ;;  %v5720_v33 = vld [vmem:[%s7681_s3 + $0x280] sm:$0xff]  ;;  %v5757_v56 = vld [vmem:[%s7681_s3 + $0x3a8] sm:$0xff] }
 0x1d0   :  { %v1448_v53 = vadd.f32 %v1447_v30, %v1375_v48  ;;  %v5712_v30 = vld [vmem:[%s7681_s3 + $0x240] sm:$0xff]  ;;  %v5750_v48 = vld [vmem:[%s7681_s3 + $0x370] sm:$0xff] }
 0x1d1   :  { %2517 = vmatpush.bf16.msra.mxu3 %v5732_v12  ;;  %1955 = vmatmul.bf16.vlgmr.msrb.gmra.mxu0 %v1881_v47  ;;  %v1169_v12 = vmax.f32 %v6418_v51, %v1144_v17  ;;  %v1170_v47 = vmax.f32 %v6446_v9, %v1145_v0  ;;  %v5728_v51 = vld [vmem:[%s7681_s3 + $0x2c0] sm:$0xff]  ;;  %v5743_v9 = vld [vmem:[%s7681_s3 + $0x338] sm:$0xff]  ;;  %v1029_v0 = vadd.f32 %v6722_v49, %v7116_v57 }
 0x1d2   :  { %2036 = vmatmul.bf16.vlgmr.msrb.gmra.mxu1 %v1962_v3  ;;  %2117 = vmatmul.bf16.vlgmr.msrb.gmra.mxu2 %v2043_v4  ;;  %v1495_v63 = vmax.f32 %v1448_v53, 0.0  ;;  %v1171_v3 = vmax.f32 %v6450_v27, %v1146_v42  ;;  %v1517_v4 = vmax.f32 %v1168_v60, %v1492_v25  ;;  %v5751_v27 = vld [vmem:[%s7681_s3 + $0x378] sm:$0xff]  ;;  %v5765_v53 = vld [vmem:[%s7681_s3 + $0x3e8] sm:$0xff]  ;;  %v5740_v61 = vld [vmem:[%s7681_s3 + $0x320] sm:$0xff] }
 0x1d3   :  { %2275 = vmatpush.bf16.msra.mxu0 %v5707_v36  ;;  %2356 = vmatpush.bf16.msra.mxu1 %v5715_v18  ;;  %v1518_v11 = vmax.f32 %v1169_v12, %v1493_v41  ;;  %v1519_v18 = vmax.f32 %v1170_v47, %v1494_v38  ;;  %v5748_v17 = vld [vmem:[%s7681_s3 + $0x360] sm:$0xff]  ;;  %v5739_v25 = vld [vmem:[%s7681_s3 + $0x318] sm:$0xff] }
 0x1d4   :  { %2198 = vmatmul.bf16.vlgmr.msrb.gmra.mxu3 %v2124_v1  ;;  %2437 = vmatpush.bf16.msra.mxu2 %v5723_v58  ;;  %v7162_v37 = vpop.f32.mrf.mxu2  ;;  %v1520_v1 = vmax.f32 %v1171_v3, %v1495_v63  ;;  %v5759_v58 = vld [vmem:[%s7681_s3 + $0x3b8] sm:$0xff]  ;;  %v2205_v45 = vpack.c.bf16 %v1517_v4, %v1517_v4  ;;  %v5738_v4 = vld [vmem:[%s7681_s3 + $0x310] sm:$0xff] }
 0x1d5   :  { %2518 = vmatpush.bf16.msra.mxu3 %v5731_v23  ;;  %v5767_v23 = vld [vmem:[%s7681_s3 + $0x3f8] sm:$0xff]  ;;  %v2286_v52 = vpack.c.bf16 %v1518_v11, %v1518_v11  ;;  %v2367_v26 = vpack.c.bf16 %v1519_v18, %v1519_v18 }
 0x1d6   :  { %v7167_v13 = vpop.f32.mrf.mxu0  ;;  %v2448_v28 = vpack.c.bf16 %v1520_v1, %v1520_v1  ;;  %v5747_v41 = vld [vmem:[%s7681_s3 + $0x358] sm:$0xff] }
 0x1d7   :  { %v7164_v20 = vpop.f32.mrf.mxu3  ;;  %v7169_v10 = vpop.f32.mrf.mxu1  ;;  %2276 = vmatpush.bf16.msra.mxu0 %v5706_v15  ;;  %2357 = vmatpush.bf16.msra.mxu1 %v5714_v44  ;;  %v5758_v15 = vld [vmem:[%s7681_s3 + $0x3b0] sm:$0xff]  ;;  %v1031_v42 = vadd.f32 %v6722_v49, %v7167_v13  ;;  %v5755_v60 = vld [vmem:[%s7681_s3 + $0x398] sm:$0xff] }
 0x1d8   :  { %2438 = vmatpush.bf16.msra.mxu2 %v5722_v29  ;;  %v5766_v44 = vld [vmem:[%s7681_s3 + $0x3f0] sm:$0xff]  ;;  %v5741_v29 = vld [vmem:[%s7681_s3 + $0x328] sm:$0xff]  ;;  %v5763_v12 = vld [vmem:[%s7681_s3 + $0x3d8] sm:$0xff] }
 0x1d9   :  { %2519 = vmatpush.bf16.msra.mxu3 %v5730_v46  ;;  %v5749_v46 = vld [vmem:[%s7681_s3 + $0x368] sm:$0xff] }
 0x1db   :  { %2277 = vmatpush.bf16.msra.mxu0 %v5705_v19  ;;  %2358 = vmatpush.bf16.msra.mxu1 %v5713_v34  ;;  %v5756_v19 = vld [vmem:[%s7681_s3 + $0x3a0] sm:$0xff] }
 0x1dc   :  { %2439 = vmatpush.bf16.msra.mxu2 %v5721_v6  ;;  %v7199_v14 = vpop.f32.mrf.mxu2  ;;  %v5764_v34 = vld [vmem:[%s7681_s3 + $0x3e0] sm:$0xff] }
 0x1dd   :  { %2520 = vmatpush.bf16.msra.mxu3 %v5729_v62 }
 0x1de   :  { %v1033_v31 = vpop.f32.mrf.mxu0 }
 0x1df   :  { %v7201_v36 = vpop.f32.mrf.mxu3  ;;  %v7209_v43 = vpop.f32.mrf.mxu1  ;;  %2278 = vmatpush.bf16.msra.mxu0 %v5704_v32  ;;  %2359 = vmatpush.bf16.msra.mxu1 %v5712_v30  ;;  %v1034_v38 = vadd.f32 %v6722_v49, %v1033_v31  ;;  %v1378_v32 = vadd.f32 %v6722_v49, %v7162_v37  ;;  %v1380_v30 = vadd.f32 %v6722_v49, %v7199_v14  ;;  %v5746_v37 = vld [vmem:[%s7681_s3 + $0x350] sm:$0xff] }
 0x1e0   :  { %2440 = vmatpush.bf16.msra.mxu2 %v5720_v33  ;;  %v1102_v33 = vadd.f32 %v7118_v21, %v1029_v0  ;;  %v5762_v21 = vld [vmem:[%s7681_s3 + $0x3d0] sm:$0xff]  ;;  %v5799_v0 = vld [vmem:[%s7681_s3 + $0x4f8] sm:$0xff] }
 0x1e1   :  { %2521 = vmatpush.bf16.msra.mxu3 %v5728_v51  ;;  %v1104_v51 = vadd.f32 %v7169_v10, %v1031_v42  ;;  %v1107_v11 = vadd.f32 %v7209_v43, %v1034_v38  ;;  %v1451_v10 = vadd.f32 %v7164_v20, %v1378_v32  ;;  %v5745_v20 = vld [vmem:[%s7681_s3 + $0x348] sm:$0xff] }
 0x1e2   :  { %2279 = vmatmul.bf16.vlgmr.msra.gmra.mxu0 %v2205_v45  ;;  %2360 = vmatmul.bf16.vlgmr.msra.gmra.mxu1 %v2286_v52  ;;  %v1147_v1 = vmax.f32 %v1102_v33, 0.0  ;;  %v5781_v33 = vld [vmem:[%s7681_s3 + $0x468] sm:$0xff] }
 0x1e3   :  { %2595 = vmatpush.bf16.msrb.mxu0 %v5743_v9  ;;  %2676 = vmatpush.bf16.msrb.mxu1 %v5751_v27  ;;  %v1453_v9 = vadd.f32 %v7201_v36, %v1380_v30  ;;  %v1148_v31 = vmax.f32 %v1104_v51, 0.0  ;;  %v1149_v45 = vmax.f32 %v1107_v11, 0.0  ;;  %v5790_v30 = vld [vmem:[%s7681_s3 + $0x4b0] sm:$0xff]  ;;  %v5789_v51 = vld [vmem:[%s7681_s3 + $0x4a8] sm:$0xff] }
 0x1e4   :  { %2757 = vmatpush.bf16.msrb.mxu2 %v5759_v58  ;;  %2522 = vmatmul.bf16.vlgmr.msra.gmra.mxu3 %v2448_v28  ;;  %v1382_v39 = vpop.f32.mrf.mxu2  ;;  %v1496_v28 = vmax.f32 %v1451_v10, 0.0  ;;  %v5780_v10 = vld [vmem:[%s7681_s3 + $0x460] sm:$0xff] }
 0x1e5   :  { %2838 = vmatpush.bf16.msrb.mxu3 %v5767_v23  ;;  %2441 = vmatmul.bf16.vlgmr.msra.gmra.mxu2 %v2367_v26  ;;  %v1383_v47 = vadd.f32 %v6722_v49, %v1382_v39  ;;  %v5737_v23 = vld [vmem:[%s7681_s3 + $0x308] sm:$0xff] }
 0x1e6   :  { %v1035_v54 = vpop.f32.mrf.mxu0  ;;  %v5761_v26 = vld [vmem:[%s7681_s3 + $0x3c8] sm:$0xff] }
 0x1e7   :  { %2596 = vmatpush.bf16.msrb.mxu0 %v5742_v59  ;;  %2677 = vmatpush.bf16.msrb.mxu1 %v5750_v48  ;;  %v1455_v22 = vpop.f32.mrf.mxu3  ;;  %v1108_v5 = vpop.f32.mrf.mxu1  ;;  %v1036_v63 = vadd.f32 %v6722_v49, %v1035_v54  ;;  %v5753_v48 = vld [vmem:[%s7681_s3 + $0x388] sm:$0xff]  ;;  %v5744_v54 = vld [vmem:[%s7681_s3 + $0x340] sm:$0xff] }
 0x1e8   :  { %2758 = vmatpush.bf16.msrb.mxu2 %v5758_v15  ;;  %v1456_v27 = vadd.f32 %v1455_v22, %v1383_v47  ;;  %v1497_v15 = vmax.f32 %v1453_v9, 0.0  ;;  %v1172_v22 = vmax.f32 %v6478_v50, %v1147_v1  ;;  %v5752_v50 = vld [vmem:[%s7681_s3 + $0x380] sm:$0xff]  ;;  %v5798_v47 = vld [vmem:[%s7681_s3 + $0x4f0] sm:$0xff] }
 0x1e9   :  { %2839 = vmatpush.bf16.msrb.mxu3 %v5766_v44  ;;  %v1109_v14 = vadd.f32 %v1108_v5, %v1036_v63  ;;  %v1174_v5 = vmax.f32 %v6522_v35, %v1149_v45  ;;  %v5783_v35 = vld [vmem:[%s7681_s3 + $0x478] sm:$0xff]  ;;  %v5774_v63 = vld [vmem:[%s7681_s3 + $0x430] sm:$0xff]  ;;  %v5788_v9 = vld [vmem:[%s7681_s3 + $0x4a0] sm:$0xff] }
 0x1ea   :  { %v1498_v44 = vmax.f32 %v1456_v27, 0.0  ;;  %v5796_v27 = vld [vmem:[%s7681_s3 + $0x4e0] sm:$0xff] }
 0x1eb   :  { %2597 = vmatpush.bf16.msrb.mxu0 %v5741_v29  ;;  %2678 = vmatpush.bf16.msrb.mxu1 %v5749_v46  ;;  %v1150_v36 = vmax.f32 %v1109_v14, 0.0  ;;  %v1173_v29 = vmax.f32 %v6488_v7, %v1148_v31  ;;  %v5736_v46 = vld [vmem:[%s7681_s3 + $0x300] sm:$0xff] }
 0x1ec   :  { %2759 = vmatpush.bf16.msrb.mxu2 %v5757_v56  ;;  %v1384_v6 = vpop.f32.mrf.mxu2  ;;  %v5760_v7 = vld [vmem:[%s7681_s3 + $0x3c0] sm:$0xff] }
 0x1ed   :  { %2840 = vmatpush.bf16.msrb.mxu3 %v5765_v53  ;;  %v1385_v3 = vadd.f32 %v6722_v49, %v1384_v6  ;;  %v5754_v49 = vld [vmem:[%s7681_s3 + $0x390] sm:$0xff]  ;;  %v1175_v56 = vmax.f32 %v6526_v55, %v1150_v36  ;;  %v1521_v53 = vmax.f32 %v1172_v22, %v1496_v28  ;;  %v1523_v55 = vmax.f32 %v1174_v5, %v1498_v44 }
 0x1ee   :  { %v7265_v57 = vpop.f32.mrf.mxu0  ;;  %v5778_v5 = vld [vmem:[%s7681_s3 + $0x450] sm:$0xff] }
 0x1ef   :  { %2598 = vmatpush.bf16.msrb.mxu0 %v5740_v61  ;;  %2679 = vmatpush.bf16.msrb.mxu1 %v5748_v17  ;;  %v1457_v62 = vpop.f32.mrf.mxu3  ;;  %v7267_v13 = vpop.f32.mrf.mxu1  ;;  %v1522_v61 = vmax.f32 %v1173_v29, %v1497_v15  ;;  %v5775_v17 = vld [vmem:[%s7681_s3 + $0x438] sm:$0xff] }
 0x1f0   :  { %2760 = vmatpush.bf16.msrb.mxu2 %v5756_v19  ;;  %v1458_v18 = vadd.f32 %v1457_v62, %v1385_v3  ;;  %v5773_v3 = vld [vmem:[%s7681_s3 + $0x428] sm:$0xff] }
 0x1f1   :  { %2841 = vmatpush.bf16.msrb.mxu3 %v5764_v34  ;;  %v5791_v34 = vld [vmem:[%s7681_s3 + $0x4b8] sm:$0xff]  ;;  %v2610_v38 = vpack.c.bf16 %v1522_v61, %v1522_v61 }
 0x1f2   :  { %v1499_v39 = vmax.f32 %v1458_v18, 0.0  ;;  %v7389_v18 = vld [vmem:[%s7679_s2] ss:$0 sm:$0xff] }
 0x1f3   :  { %2599 = vmatpush.bf16.msrb.mxu0 %v5739_v25  ;;  %2680 = vmatpush.bf16.msrb.mxu1 %v5747_v41  ;;  %v2529_v41 = vpack.c.bf16 %v1521_v53, %v1521_v53  ;;  %v1039_v1 = vadd.f32 %v7389_v18, %v7265_v57  ;;  %v5787_v57 = vld [vmem:[%s7681_s3 + $0x498] sm:$0xff] }
 0x1f4   :  { %2761 = vmatpush.bf16.msrb.mxu2 %v5755_v60  ;;  %v7298_v43 = vpop.f32.mrf.mxu2  ;;  %v1524_v19 = vmax.f32 %v1175_v56, %v1499_v39  ;;  %v5782_v60 = vld [vmem:[%s7681_s3 + $0x470] sm:$0xff] }
 0x1f5   :  { %2842 = vmatpush.bf16.msrb.mxu3 %v5763_v12  ;;  %v2691_v12 = vpack.c.bf16 %v1523_v55, %v1523_v55 }
 0x1f6   :  { %v7308_v52 = vpop.f32.mrf.mxu0  ;;  %v2772_v32 = vpack.c.bf16 %v1524_v19, %v1524_v19  ;;  %v5769_v19 = vld [vmem:[%s7681_s3 + $0x408] sm:$0xff] }
 0x1f7   :  { %2600 = vmatpush.bf16.msrb.mxu0 %v5738_v4  ;;  %2681 = vmatpush.bf16.msrb.mxu1 %v5746_v37  ;;  %v7300_v58 = vpop.f32.mrf.mxu3  ;;  %v7310_v59 = vpop.f32.mrf.mxu1  ;;  %v5797_v4 = vld [vmem:[%s7681_s3 + $0x4e8] sm:$0xff]  ;;  %v1041_v31 = vadd.f32 %v7389_v18, %v7308_v52  ;;  %v5795_v52 = vld [vmem:[%s7681_s3 + $0x4d8] sm:$0xff] }
 0x1f8   :  { %2762 = vmatpush.bf16.msrb.mxu2 %v5754_v49 }
 0x1f9   :  { %2843 = vmatpush.bf16.msrb.mxu3 %v5762_v21  ;;  %v5772_v21 = vld [vmem:[%s7681_s3 + $0x420] sm:$0xff] }
 0x1fb   :  { %2601 = vmatpush.bf16.msrb.mxu0 %v5737_v23  ;;  %2682 = vmatpush.bf16.msrb.mxu1 %v5745_v20  ;;  %v5771_v23 = vld [vmem:[%s7681_s3 + $0x418] sm:$0xff] }
 0x1fc   :  { %2763 = vmatpush.bf16.msrb.mxu2 %v5753_v48  ;;  %v1389_v42 = vpop.f32.mrf.mxu2  ;;  %v5779_v20 = vld [vmem:[%s7681_s3 + $0x458] sm:$0xff]  ;;  %v1388_v48 = vadd.f32 %v7389_v18, %v7298_v43  ;;  %v5770_v43 = vld [vmem:[%s7681_s3 + $0x410] sm:$0xff] }
 0x1fd   :  { %2844 = vmatpush.bf16.msrb.mxu3 %v5761_v26  ;;  %v1390_v26 = vadd.f32 %v7389_v18, %v1389_v42 }
 0x1fe   :  { %v1043_v62 = vpop.f32.mrf.mxu0 }
 0x1ff   :  { %2602 = vmatpush.bf16.msrb.mxu0 %v5736_v46  ;;  %2683 = vmatpush.bf16.msrb.mxu1 %v5744_v54  ;;  %v7346_v6 = vpop.f32.mrf.mxu3  ;;  %v7348_v25 = vpop.f32.mrf.mxu1  ;;  %v1044_v45 = vadd.f32 %v7389_v18, %v1043_v62  ;;  %v1112_v46 = vadd.f32 %v7267_v13, %v1039_v1  ;;  %v1114_v54 = vadd.f32 %v7310_v59, %v1041_v31  ;;  %v5786_v13 = vld [vmem:[%s7681_s3 + $0x490] sm:$0xff] }
 0x200   :  { %2764 = vmatpush.bf16.msrb.mxu2 %v5752_v50  ;;  %v5794_v59 = vld [vmem:[%s7681_s3 + $0x4d0] sm:$0xff]  ;;  %v1463_v53 = vadd.f32 %v7346_v6, %v1390_v26  ;;  %v5793_v6 = vld [vmem:[%s7681_s3 + $0x4c8] sm:$0xff] }
 0x201   :  { %2845 = vmatpush.bf16.msrb.mxu3 %v5760_v7  ;;  %v1117_v56 = vadd.f32 %v7348_v25, %v1044_v45  ;;  %v1461_v7 = vadd.f32 %v7300_v58, %v1388_v48  ;;  %v1152_v55 = vmax.f32 %v1114_v54, 0.0  ;;  %v5785_v58 = vld [vmem:[%s7681_s3 + $0x488] sm:$0xff] }
 0x202   :  { %2603 = vmatmul.bf16.vlgmr.msrb.gmra.mxu0 %v2529_v41  ;;  %2684 = vmatmul.bf16.vlgmr.msrb.gmra.mxu1 %v2610_v38  ;;  %v1501_v25 = vmax.f32 %v1463_v53, 0.0 }
 0x203   :  { %2919 = vmatpush.bf16.msra.mxu0 %v5775_v17  ;;  %3000 = vmatpush.bf16.msra.mxu1 %v5783_v35  ;;  %v1151_v35 = vmax.f32 %v1112_v46, 0.0  ;;  %v1500_v62 = vmax.f32 %v1461_v7, 0.0 }
 0x204   :  { %3081 = vmatpush.bf16.msra.mxu2 %v5791_v34  ;;  %2846 = vmatmul.bf16.vlgmr.msrb.gmra.mxu3 %v2772_v32  ;;  %v1392_v37 = vpop.f32.mrf.mxu2  ;;  %v5777_v34 = vld [vmem:[%s7681_s3 + $0x448] sm:$0xff] }
 0x205   :  { %3162 = vmatpush.bf16.msra.mxu3 %v5799_v0  ;;  %2765 = vmatmul.bf16.vlgmr.msrb.gmra.mxu2 %v2691_v12  ;;  %v1393_v44 = vadd.f32 %v7389_v18, %v1392_v37  ;;  %v1153_v0 = vmax.f32 %v1117_v56, 0.0  ;;  %v5820_v56 = vld [vmem:[%s7681_s3 + $0x5a0] sm:$0xff] }
 0x206   :  { %v1045_v14 = vpop.f32.mrf.mxu0 }
 0x207   :  { %2920 = vmatpush.bf16.msra.mxu0 %v5774_v63  ;;  %3001 = vmatpush.bf16.msra.mxu1 %v5782_v60  ;;  %v1465_v11 = vpop.f32.mrf.mxu3  ;;  %v1118_v49 = vpop.f32.mrf.mxu1  ;;  %v1046_v36 = vadd.f32 %v7389_v18, %v1045_v14  ;;  %v5807_v14 = vld [vmem:[%s7681_s3 + $0x538] sm:$0xff] }
 0x208   :  { %3082 = vmatpush.bf16.msra.mxu2 %v5790_v30  ;;  %v1466_v61 = vadd.f32 %v1465_v11, %v1393_v44  ;;  %v1176_v30 = vmax.f32 %v6557_v16, %v1151_v35  ;;  %v5784_v16 = vld [vmem:[%s7681_s3 + $0x480] sm:$0xff]  ;;  %v5821_v44 = vld [vmem:[%s7681_s3 + $0x5a8] sm:$0xff]  ;;  %v5803_v35 = vld [vmem:[%s7681_s3 + $0x518] sm:$0xff] }
 0x209   :  { %3163 = vmatpush.bf16.msra.mxu3 %v5798_v47  ;;  %v1119_v50 = vadd.f32 %v1118_v49, %v1046_v36  ;;  %v1177_v47 = vmax.f32 %v6570_v40, %v1152_v55  ;;  %v5792_v40 = vld [vmem:[%s7681_s3 + $0x4c0] sm:$0xff]  ;;  %v5811_v55 = vld [vmem:[%s7681_s3 + $0x558] sm:$0xff] }
 0x20a   :  { %v1502_v63 = vmax.f32 %v1466_v61, 0.0  ;;  %v1525_v37 = vmax.f32 %v1176_v30, %v1500_v62 }
 0x20b   :  { %2921 = vmatpush.bf16.msra.mxu0 %v5773_v3  ;;  %3002 = vmatpush.bf16.msra.mxu1 %v5781_v33  ;;  %v1154_v42 = vmax.f32 %v1119_v50, 0.0  ;;  %v5768_v3 = vld [vmem:[%s7681_s3 + $0x400] sm:$0xff]  ;;  %v1526_v11 = vmax.f32 %v1177_v47, %v1501_v25 }
 0x20c   :  { %3083 = vmatpush.bf16.msra.mxu2 %v5789_v51  ;;  %v1394_v28 = vpop.f32.mrf.mxu2  ;;  %v5776_v33 = vld [vmem:[%s7681_s3 + $0x440] sm:$0xff]  ;;  %v1178_v51 = vmax.f32 %v6598_v2, %v1153_v0  ;;  %v5815_v2 = vld [vmem:[%s7681_s3 + $0x578] sm:$0xff] }
 0x20d   :  { %3164 = vmatpush.bf16.msra.mxu3 %v5797_v4  ;;  %v1395_v39 = vadd.f32 %v7389_v18, %v1394_v28  ;;  %v1179_v4 = vmax.f32 %v6605_v24, %v1154_v42  ;;  %v5805_v28 = vld [vmem:[%s7681_s3 + $0x528] sm:$0xff]  ;;  %v5828_v50 = vld [vmem:[%s7681_s3 + $0x5e0] sm:$0xff]  ;;  %v5827_v0 = vld [vmem:[%s7681_s3 + $0x5d8] sm:$0xff] }
 0x20e   :  { %v7414_v22 = vpop.f32.mrf.mxu0  ;;  %v1527_v24 = vmax.f32 %v1178_v51, %v1502_v63 }
 0x20f   :  { %2922 = vmatpush.bf16.msra.mxu0 %v5772_v21  ;;  %3003 = vmatpush.bf16.msra.mxu1 %v5780_v10  ;;  %v1467_v15 = vpop.f32.mrf.mxu3  ;;  %v7416_v29 = vpop.f32.mrf.mxu1  ;;  %v5823_v21 = vld [vmem:[%s7681_s3 + $0x5b8] sm:$0xff]  ;;  %v1049_v53 = vadd.f32 %v7389_v18, %v7414_v22 }
 0x210   :  { %3084 = vmatpush.bf16.msra.mxu2 %v5788_v9  ;;  %v1468_v17 = vadd.f32 %v1467_v15, %v1395_v39  ;;  %v5831_v10 = vld [vmem:[%s7681_s3 + $0x5f8] sm:$0xff]  ;;  %v2853_v9 = vpack.c.bf16 %v1525_v37, %v1525_v37  ;;  %v3015_v45 = vpack.c.bf16 %v1527_v24, %v1527_v24  ;;  %v5813_v15 = vld [vmem:[%s7681_s3 + $0x568] sm:$0xff] }
 0x211   :  { %3165 = vmatpush.bf16.msra.mxu3 %v5796_v27  ;;  %v2934_v27 = vpack.c.bf16 %v1526_v11, %v1526_v11  ;;  %v5829_v39 = vld [vmem:[%s7681_s3 + $0x5e8] sm:$0xff] }
 0x212   :  { %v1503_v60 = vmax.f32 %v1468_v17, 0.0 }
 0x213   :  { %2923 = vmatpush.bf16.msra.mxu0 %v5771_v23  ;;  %3004 = vmatpush.bf16.msra.mxu1 %v5779_v20  ;;  %v5806_v23 = vld [vmem:[%s7681_s3 + $0x530] sm:$0xff] }
 0x214   :  { %3085 = vmatpush.bf16.msra.mxu2 %v5787_v57  ;;  %v7447_v41 = vpop.f32.mrf.mxu2  ;;  %v1528_v49 = vmax.f32 %v1179_v4, %v1503_v60  ;;  %v5814_v20 = vld [vmem:[%s7681_s3 + $0x570] sm:$0xff] }
 0x215   :  { %3166 = vmatpush.bf16.msra.mxu3 %v5795_v52  ;;  %v5822_v57 = vld [vmem:[%s7681_s3 + $0x5b0] sm:$0xff] }
 0x216   :  { %v7451_v12 = vpop.f32.mrf.mxu0  ;;  %v3096_v36 = vpack.c.bf16 %v1528_v49, %v1528_v49  ;;  %v5830_v52 = vld [vmem:[%s7681_s3 + $0x5f0] sm:$0xff] }
 0x217   :  { %2924 = vmatpush.bf16.msra.mxu0 %v5770_v43  ;;  %3005 = vmatpush.bf16.msra.mxu1 %v5778_v5  ;;  %v7449_v38 = vpop.f32.mrf.mxu3  ;;  %v7453_v32 = vpop.f32.mrf.mxu1  ;;  %v5804_v43 = vld [vmem:[%s7681_s3 + $0x520] sm:$0xff]  ;;  %v1051_v61 = vadd.f32 %v7389_v18, %v7451_v12  ;;  %v5802_v60 = vld [vmem:[%s7681_s3 + $0x510] sm:$0xff] }
 0x218   :  { %3086 = vmatpush.bf16.msra.mxu2 %v5786_v13  ;;  %v5812_v5 = vld [vmem:[%s7681_s3 + $0x560] sm:$0xff]  ;;  %v5810_v12 = vld [vmem:[%s7681_s3 + $0x550] sm:$0xff] }
 0x219   :  { %3167 = vmatpush.bf16.msra.mxu3 %v5794_v59  ;;  %v1124_v62 = vadd.f32 %v7453_v32, %v1051_v61  ;;  %v5818_v32 = vld [vmem:[%s7681_s3 + $0x590] sm:$0xff] }
 0x21b   :  { %2925 = vmatpush.bf16.msra.mxu0 %v5769_v19  ;;  %3006 = vmatpush.bf16.msra.mxu1 %v5777_v34  ;;  %v1398_v19 = vadd.f32 %v7389_v18, %v7447_v41  ;;  %v5819_v34 = vld [vmem:[%s7681_s3 + $0x598] sm:$0xff] }
 0x21c   :  { %3087 = vmatpush.bf16.msra.mxu2 %v5785_v58  ;;  %v1399_v1 = vpop.f32.mrf.mxu2 }
 0x21d   :  { %3168 = vmatpush.bf16.msra.mxu3 %v5793_v6  ;;  %v1400_v22 = vadd.f32 %v7389_v18, %v1399_v1  ;;  %v1122_v6 = vadd.f32 %v7416_v29, %v1049_v53  ;;  %v1471_v30 = vadd.f32 %v7449_v38, %v1398_v19  ;;  %v5838_v53 = vld [vmem:[%s7681_s3 + $0x630] sm:$0xff]  ;;  %v5837_v19 = vld [vmem:[%s7681_s3 + $0x628] sm:$0xff] }
 0x21e   :  { %v1053_v48 = vpop.f32.mrf.mxu0 }
 0x21f   :  { %2926 = vmatpush.bf16.msra.mxu0 %v5768_v3  ;;  %3007 = vmatpush.bf16.msra.mxu1 %v5776_v33  ;;  %v1472_v31 = vpop.f32.mrf.mxu3  ;;  %v1126_v26 = vpop.f32.mrf.mxu1  ;;  %v1054_v17 = vadd.f32 %v7389_v18, %v1053_v48  ;;  %v5826_v3 = vld [vmem:[%s7681_s3 + $0x5d0] sm:$0xff]  ;;  %v1155_v38 = vmax.f32 %v1122_v6, 0.0  ;;  %v1504_v24 = vmax.f32 %v1471_v30, 0.0 }
 0x220   :  { %3088 = vmatpush.bf16.msra.mxu2 %v5784_v16  ;;  %v1473_v47 = vadd.f32 %v1472_v31, %v1400_v22  ;;  %v7692_v31 = vld [vmem:[#allocation3_spill] sm:$0xff]  ;;  %v5834_v30 = vld [vmem:[%s7681_s3 + $0x610] sm:$0xff] }
 0x221   :  { %3169 = vmatpush.bf16.msra.mxu3 %v5792_v40  ;;  %v1127_v25 = vadd.f32 %v1126_v26, %v1054_v17  ;;  %v1156_v40 = vmax.f32 %v1124_v62, 0.0 }
 0x222   :  { %2927 = vmatmul.bf16.vlgmr.msra.gmra.mxu0 %v2853_v9  ;;  %3008 = vmatmul.bf16.vlgmr.msra.gmra.mxu1 %v2934_v27  ;;  %v1505_v49 = vmax.f32 %v1473_v47, 0.0  ;;  %v5825_v9 = vld [vmem:[%s7681_s3 + $0x5c8] sm:$0xff] }
 0x223   :  { %3243 = vmatpush.bf16.msrb.mxu0 %v5807_v14  ;;  %3324 = vmatpush.bf16.msrb.mxu1 %v5815_v2  ;;  %v1157_v11 = vmax.f32 %v1127_v25, 0.0  ;;  %v5801_v14 = vld [vmem:[%s7681_s3 + $0x508] sm:$0xff] }
 0x224   :  { %3405 = vmatpush.bf16.msrb.mxu2 %v5823_v21  ;;  %3170 = vmatmul.bf16.vlgmr.msra.gmra.mxu3 %v3096_v36  ;;  %v1402_v46 = vpop.f32.mrf.mxu2  ;;  %v5809_v2 = vld [vmem:[%s7681_s3 + $0x548] sm:$0xff]  ;;  %v7694_v36 = vld [vmem:[#allocation5_spill] sm:$0xff] }
 0x225   :  { %3486 = vmatpush.bf16.msrb.mxu3 %v5831_v10  ;;  %3089 = vmatmul.bf16.vlgmr.msra.gmra.mxu2 %v3015_v45  ;;  %v1403_v42 = vadd.f32 %v7389_v18, %v1402_v46  ;;  %v5817_v10 = vld [vmem:[%s7681_s3 + $0x588] sm:$0xff]  ;;  %v5824_v46 = vld [vmem:[%s7681_s3 + $0x5c0] sm:$0xff] }
 0x226   :  { %v1055_v13 = vpop.f32.mrf.mxu0 }
 0x227   :  { %3244 = vmatpush.bf16.msrb.mxu0 %v5806_v23  ;;  %3325 = vmatpush.bf16.msrb.mxu1 %v5814_v20  ;;  %v1475_v54 = vpop.f32.mrf.mxu3  ;;  %v1128_v59 = vpop.f32.mrf.mxu1  ;;  %v1056_v7 = vadd.f32 %v7389_v18, %v1055_v13  ;;  %v1180_v23 = vmax.f32 %v7692_v31, %v1155_v38  ;;  %v7693_v20 = vld [vmem:[#allocation4_spill] sm:$0xff] }
 0x228   :  { %3406 = vmatpush.bf16.msrb.mxu2 %v5822_v57  ;;  %v1476_v4 = vadd.f32 %v1475_v54, %v1403_v42  ;;  %v1181_v45 = vmax.f32 %v7693_v20, %v1156_v40  ;;  %v1182_v57 = vmax.f32 %v7694_v36, %v1157_v11  ;;  %v5832_v11 = vld [vmem:[%s7681_s3 + $0x600] sm:$0xff] }
 0x229   :  { %3487 = vmatpush.bf16.msrb.mxu3 %v5830_v52  ;;  %v1129_v58 = vadd.f32 %v1128_v59, %v1056_v7 }
 0x22a   :  { %v1506_v27 = vmax.f32 %v1476_v4, 0.0 }
 0x22b   :  { %3245 = vmatpush.bf16.msrb.mxu0 %v5805_v28  ;;  %3326 = vmatpush.bf16.msrb.mxu1 %v5813_v15  ;;  %v1158_v16 = vmax.f32 %v1129_v58, 0.0  ;;  %v5800_v28 = vld [vmem:[%s7681_s3 + $0x500] sm:$0xff] }
 0x22c   :  { %3407 = vmatpush.bf16.msrb.mxu2 %v5821_v44  ;;  %v1404_v41 = vpop.f32.mrf.mxu2  ;;  %v5808_v15 = vld [vmem:[%s7681_s3 + $0x540] sm:$0xff]  ;;  %v1530_v44 = vmax.f32 %v1181_v45, %v1505_v49 }
 0x22d   :  { %3488 = vmatpush.bf16.msrb.mxu3 %v5829_v39  ;;  %v1405_v29 = vadd.f32 %v7389_v18, %v1404_v41  ;;  %v1183_v1 = vmax.f32 %v6687_v8, %v1158_v16  ;;  %v1529_v8 = vmax.f32 %v1180_v23, %v1504_v24  ;;  %v5816_v39 = vld [vmem:[%s7681_s3 + $0x580] sm:$0xff]  ;;  %v5835_v41 = vld [vmem:[%s7681_s3 + $0x618] sm:$0xff]  ;;  %v5833_v16 = vld [vmem:[%s7681_s3 + $0x608] sm:$0xff] }
 0x22e   :  { %v7557_v33 = vpop.f32.mrf.mxu0  ;;  %v3258_v59 = vpack.c.bf16 %v1530_v44, %v1530_v44 }
 0x22f   :  { %3246 = vmatpush.bf16.msrb.mxu0 %v5804_v43  ;;  %3327 = vmatpush.bf16.msrb.mxu1 %v5812_v5  ;;  %v1477_v63 = vpop.f32.mrf.mxu3  ;;  %v7559_v51 = vpop.f32.mrf.mxu1  ;;  %v1531_v5 = vmax.f32 %v1182_v57, %v1506_v27  ;;  %v3177_v13 = vpack.c.bf16 %v1529_v8, %v1529_v8  ;;  %v1059_v58 = vadd.f32 %v7389_v18, %v7557_v33 }
 0x230   :  { %3408 = vmatpush.bf16.msrb.mxu2 %v5820_v56  ;;  %v1478_v37 = vadd.f32 %v1477_v63, %v1405_v29  ;;  %v5839_v56 = vld [vmem:[%s7681_s3 + $0x638] sm:$0xff] }
 0x231   :  { %3489 = vmatpush.bf16.msrb.mxu3 %v5828_v50  ;;  %v3339_v7 = vpack.c.bf16 %v1531_v5, %v1531_v5 }
 0x232   :  { %v1507_v21 = vmax.f32 %v1478_v37, 0.0 }
 0x233   :  { %3247 = vmatpush.bf16.msrb.mxu0 %v5803_v35  ;;  %3328 = vmatpush.bf16.msrb.mxu1 %v5811_v55 }
 0x234   :  { %3409 = vmatpush.bf16.msrb.mxu2 %v5819_v34  ;;  %v1532_v52 = vmax.f32 %v1183_v1, %v1507_v21  ;;  %v1407_v48 = vpop.f32.mrf.mxu2  ;;  %v5836_v34 = vld [vmem:[%s7681_s3 + $0x620] sm:$0xff] }
 0x235   :  { %3490 = vmatpush.bf16.msrb.mxu3 %v5827_v0  ;;  %v1408_v63 = vadd.f32 %v7389_v18, %v1407_v48 }
 0x236   :  { %v1060_v54 = vpop.f32.mrf.mxu0  ;;  %v3420_v50 = vpack.c.bf16 %v1532_v52, %v1532_v52 }
 0x237   :  { %3248 = vmatpush.bf16.msrb.mxu0 %v5802_v60  ;;  %3329 = vmatpush.bf16.msrb.mxu1 %v5810_v12  ;;  %v1480_v26 = vpop.f32.mrf.mxu3  ;;  %v1133_v43 = vpop.f32.mrf.mxu1  ;;  %v1132_v12 = vadd.f32 %v7559_v51, %v1059_v58  ;;  %v7695_v51 = vld [vmem:[#allocation6_spill] sm:$0xff]  ;;  %v5845_v58 = vld [vmem:[%s7684_s5 + $0x28] sm:$0xff] }
 0x238   :  { %3410 = vmatpush.bf16.msrb.mxu2 %v5818_v32  ;;  %v1481_v47 = vadd.f32 %v1480_v26, %v1408_v63  ;;  %v5842_v63 = vld [vmem:[%s7684_s5 + $0x10] sm:$0xff] }
 0x239   :  { %3491 = vmatpush.bf16.msrb.mxu3 %v5826_v3  ;;  %v1159_v3 = vmax.f32 %v1132_v12, 0.0 }
 0x23a   :  { %v1508_v38 = vmax.f32 %v1481_v47, 0.0  ;;  %v5840_v47 = vld [vmem:[%s7684_s5] sm:$0xff] }
 0x23b   :  { %3249 = vmatpush.bf16.msrb.mxu0 %v5801_v14  ;;  %3330 = vmatpush.bf16.msrb.mxu1 %v5809_v2  ;;  %v1184_v37 = vmax.f32 %v7695_v51, %v1159_v3  ;;  %v5853_v51 = vld [vmem:[%s7685_s7 + $0x28] sm:$0xff] }
 0x23c   :  { %3411 = vmatpush.bf16.msrb.mxu2 %v5817_v10  ;;  %v1409_v61 = vpop.f32.mrf.mxu2 }
 0x23d   :  { %3492 = vmatpush.bf16.msrb.mxu3 %v5825_v9  ;;  %v1533_v14 = vmax.f32 %v1184_v37, %v1508_v38 }
 0x23e   :  { %v1653_v35 = vpop.f32.mrf.mxu0 }
 0x23f   :  { %3250 = vmatpush.bf16.msrb.mxu0 %v5800_v28  ;;  %3331 = vmatpush.bf16.msrb.mxu1 %v5808_v15  ;;  %v1482_v17 = vpop.f32.mrf.mxu3  ;;  %v1714_v55 = vpop.f32.mrf.mxu1  ;;  %v3501_v9 = vpack.c.bf16 %v1533_v14, %v1533_v14 }
 0x240   :  { %3412 = vmatpush.bf16.msrb.mxu2 %v5816_v39  ;;  %v1715_v22 = vadd.f32 %v1714_v55, %v1653_v35  ;;  %v5847_v55 = vld [vmem:[%s7684_s5 + $0x38] sm:$0xff] }
 0x241   :  { %3493 = vmatpush.bf16.msrb.mxu3 %v5824_v46 }
 0x242   :  { %3251 = vmatmul.bf16.vlgmr.msrb.gmra.mxu0 %v3177_v13  ;;  %3332 = vmatmul.bf16.vlgmr.msrb.gmra.mxu1 %v3258_v59 }
 0x243   :  { %3567 = vmatpush.bf16.msra.mxu0 %v5839_v56  ;;  %3413 = vmatmul.bf16.vlgmr.msrb.gmra.mxu2 %v3339_v7 }
 0x244   :  { %3494 = vmatmul.bf16.vlgmr.msrb.gmra.mxu3 %v3420_v50  ;;  %v1794_v0 = vpop.f32.mrf.mxu2  ;;  %3656 = vmatpush.bf16.msra.mxu1 %v5847_v55 }
 0x245   :  { %v1798_v6 = vadd.f32 %v1794_v0, %v1715_v22 }
 0x246   :  { %v1655_v62 = vpop.f32.mrf.mxu0 }
 0x247   :  { %3568 = vmatpush.bf16.msra.mxu0 %v5838_v53  ;;  %v1875_v42 = vpop.f32.mrf.mxu3  ;;  %v1716_v25 = vpop.f32.mrf.mxu1 }
 0x248   :  { %v1879_v60 = vadd.f32 %v1875_v42, %v1798_v6  ;;  %v5844_v6 = vld [vmem:[%s7684_s5 + $0x20] sm:$0xff] }
 0x24b   :  { %3569 = vmatpush.bf16.msra.mxu0 %v5837_v19 }
 0x24c   :  { %v1796_v29 = vpop.f32.mrf.mxu2 }
 0x24e   :  { %v1956_v33 = vpop.f32.mrf.mxu0 }
 0x24f   :  { %3570 = vmatpush.bf16.msra.mxu0 %v5836_v34  ;;  %v1877_v32 = vpop.f32.mrf.mxu3  ;;  %v2037_v4 = vpop.f32.mrf.mxu1  ;;  %v1960_v18 = vadd.f32 %v1956_v33, %v1879_v60  ;;  %v5846_v34 = vld [vmem:[%s7684_s5 + $0x30] sm:$0xff]  ;;  %v5841_v60 = vld [vmem:[%s7684_s5 + $0x8] sm:$0xff]  ;;  %v5855_v33 = vld [vmem:[%s7685_s7 + $0x38] sm:$0xff] }
 0x250   :  { %3657 = vmatpush.bf16.msra.mxu1 %v5846_v34  ;;  %3739 = vmatpush.bf16.msra.mxu2 %v5855_v33 }
 0x251   :  { %v2041_v40 = vadd.f32 %v2037_v4, %v1960_v18  ;;  %v5854_v18 = vld [vmem:[%s7685_s7 + $0x30] sm:$0xff] }
 0x253   :  { %3571 = vmatpush.bf16.msra.mxu0 %v5835_v41  ;;  %v5843_v41 = vld [vmem:[%s7684_s5 + $0x18] sm:$0xff] }
 0x254   :  { %3658 = vmatpush.bf16.msra.mxu1 %v5845_v58  ;;  %3740 = vmatpush.bf16.msra.mxu2 %v5854_v18 }
 0x255   :  { %v2118_v2 = vpop.f32.mrf.mxu2 }
 0x256   :  { %v2122_v49 = vadd.f32 %v2118_v2, %v2041_v40  ;;  %v1958_v21 = vpop.f32.mrf.mxu0  ;;  %v5852_v2 = vld [vmem:[%s7685_s7 + $0x20] sm:$0xff] }
 0x257   :  { %3572 = vmatpush.bf16.msra.mxu0 %v5834_v30  ;;  %v2199_v24 = vpop.f32.mrf.mxu3  ;;  %v2039_v10 = vpop.f32.mrf.mxu1 }
 0x258   :  { %v2203_v27 = vadd.f32 %v2199_v24, %v2122_v49  ;;  %3659 = vmatpush.bf16.msra.mxu1 %v5844_v6  ;;  %3741 = vmatpush.bf16.msra.mxu2 %v5853_v51  ;;  %v5851_v49 = vld [vmem:[%s7685_s7 + $0x18] sm:$0xff] }
 0x25b   :  { %3573 = vmatpush.bf16.msra.mxu0 %v5833_v16 }
 0x25c   :  { %3660 = vmatpush.bf16.msra.mxu1 %v5843_v41  ;;  %3742 = vmatpush.bf16.msra.mxu2 %v5852_v2 }
 0x25d   :  { %v2120_v1 = vpop.f32.mrf.mxu2 }
 0x25e   :  { %v5857_v1 = vld [vmem:[%s7682_s4] ss:$0 sm:$0xff] }
 0x25f   :  { %3574 = vmatpush.bf16.msra.mxu0 %v5832_v11  ;;  %v2201_v31 = vpop.f32.mrf.mxu3  ;;  %v2280_v23 = vpop.f32.mrf.mxu0 }
 0x260   :  { %v2361_v20 = vpop.f32.mrf.mxu1  ;;  %v2284_v45 = vadd.f32 %v2280_v23, %v2203_v27  ;;  %3661 = vmatpush.bf16.msra.mxu1 %v5842_v63  ;;  %3743 = vmatpush.bf16.msra.mxu2 %v5851_v49 }
 0x262   :  { %3575 = vmatmul.bf16.vlgmr.msra.gmra.mxu0 %v3501_v9  ;;  %v2365_v36 = vadd.f32 %v2361_v20, %v2284_v45  ;;  %v5850_v9 = vld [vmem:[%s7685_s7 + $0x10] sm:$0xff] }
 0x264   :  { %3662 = vmatpush.bf16.msra.mxu1 %v5841_v60  ;;  %3744 = vmatpush.bf16.msra.mxu2 %v5850_v9 }
 0x267   :  { %v2523_v52 = vpop.f32.mrf.mxu3  ;;  %v2282_v26 = vpop.f32.mrf.mxu0 }
 0x268   :  { %v2442_v57 = vpop.f32.mrf.mxu2  ;;  %v2363_v28 = vpop.f32.mrf.mxu1  ;;  %3663 = vmatpush.bf16.msra.mxu1 %v5840_v47  ;;  %v5858_v26 = vld [vmem:[%s7683_s6] ss:$0 sm:$0xff] }
 0x269   :  { %v2446_v48 = vadd.f32 %v2442_v57, %v2365_v36 }
 0x26b   :  { %v2527_v15 = vadd.f32 %v2523_v52, %v2446_v48  ;;  %v5849_v52 = vld [vmem:[%s7685_s7 + $0x8] sm:$0xff]  ;;  %v5848_v48 = vld [vmem:[%s7685_s7] sm:$0xff] }
 0x26c   :  { %3745 = vmatpush.bf16.msra.mxu2 %v5849_v52 }
 0x26f   :  { %v2525_v44 = vpop.f32.mrf.mxu3 }
 0x270   :  { %v2444_v8 = vpop.f32.mrf.mxu2  ;;  %3746 = vmatpush.bf16.msra.mxu2 %v5848_v48 }
 0x27f   :  { %v2604_v39 = vpop.f32.mrf.mxu0  ;;  %v2685_v46 = vpop.f32.mrf.mxu1 }
 0x280   :  { %v2608_v54 = vadd.f32 %v2604_v39, %v2527_v15 }
 0x282   :  { %v2689_v43 = vadd.f32 %v2685_v46, %v2608_v54  ;;  %v5859_v46 = vld [vmem:[%s7686_s8] ss:$0 sm:$0xff] }
 0x287   :  { %v2847_v56 = vpop.f32.mrf.mxu3  ;;  %v2606_v13 = vpop.f32.mrf.mxu0 }
 0x288   :  { %v2766_v5 = vpop.f32.mrf.mxu2  ;;  %v2687_v59 = vpop.f32.mrf.mxu1 }
 0x289   :  { %v2770_v50 = vadd.f32 %v2766_v5, %v2689_v43 }
 0x28b   :  { %v2851_v7 = vadd.f32 %v2847_v56, %v2770_v50 }
 0x28f   :  { %v2849_v61 = vpop.f32.mrf.mxu3 }
 0x290   :  { %v2768_v53 = vpop.f32.mrf.mxu2 }
 0x29f   :  { %v2928_v17 = vpop.f32.mrf.mxu0  ;;  %v3009_v35 = vpop.f32.mrf.mxu1 }
 0x2a0   :  { %v2932_v29 = vadd.f32 %v2928_v17, %v2851_v7 }
 0x2a2   :  { %v3013_v38 = vadd.f32 %v3009_v35, %v2932_v29 }
 0x2a7   :  { %v3171_v22 = vpop.f32.mrf.mxu3  ;;  %v2930_v0 = vpop.f32.mrf.mxu0 }
 0x2a8   :  { %v3090_v19 = vpop.f32.mrf.mxu2  ;;  %v3011_v42 = vpop.f32.mrf.mxu1 }
 0x2a9   :  { %v3094_v40 = vadd.f32 %v3090_v19, %v3013_v38 }
 0x2ab   :  { %v3175_v14 = vadd.f32 %v3171_v22, %v3094_v40 }
 0x2af   :  { %v3173_v25 = vpop.f32.mrf.mxu3 }
 0x2b0   :  { %v3092_v62 = vpop.f32.mrf.mxu2 }
 0x2bf   :  { %v3252_v12 = vpop.f32.mrf.mxu0  ;;  %v3333_v30 = vpop.f32.mrf.mxu1 }
 0x2c0   :  { %v3256_v24 = vadd.f32 %v3252_v12, %v3175_v14 }
 0x2c2   :  { %v3337_v21 = vadd.f32 %v3333_v30, %v3256_v24 }
 0x2c6   :  { %v3414_v32 = vpop.f32.mrf.mxu2 }
 0x2c7   :  { %v3495_v3 = vpop.f32.mrf.mxu3  ;;  %v3254_v4 = vpop.f32.mrf.mxu0  ;;  %v3418_v10 = vadd.f32 %v3414_v32, %v3337_v21 }
 0x2c8   :  { %v3335_v16 = vpop.f32.mrf.mxu1 }
 0x2c9   :  { %v3499_v27 = vadd.f32 %v3495_v3, %v3418_v10 }
 0x2ce   :  { %v3416_v37 = vpop.f32.mrf.mxu2 }
 0x2cf   :  { %v3497_v11 = vpop.f32.mrf.mxu3 }
 0x2df   :  { %v3576_v31 = vpop.f32.mrf.mxu0 }
 0x2e0   :  { %v3580_v23 = vadd.f32 %v3576_v31, %v3499_v27 }
 0x2e2   :  { %v3585_v20 = vadd.f32 %v5857_v1, %v3580_v23 }
 0x2e4   :  { %v3586_v45 = vmax.f32 %v3585_v20, 0.0 }
 0x2e6   :  { %v3587_v36 = vpack.c.bf16 %v3586_v45, %v3586_v45 }
 0x2e7   :  { %v3578_v57 = vpop.f32.mrf.mxu0 }
 0x2e8   :  { %3664 = vmatmul.bf16.vlgmr.msra.gmra.mxu1 %v3587_v36 }
 0x365   :  { %v3665_v28 = vpop.f32.mrf.mxu1 }
 0x366   :  { %v3666_v15 = vadd.f32 %v5858_v26, %v3665_v28 }
 0x368   :  { %v3669_v8 = vmax.f32 %v3666_v15, 0.0 }
 0x36a   :  { %v3670_v44 = vpack.c.bf16 %v3669_v8, %v3669_v8 }
 0x36c   :  { %3747 = vmatmul.bf16.vlgmr.msra.gmra.mxu2 %v3670_v44 }
 0x36d   :  { %v3667_v39 = vpop.f32.mrf.mxu1 }
 0x3ef   :  { %v3748_v54 = vpop.f32.mrf.mxu2 }
 0x3f0   :  { %v3749_v43 = vadd.f32 %v5859_v46, %v3748_v54 }
 0x3f2   :  { %3752 = vst [vmem:[%s7687_s9] sm:$0xff] %v3749_v43 }
 0x3f7   :  { %v3750_v5 = vpop.f32.mrf.mxu2 }

</bundles_post_ra>
